<compile_context>
chip_gen: v6e
topology: v6e:2x2x1
jax: 0.10.0
libtpu: 0.0.40
codegen_flags: <defaults>
</compile_context>

<pallas_src>
import functools

import jax
import jax.numpy as jnp
from jax.experimental import pallas as pl
from jax.experimental.pallas import tpu as pltpu

_BN_EPS = 1e-5
_TM_MAX = 256              # max patch-rows per MXU tile (good for 256-wide v6e/v7x MXU)
_TK_MAX = 2048             # single K block up to this size; beyond -> 512-wide K tiles
_VMEM_LIMIT_BYTES = 32 * 1024 * 1024   # safe on v5e/v6e (128 MiB) and v7x (64 MiB)


def _round_up(x, m):
    return (x + m - 1) // m * m


# --------------------------------------------------------------------------
# Fused tiled matmul kernel: out = (A @ B) * scale + bias (+ReLU) (+resid, ReLU)
# --------------------------------------------------------------------------
def _mm_bn_kernel(a_ref, b_ref, s_ref, c_ref, *refs, relu, has_resid):
    if has_resid:
        r_ref, o_ref, acc_ref = refs
    else:
        o_ref, acc_ref = refs

    @pl.when(pl.program_id(2) == 0)
    def _init():
        acc_ref[...] = jnp.zeros_like(acc_ref)

    # bf16 x bf16 -> f32 accumulation on the MXU.
    acc_ref[...] += jnp.dot(a_ref[...], b_ref[...],
                            preferred_element_type=jnp.float32)

    @pl.when(pl.program_id(2) == pl.num_programs(2) - 1)
    def _epilogue():
        out = acc_ref[...] * s_ref[...] + c_ref[...]
        if relu:
            out = jnp.maximum(out, 0.0)
        if has_resid:  # residual add + second ReLU (BasicBlock tail)
            out = jnp.maximum(out + r_ref[...].astype(jnp.float32), 0.0)
        o_ref[...] = out.astype(o_ref.dtype)


def matmul_bn_act(a, b, scale, bias, *, relu=False, residual=None,
                  out_dtype=jnp.bfloat16):
    """Fused (A @ B) * scale + bias (+ReLU) (+residual add + ReLU).

    A: (M, K) patches/activations, B: (K, N) weights -> cast to bf16 for MXU.
    scale/bias: (N,) f32 (folded BatchNorm).  residual: optional (M, N).
    Tiled over (M, N, K) with an f32 VMEM accumulator and pl.when init/finalize.
    """
    M, K = a.shape
    K2, N = b.shape
    assert K == K2

    # Tile selection: single full-dim tile when small (legal for any size),
    # otherwise pad to tile multiples and slice the output back.
    if M <= _TM_MAX:
        tm, Mp = M, M
    else:
        tm = _TM_MAX
        Mp = _round_up(M, tm)
    tn, Np = N, N                      # N is 32..256 in this model: one lane tile
    if K <= _TK_MAX:
        tk, Kp = K, K
    else:
        tk = 512
        Kp = _round_up(K, tk)

    a = a.astype(jnp.bfloat16)
    b = b.astype(jnp.bfloat16)
    if (Mp, Kp) != (M, K):
        a = jnp.pad(a, ((0, Mp - M), (0, Kp - K)))
    if Kp != K:
        b = jnp.pad(b, ((0, Kp - K), (0, 0)))
    s2 = scale.reshape(1, N).astype(jnp.float32)
    c2 = bias.reshape(1, N).astype(jnp.float32)

    has_resid = residual is not None
    inputs = [a, b, s2, c2]
    in_specs = [
        pl.BlockSpec((tm, tk), lambda i, j, k: (i, k)),
        pl.BlockSpec((tk, tn), lambda i, j, k: (k, j)),
        pl.BlockSpec((1, tn), lambda i, j, k: (0, j)),
        pl.BlockSpec((1, tn), lambda i, j, k: (0, j)),
    ]
    if has_resid:
        r = residual.astype(jnp.bfloat16)
        if Mp != M:
            r = jnp.pad(r, ((0, Mp - M), (0, 0)))
        inputs.append(r)
        in_specs.append(pl.BlockSpec((tm, tn), lambda i, j, k: (i, j)))

    kern = functools.partial(_mm_bn_kernel, relu=relu, has_resid=has_resid)
    out = pl.pallas_call(
        kern,
        out_shape=jax.ShapeDtypeStruct((Mp, Np), out_dtype),
        grid=(Mp // tm, Np // tn, Kp // tk),
        in_specs=in_specs,
        out_specs=pl.BlockSpec((tm, tn), lambda i, j, k: (i, j)),
        scratch_shapes=[pltpu.VMEM((tm, tn), jnp.float32)],
        compiler_params=pltpu.CompilerParams(
            dimension_semantics=("parallel", "parallel", "arbitrary"),
            vmem_limit_bytes=_VMEM_LIMIT_BYTES,
        ),
    )(*inputs)
    if Mp != M:
        out = out[:M]
    return out


# --------------------------------------------------------------------------
# 2x2 max-pool: one Pallas kernel, grid over batch (parallel)
# --------------------------------------------------------------------------
def _maxpool_kernel(x_ref, o_ref):
    x = x_ref[...]                                 # (1, OH, 2, OW, 2, C)
    m = jnp.max(x, axis=4, keepdims=True)          # reduce window-cols (sublane)
    m = jnp.max(m, axis=2, keepdims=True)          # reduce window-rows (major dim)
    o_ref[...] = m                                 # (1, OH, 1, OW, 1, C)


def maxpool2x2(x):
    """MaxPool2d(kernel=2, stride=2) on an NHWC tensor in a single Pallas call."""
    N, H, W, C = x.shape
    OH, OW = H // 2, W // 2
    x6 = x.reshape(N, OH, 2, OW, 2, C)             # free reshape (contiguous)
    out = pl.pallas_call(
        _maxpool_kernel,
        out_shape=jax.ShapeDtypeStruct((N, OH, 1, OW, 1, C), x.dtype),
        grid=(N,),
        in_specs=[pl.BlockSpec((1, OH, 2, OW, 2, C),
                               lambda n: (n, 0, 0, 0, 0, 0))],
        out_specs=pl.BlockSpec((1, OH, 1, OW, 1, C),
                               lambda n: (n, 0, 0, 0, 0, 0)),
        compiler_params=pltpu.CompilerParams(dimension_semantics=("parallel",)),
    )(x6)
    return out.reshape(N, OH, OW, C)


# --------------------------------------------------------------------------
# Fused FC head: global avg-pool + (Linear+BN1d+ReLU) x2 + Linear(+bias)
# --------------------------------------------------------------------------
def _fc_head_kernel(x_ref, w1_ref, s1_ref, b1_ref, w2_ref, s2_ref, b2_ref,
                    w3_ref, b3_ref, o_ref):
    x = x_ref[...].astype(jnp.float32)                       # (N, HW, C)
    pooled = jnp.mean(x, axis=1)                             # AdaptiveAvgPool2d((1,1))
    h = jnp.dot(pooled.astype(jnp.bfloat16), w1_ref[...],
                preferred_element_type=jnp.float32)
    h = jnp.maximum(h * s1_ref[...] + b1_ref[...], 0.0)      # BN1d + ReLU (Dropout=id)
    h = jnp.dot(h.astype(jnp.bfloat16), w2_ref[...],
                preferred_element_type=jnp.float32)
    h = jnp.maximum(h * s2_ref[...] + b2_ref[...], 0.0)
    out = jnp.dot(h.astype(jnp.bfloat16), w3_ref[...],
                  preferred_element_type=jnp.float32) + b3_ref[...]
    o_ref[...] = out


def _full_spec(x):
    return pl.BlockSpec(x.shape, lambda i: (0,) * x.ndim)


def fc_head(x3, hp):
    """x3: (N, H*W, C) activations.  All FC weights stay resident in VMEM."""
    N, HW, C = x3.shape
    out_dim = hp["w3"].shape[1]
    inputs = [
        x3.astype(jnp.bfloat16),
        hp["w1"], hp["s1"].reshape(1, -1), hp["b1"].reshape(1, -1),
        hp["w2"], hp["s2"].reshape(1, -1), hp["b2"].reshape(1, -1),
        hp["w3"], hp["b3"].reshape(1, -1),
    ]
    return pl.pallas_call(
        _fc_head_kernel,
        out_shape=jax.ShapeDtypeStruct((N, out_dim), jnp.float32),
        grid=(1,),
        in_specs=[_full_spec(v) for v in inputs],
        out_specs=pl.BlockSpec((N, out_dim), lambda i: (0, 0)),
    )(*inputs)


# --------------------------------------------------------------------------
# Plain-JAX glue (layout / patch extraction / parameter folding)
# --------------------------------------------------------------------------
def _im2col(x, kh, kw, stride, pad):
    """x: (N, H, W, C) NHWC -> patches (N*OH*OW, KH*KW*C)."""
    # TODO(synk): fuse patch extraction into the conv kernel (K-grid over taps /
    # shifted-window DMA) to avoid materializing the kh*kw-x patch matrix in HBM.
    N, H, W, C = x.shape
    xp = jnp.pad(x, ((0, 0), (pad, pad), (pad, pad), (0, 0))) if pad else x
    OH = (H + 2 * pad - kh) // stride + 1
    OW = (W + 2 * pad - kw) // stride + 1
    cols = []
    for i in range(kh):
        for j in range(kw):
            cols.append(xp[:, i:i + stride * OH:stride, j:j + stride * OW:stride, :])
    patches = jnp.stack(cols, axis=3)            # (N, OH, OW, KH*KW, C)
    return patches.reshape(N * OH * OW, kh * kw * C), (N, OH, OW)


def _fold_bn(bn, conv_bias=None):
    scale = bn["gamma"] / jnp.sqrt(bn["var"] + _BN_EPS)
    cb = conv_bias if conv_bias is not None else 0.0
    bias = (cb - bn["mean"]) * scale + bn["beta"]
    return scale.astype(jnp.float32), bias.astype(jnp.float32)


def conv_bn_act(x, cp, *, stride, pad, relu, residual=None):
    """Conv2d + BatchNorm2d (+ReLU) (+residual add+ReLU) via im2col + fused matmul."""
    kh, kw, ic, oc = cp["w"].shape
    patches, (N, OH, OW) = _im2col(x, kh, kw, stride, pad)
    w_mat = cp["w"].reshape(kh * kw * ic, oc)     # free reshape; already bf16
    res = residual.reshape(N * OH * OW, oc) if residual is not None else None
    out = matmul_bn_act(patches, w_mat, cp["scale"], cp["bias"],
                        relu=relu, residual=res)
    return out.reshape(N, OH, OW, oc)


def basic_block(x, p, *, stride):
    """ResNet BasicBlock exactly as in the reference: conv1/bn1/relu,
    conv2(stride)/bn2/relu, then residual add + relu (fused into conv2)."""
    out = conv_bn_act(x, p["conv1"], stride=1, pad=1, relu=True)
    if "down" in p:
        identity = conv_bn_act(x, p["down"], stride=stride, pad=0, relu=False)
    else:
        identity = x
    out = conv_bn_act(out, p["conv2"], stride=stride, pad=1, relu=True,
                      residual=identity)
    return out


def patch2d_forward(x_nchw, prep, *, out_shape):
    x = jnp.transpose(x_nchw, (0, 2, 3, 1)).astype(jnp.bfloat16)  # NCHW -> NHWC
    # Stem: conv 7x7 s2 p3 (with bias) + BN + ReLU, then MaxPool 2x2.
    x = conv_bn_act(x, prep["stem"], stride=2, pad=3, relu=True)
    x = maxpool2x2(x)
    # layer1: 2 blocks, 64 -> 64, stride 1
    x = basic_block(x, prep["layer1"][0], stride=1)
    x = basic_block(x, prep["layer1"][1], stride=1)
    # layer2: 2 blocks, 64 -> 128, stride 2 (first block has downsample)
    x = basic_block(x, prep["layer2"][0], stride=2)
    x = basic_block(x, prep["layer2"][1], stride=1)
    # AvgPool + FC head in a single fused kernel.
    N, H, W, C = x.shape
    out = fc_head(x.reshape(N, H * W, C), prep["head"])          # (N, prod(out))
    return out.reshape(-1, out_shape[0], out_shape[1])


# --------------------------------------------------------------------------
# Parameter preparation (fold BN, pre-cast weights to bf16 once, outside jit)
# --------------------------------------------------------------------------
def _prep_conv(w_oihw, bn, conv_bias=None):
    oc, ic, kh, kw = w_oihw.shape
    w = jnp.transpose(w_oihw, (2, 3, 1, 0)).astype(jnp.bfloat16)   # (kh,kw,ic,oc)
    scale, bias = _fold_bn(bn, conv_bias)
    return dict(w=w, scale=scale, bias=bias)


def prepare_params(params):
    prep = dict(stem=_prep_conv(params["conv1_w"], params["bn1"], params["conv1_b"]))
    for name in ("layer1", "layer2"):
        blocks = []
        for bp in params[name]:
            b = dict(conv1=_prep_conv(bp["conv1_w"], bp["bn1"]),
                     conv2=_prep_conv(bp["conv2_w"], bp["bn2"]))
            if "down_w" in bp:
                b["down"] = _prep_conv(bp["down_w"], bp["down_bn"])
            blocks.append(b)
        prep[name] = blocks
    s1, b1 = _fold_bn(params["fc_bn1"])
    s2, b2 = _fold_bn(params["fc_bn2"])
    prep["head"] = dict(
        w1=params["fc1_w"].T.astype(jnp.bfloat16), s1=s1, b1=b1,
        w2=params["fc2_w"].T.astype(jnp.bfloat16), s2=s2, b2=b2,
        w3=params["fc3_w"].T.astype(jnp.bfloat16),
        b3=params["fc3_b"].astype(jnp.float32))
    return prep


# --------------------------------------------------------------------------
# Deterministic parameter initialization (shapes from the PyTorch __init__)
# --------------------------------------------------------------------------
def _init_conv(key, oc, ic, kh, kw):
    fan_out = oc * kh * kw
    std = (2.0 / fan_out) ** 0.5
    return jax.random.normal(key, (oc, ic, kh, kw), jnp.float32) * std


def _init_bn(c):
    return dict(gamma=jnp.ones((c,), jnp.float32), beta=jnp.zeros((c,), jnp.float32),
                mean=jnp.zeros((c,), jnp.float32), var=jnp.ones((c,), jnp.float32))


def _init_linear(key, out_f, in_f):
    bound = 1.0 / (in_f ** 0.5)
    return jax.random.uniform(key, (out_f, in_f), jnp.float32, -bound, bound)


def init_params(out_shape, key):
    c_in = out_shape[0]
    out_dim = out_shape[0] * out_shape[1]
    ks = iter(jax.random.split(key, 32))
    p = {}
    p["conv1_w"] = _init_conv(next(ks), 64, c_in, 7, 7)
    p["conv1_b"] = jax.random.uniform(next(ks), (64,), jnp.float32, -0.05, 0.05)
    p["bn1"] = _init_bn(64)

    def make_block(ic, oc, downsample):
        blk = dict(conv1_w=_init_conv(next(ks), oc, ic, 3, 3), bn1=_init_bn(oc),
                   conv2_w=_init_conv(next(ks), oc, oc, 3, 3), bn2=_init_bn(oc))
        if downsample:
            blk["down_w"] = _init_conv(next(ks), oc, ic, 1, 1)
            blk["down_bn"] = _init_bn(oc)
        return blk

    p["layer1"] = [make_block(64, 64, False), make_block(64, 64, False)]
    p["layer2"] = [make_block(64, 128, True), make_block(128, 128, False)]

    p["fc1_w"] = _init_linear(next(ks), 256, 128)
    p["fc_bn1"] = _init_bn(256)
    p["fc2_w"] = _init_linear(next(ks), 256, 256)
    p["fc_bn2"] = _init_bn(256)
    p["fc3_w"] = _init_linear(next(ks), out_dim, 256)
    p["fc3_b"] = jax.random.uniform(next(ks), (out_dim,), jnp.float32,
                                    -1.0 / 16.0, 1.0 / 16.0)
    return p


# --------------------------------------------------------------------------
if __name__ == "__main__":
    output_shape = [4, 8]  # -> in_channels = 4, fc output = 32, result (N, 4, 8)
    key = jax.random.PRNGKey(0)
    pkey, xkey = jax.random.split(key)
    params = init_params(output_shape, pkey)
    prep = prepare_params(params)   # fold BN + bf16 weight matrices, once

    # Input matches PyTorch NCHW: (batch=2, channels=output_shape[0]=4, 16, 16)
    x = jax.random.normal(xkey, (2, output_shape[0], 16, 16), jnp.float32)

    fwd = jax.jit(functools.partial(patch2d_forward, out_shape=tuple(output_shape)))
    y = fwd(x, prep)
    jax.block_until_ready(y)
    assert y.shape == (2, output_shape[0], output_shape[1]), y.shape
    assert y.dtype == jnp.float32
    print("KERNEL_OK")
</pallas_src>

<mosaic_0001>
module attributes {stable_mosaic.version = 11 : i64} {
  func.func @_mm_bn_kernel(%arg0: i32, %arg1: i32, %arg2: i32, %arg3: memref<128x196xbf16, #tpu.memory_space<vmem>>, %arg4: memref<196x64xbf16, #tpu.memory_space<vmem>>, %arg5: memref<1x64xf32, #tpu.memory_space<vmem>>, %arg6: memref<1x64xf32, #tpu.memory_space<vmem>>, %arg7: memref<128x64xbf16, #tpu.memory_space<vmem>>, %arg8: memref<128x64xf32, #tpu.memory_space<vmem>>) attributes {dimension_semantics = [#tpu.dimension_semantics<parallel>, #tpu.dimension_semantics<parallel>, #tpu.dimension_semantics<arbitrary>], iteration_bounds = array<i64: 1, 1, 1>, scalar_prefetch = 0 : i64, scratch_operands = 1 : i64, tpu.core_type = #tpu.core_type<tc>, window_params = [{transform_indices = @transform_0, window_bounds = array<i64: 128, 196>}, {transform_indices = @transform_1, window_bounds = array<i64: 196, 64>}, {transform_indices = @transform_2, window_bounds = array<i64: 1, 64>}, {transform_indices = @transform_3, window_bounds = array<i64: 1, 64>}, {transform_indices = @transform_4, window_bounds = array<i64: 128, 64>}]} {
    %c0_i32 = arith.constant 0 : i32
    %0 = arith.cmpi eq, %arg2, %c0_i32 : i32
    %1 = arith.extui %0 : i1 to i32
    %c0_i32_0 = arith.constant 0 : i32
    %2 = arith.cmpi ne, %1, %c0_i32_0 : i32
    scf.if %2 {
      %cst_10 = arith.constant 0.000000e+00 : f32
      %12 = vector.broadcast %cst_10 : f32 to vector<128x64xf32>
      %c0_11 = arith.constant 0 : index
      %c0_12 = arith.constant 0 : index
      %13 = vector.load %arg8[%c0_11, %c0_12] : memref<128x64xf32, #tpu.memory_space<vmem>>, vector<128x64xf32>
      tpu.vector_store %arg8[%c0_11, %c0_12], %12 {strides = array<i32>} : memref<128x64xf32, #tpu.memory_space<vmem>>, vector<128x64xf32>,
    } else {
    }
    %c0 = arith.constant 0 : index
    %c0_1 = arith.constant 0 : index
    %3 = vector.load %arg8[%c0, %c0_1] : memref<128x64xf32, #tpu.memory_space<vmem>>, vector<128x64xf32>
    %c0_2 = arith.constant 0 : index
    %c0_3 = arith.constant 0 : index
    %4 = vector.load %arg3[%c0_2, %c0_3] : memref<128x196xbf16, #tpu.memory_space<vmem>>, vector<128x196xbf16>
    %c0_4 = arith.constant 0 : index
    %c0_5 = arith.constant 0 : index
    %5 = vector.load %arg4[%c0_4, %c0_5] : memref<196x64xbf16, #tpu.memory_space<vmem>>, vector<196x64xbf16>
    %cst = arith.constant dense<0.000000e+00> : vector<128x64xf32>
    %6 = tpu.matmul %4, %5, %cst {dimension_numbers = #tpu.dot_dimension_numbers<[1], [0], [0], [1], [0, 0, 1, 1], [], []>} : vector<128x196xbf16>, vector<196x64xbf16>, vector<128x64xf32> -> vector<128x64xf32>
    %7 = arith.addf %3, %6 : vector<128x64xf32>
    %c0_6 = arith.constant 0 : index
    %c0_7 = arith.constant 0 : index
    %8 = vector.load %arg8[%c0_6, %c0_7] : memref<128x64xf32, #tpu.memory_space<vmem>>, vector<128x64xf32>
    tpu.vector_store %arg8[%c0_6, %c0_7], %7 {strides = array<i32>} : memref<128x64xf32, #tpu.memory_space<vmem>>, vector<128x64xf32>,
    %c0_i32_8 = arith.constant 0 : i32
    %9 = arith.cmpi eq, %arg2, %c0_i32_8 : i32
    %10 = arith.extui %9 : i1 to i32
    %c0_i32_9 = arith.constant 0 : i32
    %11 = arith.cmpi ne, %10, %c0_i32_9 : i32
    scf.if %11 {
      %c0_10 = arith.constant 0 : index
      %c0_11 = arith.constant 0 : index
      %12 = vector.load %arg8[%c0_10, %c0_11] : memref<128x64xf32, #tpu.memory_space<vmem>>, vector<128x64xf32>
      %c0_12 = arith.constant 0 : index
      %c0_13 = arith.constant 0 : index
      %13 = vector.load %arg5[%c0_12, %c0_13] : memref<1x64xf32, #tpu.memory_space<vmem>>, vector<1x64xf32>
      %14 = vector.broadcast %13 : vector<1x64xf32> to vector<128x64xf32>
      %15 = arith.mulf %12, %14 : vector<128x64xf32>
      %c0_14 = arith.constant 0 : index
      %c0_15 = arith.constant 0 : index
      %16 = vector.load %arg6[%c0_14, %c0_15] : memref<1x64xf32, #tpu.memory_space<vmem>>, vector<1x64xf32>
      %17 = vector.broadcast %16 : vector<1x64xf32> to vector<128x64xf32>
      %18 = arith.addf %15, %17 : vector<128x64xf32>
      %cst_16 = arith.constant 0.000000e+00 : f32
      %19 = vector.broadcast %cst_16 : f32 to vector<128x64xf32>
      %20 = arith.maximumf %18, %19 : vector<128x64xf32>
      %21 = arith.truncf %20 : vector<128x64xf32> to vector<128x64xbf16>
      %c0_17 = arith.constant 0 : index
      %c0_18 = arith.constant 0 : index
      %22 = vector.load %arg7[%c0_17, %c0_18] : memref<128x64xbf16, #tpu.memory_space<vmem>>, vector<128x64xbf16>
      tpu.vector_store %arg7[%c0_17, %c0_18], %21 {strides = array<i32>} : memref<128x64xbf16, #tpu.memory_space<vmem>>, vector<128x64xbf16>,
    } else {
    }
    return
  }
  func.func @transform_0(%arg0: i32, %arg1: i32, %arg2: i32) -> (i32, i32) {
    %c0_i32 = arith.constant 0 : i32
    return %arg0, %arg2 : i32, i32
  }
  func.func @transform_1(%arg0: i32, %arg1: i32, %arg2: i32) -> (i32, i32) {
    %c0_i32 = arith.constant 0 : i32
    return %arg2, %arg1 : i32, i32
  }
  func.func @transform_2(%arg0: i32, %arg1: i32, %arg2: i32) -> (i32, i32) {
    %c0_i32 = arith.constant 0 : i32
    %c0_i32_0 = arith.constant 0 : i32
    return %c0_i32, %arg1 : i32, i32
  }
  func.func @transform_3(%arg0: i32, %arg1: i32, %arg2: i32) -> (i32, i32) {
    %c0_i32 = arith.constant 0 : i32
    %c0_i32_0 = arith.constant 0 : i32
    return %c0_i32, %arg1 : i32, i32
  }
  func.func @transform_4(%arg0: i32, %arg1: i32, %arg2: i32) -> (i32, i32) {
    %c0_i32 = arith.constant 0 : i32
    return %arg0, %arg1 : i32, i32
  }
}

module attributes {stable_mosaic.version = 11 : i64} {
  func.func @_maxpool_kernel(%arg0: i32, %arg1: memref<1x4x2x4x2x64xbf16, #tpu.memory_space<vmem>>, %arg2: memref<1x4x1x4x1x64xbf16, #tpu.memory_space<vmem>>) attributes {dimension_semantics = [#tpu.dimension_semantics<parallel>], iteration_bounds = array<i64: 2>, scalar_prefetch = 0 : i64, scratch_operands = 0 : i64, tpu.core_type = #tpu.core_type<tc>, window_params = [{transform_indices = @transform_0, window_bounds = array<i64: 1, 4, 2, 4, 2, 64>}, {transform_indices = @transform_1, window_bounds = array<i64: 1, 4, 1, 4, 1, 64>}]} {
    %c0 = arith.constant 0 : index
    %c0_0 = arith.constant 0 : index
    %c0_1 = arith.constant 0 : index
    %c0_2 = arith.constant 0 : index
    %c0_3 = arith.constant 0 : index
    %c0_4 = arith.constant 0 : index
    %0 = vector.load %arg1[%c0, %c0_0, %c0_1, %c0_2, %c0_3, %c0_4] : memref<1x4x2x4x2x64xbf16, #tpu.memory_space<vmem>>, vector<1x4x2x4x2x64xbf16>
    %cst = arith.constant dense<0xFF80> : vector<1x4x2x4x64xbf16>
    %1 = vector.multi_reduction <maximumf>, %0, %cst [4] : vector<1x4x2x4x2x64xbf16> to vector<1x4x2x4x64xbf16>
    %2 = vector.shape_cast %1 : vector<1x4x2x4x64xbf16> to vector<1x4x2x4x1x64xbf16>
    %cst_5 = arith.constant dense<0xFF80> : vector<1x4x4x1x64xbf16>
    %3 = vector.multi_reduction <maximumf>, %2, %cst_5 [2] : vector<1x4x2x4x1x64xbf16> to vector<1x4x4x1x64xbf16>
    %4 = vector.shape_cast %3 : vector<1x4x4x1x64xbf16> to vector<1x4x1x4x1x64xbf16>
    %c0_6 = arith.constant 0 : index
    %c0_7 = arith.constant 0 : index
    %c0_8 = arith.constant 0 : index
    %c0_9 = arith.constant 0 : index
    %c0_10 = arith.constant 0 : index
    %c0_11 = arith.constant 0 : index
    %5 = vector.load %arg2[%c0_6, %c0_7, %c0_8, %c0_9, %c0_10, %c0_11] : memref<1x4x1x4x1x64xbf16, #tpu.memory_space<vmem>>, vector<1x4x1x4x1x64xbf16>
    tpu.vector_store %arg2[%c0_6, %c0_7, %c0_8, %c0_9, %c0_10, %c0_11], %4 {strides = array<i32>} : memref<1x4x1x4x1x64xbf16, #tpu.memory_space<vmem>>, vector<1x4x1x4x1x64xbf16>,
    return
  }
  func.func @transform_0(%arg0: i32) -> (i32, i32, i32, i32, i32, i32) {
    %c0_i32 = arith.constant 0 : i32
    %c0_i32_0 = arith.constant 0 : i32
    %c0_i32_1 = arith.constant 0 : i32
    %c0_i32_2 = arith.constant 0 : i32
    %c0_i32_3 = arith.constant 0 : i32
    %c0_i32_4 = arith.constant 0 : i32
    return %arg0, %c0_i32, %c0_i32_0, %c0_i32_1, %c0_i32_2, %c0_i32_3 : i32, i32, i32, i32, i32, i32
  }
  func.func @transform_1(%arg0: i32) -> (i32, i32, i32, i32, i32, i32) {
    %c0_i32 = arith.constant 0 : i32
    %c0_i32_0 = arith.constant 0 : i32
    %c0_i32_1 = arith.constant 0 : i32
    %c0_i32_2 = arith.constant 0 : i32
    %c0_i32_3 = arith.constant 0 : i32
    %c0_i32_4 = arith.constant 0 : i32
    return %arg0, %c0_i32, %c0_i32_0, %c0_i32_1, %c0_i32_2, %c0_i32_3 : i32, i32, i32, i32, i32, i32
  }
}

module attributes {stable_mosaic.version = 11 : i64} {
  func.func @_mm_bn_kernel(%arg0: i32, %arg1: i32, %arg2: i32, %arg3: memref<32x576xbf16, #tpu.memory_space<vmem>>, %arg4: memref<576x64xbf16, #tpu.memory_space<vmem>>, %arg5: memref<1x64xf32, #tpu.memory_space<vmem>>, %arg6: memref<1x64xf32, #tpu.memory_space<vmem>>, %arg7: memref<32x64xbf16, #tpu.memory_space<vmem>>, %arg8: memref<32x64xf32, #tpu.memory_space<vmem>>) attributes {dimension_semantics = [#tpu.dimension_semantics<parallel>, #tpu.dimension_semantics<parallel>, #tpu.dimension_semantics<arbitrary>], iteration_bounds = array<i64: 1, 1, 1>, scalar_prefetch = 0 : i64, scratch_operands = 1 : i64, tpu.core_type = #tpu.core_type<tc>, window_params = [{transform_indices = @transform_0, window_bounds = array<i64: 32, 576>}, {transform_indices = @transform_1, window_bounds = array<i64: 576, 64>}, {transform_indices = @transform_2, window_bounds = array<i64: 1, 64>}, {transform_indices = @transform_3, window_bounds = array<i64: 1, 64>}, {transform_indices = @transform_4, window_bounds = array<i64: 32, 64>}]} {
    %c0_i32 = arith.constant 0 : i32
    %0 = arith.cmpi eq, %arg2, %c0_i32 : i32
    %1 = arith.extui %0 : i1 to i32
    %c0_i32_0 = arith.constant 0 : i32
    %2 = arith.cmpi ne, %1, %c0_i32_0 : i32
    scf.if %2 {
      %cst_10 = arith.constant 0.000000e+00 : f32
      %12 = vector.broadcast %cst_10 : f32 to vector<32x64xf32>
      %c0_11 = arith.constant 0 : index
      %c0_12 = arith.constant 0 : index
      %13 = vector.load %arg8[%c0_11, %c0_12] : memref<32x64xf32, #tpu.memory_space<vmem>>, vector<32x64xf32>
      tpu.vector_store %arg8[%c0_11, %c0_12], %12 {strides = array<i32>} : memref<32x64xf32, #tpu.memory_space<vmem>>, vector<32x64xf32>,
    } else {
    }
    %c0 = arith.constant 0 : index
    %c0_1 = arith.constant 0 : index
    %3 = vector.load %arg8[%c0, %c0_1] : memref<32x64xf32, #tpu.memory_space<vmem>>, vector<32x64xf32>
    %c0_2 = arith.constant 0 : index
    %c0_3 = arith.constant 0 : index
    %4 = vector.load %arg3[%c0_2, %c0_3] : memref<32x576xbf16, #tpu.memory_space<vmem>>, vector<32x576xbf16>
    %c0_4 = arith.constant 0 : index
    %c0_5 = arith.constant 0 : index
    %5 = vector.load %arg4[%c0_4, %c0_5] : memref<576x64xbf16, #tpu.memory_space<vmem>>, vector<576x64xbf16>
    %cst = arith.constant dense<0.000000e+00> : vector<32x64xf32>
    %6 = tpu.matmul %4, %5, %cst {dimension_numbers = #tpu.dot_dimension_numbers<[1], [0], [0], [1], [0, 0, 1, 1], [], []>} : vector<32x576xbf16>, vector<576x64xbf16>, vector<32x64xf32> -> vector<32x64xf32>
    %7 = arith.addf %3, %6 : vector<32x64xf32>
    %c0_6 = arith.constant 0 : index
    %c0_7 = arith.constant 0 : index
    %8 = vector.load %arg8[%c0_6, %c0_7] : memref<32x64xf32, #tpu.memory_space<vmem>>, vector<32x64xf32>
    tpu.vector_store %arg8[%c0_6, %c0_7], %7 {strides = array<i32>} : memref<32x64xf32, #tpu.memory_space<vmem>>, vector<32x64xf32>,
    %c0_i32_8 = arith.constant 0 : i32
    %9 = arith.cmpi eq, %arg2, %c0_i32_8 : i32
    %10 = arith.extui %9 : i1 to i32
    %c0_i32_9 = arith.constant 0 : i32
    %11 = arith.cmpi ne, %10, %c0_i32_9 : i32
    scf.if %11 {
      %c0_10 = arith.constant 0 : index
      %c0_11 = arith.constant 0 : index
      %12 = vector.load %arg8[%c0_10, %c0_11] : memref<32x64xf32, #tpu.memory_space<vmem>>, vector<32x64xf32>
      %c0_12 = arith.constant 0 : index
      %c0_13 = arith.constant 0 : index
      %13 = vector.load %arg5[%c0_12, %c0_13] : memref<1x64xf32, #tpu.memory_space<vmem>>, vector<1x64xf32>
      %14 = vector.broadcast %13 : vector<1x64xf32> to vector<32x64xf32>
      %15 = arith.mulf %12, %14 : vector<32x64xf32>
      %c0_14 = arith.constant 0 : index
      %c0_15 = arith.constant 0 : index
      %16 = vector.load %arg6[%c0_14, %c0_15] : memref<1x64xf32, #tpu.memory_space<vmem>>, vector<1x64xf32>
      %17 = vector.broadcast %16 : vector<1x64xf32> to vector<32x64xf32>
      %18 = arith.addf %15, %17 : vector<32x64xf32>
      %cst_16 = arith.constant 0.000000e+00 : f32
      %19 = vector.broadcast %cst_16 : f32 to vector<32x64xf32>
      %20 = arith.maximumf %18, %19 : vector<32x64xf32>
      %21 = arith.truncf %20 : vector<32x64xf32> to vector<32x64xbf16>
      %c0_17 = arith.constant 0 : index
      %c0_18 = arith.constant 0 : index
      %22 = vector.load %arg7[%c0_17, %c0_18] : memref<32x64xbf16, #tpu.memory_space<vmem>>, vector<32x64xbf16>
      tpu.vector_store %arg7[%c0_17, %c0_18], %21 {strides = array<i32>} : memref<32x64xbf16, #tpu.memory_space<vmem>>, vector<32x64xbf16>,
    } else {
    }
    return
  }
  func.func @transform_0(%arg0: i32, %arg1: i32, %arg2: i32) -> (i32, i32) {
    %c0_i32 = arith.constant 0 : i32
    return %arg0, %arg2 : i32, i32
  }
  func.func @transform_1(%arg0: i32, %arg1: i32, %arg2: i32) -> (i32, i32) {
    %c0_i32 = arith.constant 0 : i32
    return %arg2, %arg1 : i32, i32
  }
  func.func @transform_2(%arg0: i32, %arg1: i32, %arg2: i32) -> (i32, i32) {
    %c0_i32 = arith.constant 0 : i32
    %c0_i32_0 = arith.constant 0 : i32
    return %c0_i32, %arg1 : i32, i32
  }
  func.func @transform_3(%arg0: i32, %arg1: i32, %arg2: i32) -> (i32, i32) {
    %c0_i32 = arith.constant 0 : i32
    %c0_i32_0 = arith.constant 0 : i32
    return %c0_i32, %arg1 : i32, i32
  }
  func.func @transform_4(%arg0: i32, %arg1: i32, %arg2: i32) -> (i32, i32) {
    %c0_i32 = arith.constant 0 : i32
    return %arg0, %arg1 : i32, i32
  }
}

module attributes {stable_mosaic.version = 11 : i64} {
  func.func @_mm_bn_kernel(%arg0: i32, %arg1: i32, %arg2: i32, %arg3: memref<32x576xbf16, #tpu.memory_space<vmem>>, %arg4: memref<576x64xbf16, #tpu.memory_space<vmem>>, %arg5: memref<1x64xf32, #tpu.memory_space<vmem>>, %arg6: memref<1x64xf32, #tpu.memory_space<vmem>>, %arg7: memref<32x64xbf16, #tpu.memory_space<vmem>>, %arg8: memref<32x64xbf16, #tpu.memory_space<vmem>>, %arg9: memref<32x64xf32, #tpu.memory_space<vmem>>) attributes {dimension_semantics = [#tpu.dimension_semantics<parallel>, #tpu.dimension_semantics<parallel>, #tpu.dimension_semantics<arbitrary>], iteration_bounds = array<i64: 1, 1, 1>, scalar_prefetch = 0 : i64, scratch_operands = 1 : i64, tpu.core_type = #tpu.core_type<tc>, window_params = [{transform_indices = @transform_0, window_bounds = array<i64: 32, 576>}, {transform_indices = @transform_1, window_bounds = array<i64: 576, 64>}, {transform_indices = @transform_2, window_bounds = array<i64: 1, 64>}, {transform_indices = @transform_3, window_bounds = array<i64: 1, 64>}, {transform_indices = @transform_4, window_bounds = array<i64: 32, 64>}, {transform_indices = @transform_5, window_bounds = array<i64: 32, 64>}]} {
    %c0_i32 = arith.constant 0 : i32
    %0 = arith.cmpi eq, %arg2, %c0_i32 : i32
    %1 = arith.extui %0 : i1 to i32
    %c0_i32_0 = arith.constant 0 : i32
    %2 = arith.cmpi ne, %1, %c0_i32_0 : i32
    scf.if %2 {
      %cst_10 = arith.constant 0.000000e+00 : f32
      %12 = vector.broadcast %cst_10 : f32 to vector<32x64xf32>
      %c0_11 = arith.constant 0 : index
      %c0_12 = arith.constant 0 : index
      %13 = vector.load %arg9[%c0_11, %c0_12] : memref<32x64xf32, #tpu.memory_space<vmem>>, vector<32x64xf32>
      tpu.vector_store %arg9[%c0_11, %c0_12], %12 {strides = array<i32>} : memref<32x64xf32, #tpu.memory_space<vmem>>, vector<32x64xf32>,
    } else {
    }
    %c0 = arith.constant 0 : index
    %c0_1 = arith.constant 0 : index
    %3 = vector.load %arg9[%c0, %c0_1] : memref<32x64xf32, #tpu.memory_space<vmem>>, vector<32x64xf32>
    %c0_2 = arith.constant 0 : index
    %c0_3 = arith.constant 0 : index
    %4 = vector.load %arg3[%c0_2, %c0_3] : memref<32x576xbf16, #tpu.memory_space<vmem>>, vector<32x576xbf16>
    %c0_4 = arith.constant 0 : index
    %c0_5 = arith.constant 0 : index
    %5 = vector.load %arg4[%c0_4, %c0_5] : memref<576x64xbf16, #tpu.memory_space<vmem>>, vector<576x64xbf16>
    %cst = arith.constant dense<0.000000e+00> : vector<32x64xf32>
    %6 = tpu.matmul %4, %5, %cst {dimension_numbers = #tpu.dot_dimension_numbers<[1], [0], [0], [1], [0, 0, 1, 1], [], []>} : vector<32x576xbf16>, vector<576x64xbf16>, vector<32x64xf32> -> vector<32x64xf32>
    %7 = arith.addf %3, %6 : vector<32x64xf32>
    %c0_6 = arith.constant 0 : index
    %c0_7 = arith.constant 0 : index
    %8 = vector.load %arg9[%c0_6, %c0_7] : memref<32x64xf32, #tpu.memory_space<vmem>>, vector<32x64xf32>
    tpu.vector_store %arg9[%c0_6, %c0_7], %7 {strides = array<i32>} : memref<32x64xf32, #tpu.memory_space<vmem>>, vector<32x64xf32>,
    %c0_i32_8 = arith.constant 0 : i32
    %9 = arith.cmpi eq, %arg2, %c0_i32_8 : i32
    %10 = arith.extui %9 : i1 to i32
    %c0_i32_9 = arith.constant 0 : i32
    %11 = arith.cmpi ne, %10, %c0_i32_9 : i32
    scf.if %11 {
      %c0_10 = arith.constant 0 : index
      %c0_11 = arith.constant 0 : index
      %12 = vector.load %arg9[%c0_10, %c0_11] : memref<32x64xf32, #tpu.memory_space<vmem>>, vector<32x64xf32>
      %c0_12 = arith.constant 0 : index
      %c0_13 = arith.constant 0 : index
      %13 = vector.load %arg5[%c0_12, %c0_13] : memref<1x64xf32, #tpu.memory_space<vmem>>, vector<1x64xf32>
      %14 = vector.broadcast %13 : vector<1x64xf32> to vector<32x64xf32>
      %15 = arith.mulf %12, %14 : vector<32x64xf32>
      %c0_14 = arith.constant 0 : index
      %c0_15 = arith.constant 0 : index
      %16 = vector.load %arg6[%c0_14, %c0_15] : memref<1x64xf32, #tpu.memory_space<vmem>>, vector<1x64xf32>
      %17 = vector.broadcast %16 : vector<1x64xf32> to vector<32x64xf32>
      %18 = arith.addf %15, %17 : vector<32x64xf32>
      %cst_16 = arith.constant 0.000000e+00 : f32
      %19 = vector.broadcast %cst_16 : f32 to vector<32x64xf32>
      %20 = arith.maximumf %18, %19 : vector<32x64xf32>
      %c0_17 = arith.constant 0 : index
      %c0_18 = arith.constant 0 : index
      %21 = vector.load %arg7[%c0_17, %c0_18] : memref<32x64xbf16, #tpu.memory_space<vmem>>, vector<32x64xbf16>
      %22 = arith.extf %21 : vector<32x64xbf16> to vector<32x64xf32>
      %23 = arith.addf %20, %22 : vector<32x64xf32>
      %cst_19 = arith.constant 0.000000e+00 : f32
      %24 = vector.broadcast %cst_19 : f32 to vector<32x64xf32>
      %25 = arith.maximumf %23, %24 : vector<32x64xf32>
      %26 = arith.truncf %25 : vector<32x64xf32> to vector<32x64xbf16>
      %c0_20 = arith.constant 0 : index
      %c0_21 = arith.constant 0 : index
      %27 = vector.load %arg8[%c0_20, %c0_21] : memref<32x64xbf16, #tpu.memory_space<vmem>>, vector<32x64xbf16>
      tpu.vector_store %arg8[%c0_20, %c0_21], %26 {strides = array<i32>} : memref<32x64xbf16, #tpu.memory_space<vmem>>, vector<32x64xbf16>,
    } else {
    }
    return
  }
  func.func @transform_0(%arg0: i32, %arg1: i32, %arg2: i32) -> (i32, i32) {
    %c0_i32 = arith.constant 0 : i32
    return %arg0, %arg2 : i32, i32
  }
  func.func @transform_1(%arg0: i32, %arg1: i32, %arg2: i32) -> (i32, i32) {
    %c0_i32 = arith.constant 0 : i32
    return %arg2, %arg1 : i32, i32
  }
  func.func @transform_2(%arg0: i32, %arg1: i32, %arg2: i32) -> (i32, i32) {
    %c0_i32 = arith.constant 0 : i32
    %c0_i32_0 = arith.constant 0 : i32
    return %c0_i32, %arg1 : i32, i32
  }
  func.func @transform_3(%arg0: i32, %arg1: i32, %arg2: i32) -> (i32, i32) {
    %c0_i32 = arith.constant 0 : i32
    %c0_i32_0 = arith.constant 0 : i32
    return %c0_i32, %arg1 : i32, i32
  }
  func.func @transform_4(%arg0: i32, %arg1: i32, %arg2: i32) -> (i32, i32) {
    %c0_i32 = arith.constant 0 : i32
    return %arg0, %arg1 : i32, i32
  }
  func.func @transform_5(%arg0: i32, %arg1: i32, %arg2: i32) -> (i32, i32) {
    %c0_i32 = arith.constant 0 : i32
    return %arg0, %arg1 : i32, i32
  }
}

module attributes {stable_mosaic.version = 11 : i64} {
  func.func @_mm_bn_kernel(%arg0: i32, %arg1: i32, %arg2: i32, %arg3: memref<32x576xbf16, #tpu.memory_space<vmem>>, %arg4: memref<576x128xbf16, #tpu.memory_space<vmem>>, %arg5: memref<1x128xf32, #tpu.memory_space<vmem>>, %arg6: memref<1x128xf32, #tpu.memory_space<vmem>>, %arg7: memref<32x128xbf16, #tpu.memory_space<vmem>>, %arg8: memref<32x128xf32, #tpu.memory_space<vmem>>) attributes {dimension_semantics = [#tpu.dimension_semantics<parallel>, #tpu.dimension_semantics<parallel>, #tpu.dimension_semantics<arbitrary>], iteration_bounds = array<i64: 1, 1, 1>, scalar_prefetch = 0 : i64, scratch_operands = 1 : i64, tpu.core_type = #tpu.core_type<tc>, window_params = [{transform_indices = @transform_0, window_bounds = array<i64: 32, 576>}, {transform_indices = @transform_1, window_bounds = array<i64: 576, 128>}, {transform_indices = @transform_2, window_bounds = array<i64: 1, 128>}, {transform_indices = @transform_3, window_bounds = array<i64: 1, 128>}, {transform_indices = @transform_4, window_bounds = array<i64: 32, 128>}]} {
    %c0_i32 = arith.constant 0 : i32
    %0 = arith.cmpi eq, %arg2, %c0_i32 : i32
    %1 = arith.extui %0 : i1 to i32
    %c0_i32_0 = arith.constant 0 : i32
    %2 = arith.cmpi ne, %1, %c0_i32_0 : i32
    scf.if %2 {
      %cst_10 = arith.constant 0.000000e+00 : f32
      %12 = vector.broadcast %cst_10 : f32 to vector<32x128xf32>
      %c0_11 = arith.constant 0 : index
      %c0_12 = arith.constant 0 : index
      %13 = vector.load %arg8[%c0_11, %c0_12] : memref<32x128xf32, #tpu.memory_space<vmem>>, vector<32x128xf32>
      tpu.vector_store %arg8[%c0_11, %c0_12], %12 {strides = array<i32>} : memref<32x128xf32, #tpu.memory_space<vmem>>, vector<32x128xf32>,
    } else {
    }
    %c0 = arith.constant 0 : index
    %c0_1 = arith.constant 0 : index
    %3 = vector.load %arg8[%c0, %c0_1] : memref<32x128xf32, #tpu.memory_space<vmem>>, vector<32x128xf32>
    %c0_2 = arith.constant 0 : index
    %c0_3 = arith.constant 0 : index
    %4 = vector.load %arg3[%c0_2, %c0_3] : memref<32x576xbf16, #tpu.memory_space<vmem>>, vector<32x576xbf16>
    %c0_4 = arith.constant 0 : index
    %c0_5 = arith.constant 0 : index
    %5 = vector.load %arg4[%c0_4, %c0_5] : memref<576x128xbf16, #tpu.memory_space<vmem>>, vector<576x128xbf16>
    %cst = arith.constant dense<0.000000e+00> : vector<32x128xf32>
    %6 = tpu.matmul %4, %5, %cst {dimension_numbers = #tpu.dot_dimension_numbers<[1], [0], [0], [1], [0, 0, 1, 1], [], []>} : vector<32x576xbf16>, vector<576x128xbf16>, vector<32x128xf32> -> vector<32x128xf32>
    %7 = arith.addf %3, %6 : vector<32x128xf32>
    %c0_6 = arith.constant 0 : index
    %c0_7 = arith.constant 0 : index
    %8 = vector.load %arg8[%c0_6, %c0_7] : memref<32x128xf32, #tpu.memory_space<vmem>>, vector<32x128xf32>
    tpu.vector_store %arg8[%c0_6, %c0_7], %7 {strides = array<i32>} : memref<32x128xf32, #tpu.memory_space<vmem>>, vector<32x128xf32>,
    %c0_i32_8 = arith.constant 0 : i32
    %9 = arith.cmpi eq, %arg2, %c0_i32_8 : i32
    %10 = arith.extui %9 : i1 to i32
    %c0_i32_9 = arith.constant 0 : i32
    %11 = arith.cmpi ne, %10, %c0_i32_9 : i32
    scf.if %11 {
      %c0_10 = arith.constant 0 : index
      %c0_11 = arith.constant 0 : index
      %12 = vector.load %arg8[%c0_10, %c0_11] : memref<32x128xf32, #tpu.memory_space<vmem>>, vector<32x128xf32>
      %c0_12 = arith.constant 0 : index
      %c0_13 = arith.constant 0 : index
      %13 = vector.load %arg5[%c0_12, %c0_13] : memref<1x128xf32, #tpu.memory_space<vmem>>, vector<1x128xf32>
      %14 = vector.broadcast %13 : vector<1x128xf32> to vector<32x128xf32>
      %15 = arith.mulf %12, %14 : vector<32x128xf32>
      %c0_14 = arith.constant 0 : index
      %c0_15 = arith.constant 0 : index
      %16 = vector.load %arg6[%c0_14, %c0_15] : memref<1x128xf32, #tpu.memory_space<vmem>>, vector<1x128xf32>
      %17 = vector.broadcast %16 : vector<1x128xf32> to vector<32x128xf32>
      %18 = arith.addf %15, %17 : vector<32x128xf32>
      %cst_16 = arith.constant 0.000000e+00 : f32
      %19 = vector.broadcast %cst_16 : f32 to vector<32x128xf32>
      %20 = arith.maximumf %18, %19 : vector<32x128xf32>
      %21 = arith.truncf %20 : vector<32x128xf32> to vector<32x128xbf16>
      %c0_17 = arith.constant 0 : index
      %c0_18 = arith.constant 0 : index
      %22 = vector.load %arg7[%c0_17, %c0_18] : memref<32x128xbf16, #tpu.memory_space<vmem>>, vector<32x128xbf16>
      tpu.vector_store %arg7[%c0_17, %c0_18], %21 {strides = array<i32>} : memref<32x128xbf16, #tpu.memory_space<vmem>>, vector<32x128xbf16>,
    } else {
    }
    return
  }
  func.func @transform_0(%arg0: i32, %arg1: i32, %arg2: i32) -> (i32, i32) {
    %c0_i32 = arith.constant 0 : i32
    return %arg0, %arg2 : i32, i32
  }
  func.func @transform_1(%arg0: i32, %arg1: i32, %arg2: i32) -> (i32, i32) {
    %c0_i32 = arith.constant 0 : i32
    return %arg2, %arg1 : i32, i32
  }
  func.func @transform_2(%arg0: i32, %arg1: i32, %arg2: i32) -> (i32, i32) {
    %c0_i32 = arith.constant 0 : i32
    %c0_i32_0 = arith.constant 0 : i32
    return %c0_i32, %arg1 : i32, i32
  }
  func.func @transform_3(%arg0: i32, %arg1: i32, %arg2: i32) -> (i32, i32) {
    %c0_i32 = arith.constant 0 : i32
    %c0_i32_0 = arith.constant 0 : i32
    return %c0_i32, %arg1 : i32, i32
  }
  func.func @transform_4(%arg0: i32, %arg1: i32, %arg2: i32) -> (i32, i32) {
    %c0_i32 = arith.constant 0 : i32
    return %arg0, %arg1 : i32, i32
  }
}

module attributes {stable_mosaic.version = 11 : i64} {
  func.func @_mm_bn_kernel(%arg0: i32, %arg1: i32, %arg2: i32, %arg3: memref<8x64xbf16, #tpu.memory_space<vmem>>, %arg4: memref<64x128xbf16, #tpu.memory_space<vmem>>, %arg5: memref<1x128xf32, #tpu.memory_space<vmem>>, %arg6: memref<1x128xf32, #tpu.memory_space<vmem>>, %arg7: memref<8x128xbf16, #tpu.memory_space<vmem>>, %arg8: memref<8x128xf32, #tpu.memory_space<vmem>>) attributes {dimension_semantics = [#tpu.dimension_semantics<parallel>, #tpu.dimension_semantics<parallel>, #tpu.dimension_semantics<arbitrary>], iteration_bounds = array<i64: 1, 1, 1>, scalar_prefetch = 0 : i64, scratch_operands = 1 : i64, tpu.core_type = #tpu.core_type<tc>, window_params = [{transform_indices = @transform_0, window_bounds = array<i64: 8, 64>}, {transform_indices = @transform_1, window_bounds = array<i64: 64, 128>}, {transform_indices = @transform_2, window_bounds = array<i64: 1, 128>}, {transform_indices = @transform_3, window_bounds = array<i64: 1, 128>}, {transform_indices = @transform_4, window_bounds = array<i64: 8, 128>}]} {
    %c0_i32 = arith.constant 0 : i32
    %0 = arith.cmpi eq, %arg2, %c0_i32 : i32
    %1 = arith.extui %0 : i1 to i32
    %c0_i32_0 = arith.constant 0 : i32
    %2 = arith.cmpi ne, %1, %c0_i32_0 : i32
    scf.if %2 {
      %cst_10 = arith.constant 0.000000e+00 : f32
      %12 = vector.broadcast %cst_10 : f32 to vector<8x128xf32>
      %c0_11 = arith.constant 0 : index
      %c0_12 = arith.constant 0 : index
      %13 = vector.load %arg8[%c0_11, %c0_12] : memref<8x128xf32, #tpu.memory_space<vmem>>, vector<8x128xf32>
      tpu.vector_store %arg8[%c0_11, %c0_12], %12 {strides = array<i32>} : memref<8x128xf32, #tpu.memory_space<vmem>>, vector<8x128xf32>,
    } else {
    }
    %c0 = arith.constant 0 : index
    %c0_1 = arith.constant 0 : index
    %3 = vector.load %arg8[%c0, %c0_1] : memref<8x128xf32, #tpu.memory_space<vmem>>, vector<8x128xf32>
    %c0_2 = arith.constant 0 : index
    %c0_3 = arith.constant 0 : index
    %4 = vector.load %arg3[%c0_2, %c0_3] : memref<8x64xbf16, #tpu.memory_space<vmem>>, vector<8x64xbf16>
    %c0_4 = arith.constant 0 : index
    %c0_5 = arith.constant 0 : index
    %5 = vector.load %arg4[%c0_4, %c0_5] : memref<64x128xbf16, #tpu.memory_space<vmem>>, vector<64x128xbf16>
    %cst = arith.constant dense<0.000000e+00> : vector<8x128xf32>
    %6 = tpu.matmul %4, %5, %cst {dimension_numbers = #tpu.dot_dimension_numbers<[1], [0], [0], [1], [0, 0, 1, 1], [], []>} : vector<8x64xbf16>, vector<64x128xbf16>, vector<8x128xf32> -> vector<8x128xf32>
    %7 = arith.addf %3, %6 : vector<8x128xf32>
    %c0_6 = arith.constant 0 : index
    %c0_7 = arith.constant 0 : index
    %8 = vector.load %arg8[%c0_6, %c0_7] : memref<8x128xf32, #tpu.memory_space<vmem>>, vector<8x128xf32>
    tpu.vector_store %arg8[%c0_6, %c0_7], %7 {strides = array<i32>} : memref<8x128xf32, #tpu.memory_space<vmem>>, vector<8x128xf32>,
    %c0_i32_8 = arith.constant 0 : i32
    %9 = arith.cmpi eq, %arg2, %c0_i32_8 : i32
    %10 = arith.extui %9 : i1 to i32
    %c0_i32_9 = arith.constant 0 : i32
    %11 = arith.cmpi ne, %10, %c0_i32_9 : i32
    scf.if %11 {
      %c0_10 = arith.constant 0 : index
      %c0_11 = arith.constant 0 : index
      %12 = vector.load %arg8[%c0_10, %c0_11] : memref<8x128xf32, #tpu.memory_space<vmem>>, vector<8x128xf32>
      %c0_12 = arith.constant 0 : index
      %c0_13 = arith.constant 0 : index
      %13 = vector.load %arg5[%c0_12, %c0_13] : memref<1x128xf32, #tpu.memory_space<vmem>>, vector<1x128xf32>
      %14 = vector.broadcast %13 : vector<1x128xf32> to vector<8x128xf32>
      %15 = arith.mulf %12, %14 : vector<8x128xf32>
      %c0_14 = arith.constant 0 : index
      %c0_15 = arith.constant 0 : index
      %16 = vector.load %arg6[%c0_14, %c0_15] : memref<1x128xf32, #tpu.memory_space<vmem>>, vector<1x128xf32>
      %17 = vector.broadcast %16 : vector<1x128xf32> to vector<8x128xf32>
      %18 = arith.addf %15, %17 : vector<8x128xf32>
      %19 = arith.truncf %18 : vector<8x128xf32> to vector<8x128xbf16>
      %c0_16 = arith.constant 0 : index
      %c0_17 = arith.constant 0 : index
      %20 = vector.load %arg7[%c0_16, %c0_17] : memref<8x128xbf16, #tpu.memory_space<vmem>>, vector<8x128xbf16>
      tpu.vector_store %arg7[%c0_16, %c0_17], %19 {strides = array<i32>} : memref<8x128xbf16, #tpu.memory_space<vmem>>, vector<8x128xbf16>,
    } else {
    }
    return
  }
  func.func @transform_0(%arg0: i32, %arg1: i32, %arg2: i32) -> (i32, i32) {
    %c0_i32 = arith.constant 0 : i32
    return %arg0, %arg2 : i32, i32
  }
  func.func @transform_1(%arg0: i32, %arg1: i32, %arg2: i32) -> (i32, i32) {
    %c0_i32 = arith.constant 0 : i32
    return %arg2, %arg1 : i32, i32
  }
  func.func @transform_2(%arg0: i32, %arg1: i32, %arg2: i32) -> (i32, i32) {
    %c0_i32 = arith.constant 0 : i32
    %c0_i32_0 = arith.constant 0 : i32
    return %c0_i32, %arg1 : i32, i32
  }
  func.func @transform_3(%arg0: i32, %arg1: i32, %arg2: i32) -> (i32, i32) {
    %c0_i32 = arith.constant 0 : i32
    %c0_i32_0 = arith.constant 0 : i32
    return %c0_i32, %arg1 : i32, i32
  }
  func.func @transform_4(%arg0: i32, %arg1: i32, %arg2: i32) -> (i32, i32) {
    %c0_i32 = arith.constant 0 : i32
    return %arg0, %arg1 : i32, i32
  }
}

module attributes {stable_mosaic.version = 11 : i64} {
  func.func @_mm_bn_kernel(%arg0: i32, %arg1: i32, %arg2: i32, %arg3: memref<8x1152xbf16, #tpu.memory_space<vmem>>, %arg4: memref<1152x128xbf16, #tpu.memory_space<vmem>>, %arg5: memref<1x128xf32, #tpu.memory_space<vmem>>, %arg6: memref<1x128xf32, #tpu.memory_space<vmem>>, %arg7: memref<8x128xbf16, #tpu.memory_space<vmem>>, %arg8: memref<8x128xbf16, #tpu.memory_space<vmem>>, %arg9: memref<8x128xf32, #tpu.memory_space<vmem>>) attributes {dimension_semantics = [#tpu.dimension_semantics<parallel>, #tpu.dimension_semantics<parallel>, #tpu.dimension_semantics<arbitrary>], iteration_bounds = array<i64: 1, 1, 1>, scalar_prefetch = 0 : i64, scratch_operands = 1 : i64, tpu.core_type = #tpu.core_type<tc>, window_params = [{transform_indices = @transform_0, window_bounds = array<i64: 8, 1152>}, {transform_indices = @transform_1, window_bounds = array<i64: 1152, 128>}, {transform_indices = @transform_2, window_bounds = array<i64: 1, 128>}, {transform_indices = @transform_3, window_bounds = array<i64: 1, 128>}, {transform_indices = @transform_4, window_bounds = array<i64: 8, 128>}, {transform_indices = @transform_5, window_bounds = array<i64: 8, 128>}]} {
    %c0_i32 = arith.constant 0 : i32
    %0 = arith.cmpi eq, %arg2, %c0_i32 : i32
    %1 = arith.extui %0 : i1 to i32
    %c0_i32_0 = arith.constant 0 : i32
    %2 = arith.cmpi ne, %1, %c0_i32_0 : i32
    scf.if %2 {
      %cst_10 = arith.constant 0.000000e+00 : f32
      %12 = vector.broadcast %cst_10 : f32 to vector<8x128xf32>
      %c0_11 = arith.constant 0 : index
      %c0_12 = arith.constant 0 : index
      %13 = vector.load %arg9[%c0_11, %c0_12] : memref<8x128xf32, #tpu.memory_space<vmem>>, vector<8x128xf32>
      tpu.vector_store %arg9[%c0_11, %c0_12], %12 {strides = array<i32>} : memref<8x128xf32, #tpu.memory_space<vmem>>, vector<8x128xf32>,
    } else {
    }
    %c0 = arith.constant 0 : index
    %c0_1 = arith.constant 0 : index
    %3 = vector.load %arg9[%c0, %c0_1] : memref<8x128xf32, #tpu.memory_space<vmem>>, vector<8x128xf32>
    %c0_2 = arith.constant 0 : index
    %c0_3 = arith.constant 0 : index
    %4 = vector.load %arg3[%c0_2, %c0_3] : memref<8x1152xbf16, #tpu.memory_space<vmem>>, vector<8x1152xbf16>
    %c0_4 = arith.constant 0 : index
    %c0_5 = arith.constant 0 : index
    %5 = vector.load %arg4[%c0_4, %c0_5] : memref<1152x128xbf16, #tpu.memory_space<vmem>>, vector<1152x128xbf16>
    %cst = arith.constant dense<0.000000e+00> : vector<8x128xf32>
    %6 = tpu.matmul %4, %5, %cst {dimension_numbers = #tpu.dot_dimension_numbers<[1], [0], [0], [1], [0, 0, 1, 1], [], []>} : vector<8x1152xbf16>, vector<1152x128xbf16>, vector<8x128xf32> -> vector<8x128xf32>
    %7 = arith.addf %3, %6 : vector<8x128xf32>
    %c0_6 = arith.constant 0 : index
    %c0_7 = arith.constant 0 : index
    %8 = vector.load %arg9[%c0_6, %c0_7] : memref<8x128xf32, #tpu.memory_space<vmem>>, vector<8x128xf32>
    tpu.vector_store %arg9[%c0_6, %c0_7], %7 {strides = array<i32>} : memref<8x128xf32, #tpu.memory_space<vmem>>, vector<8x128xf32>,
    %c0_i32_8 = arith.constant 0 : i32
    %9 = arith.cmpi eq, %arg2, %c0_i32_8 : i32
    %10 = arith.extui %9 : i1 to i32
    %c0_i32_9 = arith.constant 0 : i32
    %11 = arith.cmpi ne, %10, %c0_i32_9 : i32
    scf.if %11 {
      %c0_10 = arith.constant 0 : index
      %c0_11 = arith.constant 0 : index
      %12 = vector.load %arg9[%c0_10, %c0_11] : memref<8x128xf32, #tpu.memory_space<vmem>>, vector<8x128xf32>
      %c0_12 = arith.constant 0 : index
      %c0_13 = arith.constant 0 : index
      %13 = vector.load %arg5[%c0_12, %c0_13] : memref<1x128xf32, #tpu.memory_space<vmem>>, vector<1x128xf32>
      %14 = vector.broadcast %13 : vector<1x128xf32> to vector<8x128xf32>
      %15 = arith.mulf %12, %14 : vector<8x128xf32>
      %c0_14 = arith.constant 0 : index
      %c0_15 = arith.constant 0 : index
      %16 = vector.load %arg6[%c0_14, %c0_15] : memref<1x128xf32, #tpu.memory_space<vmem>>, vector<1x128xf32>
      %17 = vector.broadcast %16 : vector<1x128xf32> to vector<8x128xf32>
      %18 = arith.addf %15, %17 : vector<8x128xf32>
      %cst_16 = arith.constant 0.000000e+00 : f32
      %19 = vector.broadcast %cst_16 : f32 to vector<8x128xf32>
      %20 = arith.maximumf %18, %19 : vector<8x128xf32>
      %c0_17 = arith.constant 0 : index
      %c0_18 = arith.constant 0 : index
      %21 = vector.load %arg7[%c0_17, %c0_18] : memref<8x128xbf16, #tpu.memory_space<vmem>>, vector<8x128xbf16>
      %22 = arith.extf %21 : vector<8x128xbf16> to vector<8x128xf32>
      %23 = arith.addf %20, %22 : vector<8x128xf32>
      %cst_19 = arith.constant 0.000000e+00 : f32
      %24 = vector.broadcast %cst_19 : f32 to vector<8x128xf32>
      %25 = arith.maximumf %23, %24 : vector<8x128xf32>
      %26 = arith.truncf %25 : vector<8x128xf32> to vector<8x128xbf16>
      %c0_20 = arith.constant 0 : index
      %c0_21 = arith.constant 0 : index
      %27 = vector.load %arg8[%c0_20, %c0_21] : memref<8x128xbf16, #tpu.memory_space<vmem>>, vector<8x128xbf16>
      tpu.vector_store %arg8[%c0_20, %c0_21], %26 {strides = array<i32>} : memref<8x128xbf16, #tpu.memory_space<vmem>>, vector<8x128xbf16>,
    } else {
    }
    return
  }
  func.func @transform_0(%arg0: i32, %arg1: i32, %arg2: i32) -> (i32, i32) {
    %c0_i32 = arith.constant 0 : i32
    return %arg0, %arg2 : i32, i32
  }
  func.func @transform_1(%arg0: i32, %arg1: i32, %arg2: i32) -> (i32, i32) {
    %c0_i32 = arith.constant 0 : i32
    return %arg2, %arg1 : i32, i32
  }
  func.func @transform_2(%arg0: i32, %arg1: i32, %arg2: i32) -> (i32, i32) {
    %c0_i32 = arith.constant 0 : i32
    %c0_i32_0 = arith.constant 0 : i32
    return %c0_i32, %arg1 : i32, i32
  }
  func.func @transform_3(%arg0: i32, %arg1: i32, %arg2: i32) -> (i32, i32) {
    %c0_i32 = arith.constant 0 : i32
    %c0_i32_0 = arith.constant 0 : i32
    return %c0_i32, %arg1 : i32, i32
  }
  func.func @transform_4(%arg0: i32, %arg1: i32, %arg2: i32) -> (i32, i32) {
    %c0_i32 = arith.constant 0 : i32
    return %arg0, %arg1 : i32, i32
  }
  func.func @transform_5(%arg0: i32, %arg1: i32, %arg2: i32) -> (i32, i32) {
    %c0_i32 = arith.constant 0 : i32
    return %arg0, %arg1 : i32, i32
  }
}

module attributes {stable_mosaic.version = 11 : i64} {
  func.func @_mm_bn_kernel(%arg0: i32, %arg1: i32, %arg2: i32, %arg3: memref<8x1152xbf16, #tpu.memory_space<vmem>>, %arg4: memref<1152x128xbf16, #tpu.memory_space<vmem>>, %arg5: memref<1x128xf32, #tpu.memory_space<vmem>>, %arg6: memref<1x128xf32, #tpu.memory_space<vmem>>, %arg7: memref<8x128xbf16, #tpu.memory_space<vmem>>, %arg8: memref<8x128xf32, #tpu.memory_space<vmem>>) attributes {dimension_semantics = [#tpu.dimension_semantics<parallel>, #tpu.dimension_semantics<parallel>, #tpu.dimension_semantics<arbitrary>], iteration_bounds = array<i64: 1, 1, 1>, scalar_prefetch = 0 : i64, scratch_operands = 1 : i64, tpu.core_type = #tpu.core_type<tc>, window_params = [{transform_indices = @transform_0, window_bounds = array<i64: 8, 1152>}, {transform_indices = @transform_1, window_bounds = array<i64: 1152, 128>}, {transform_indices = @transform_2, window_bounds = array<i64: 1, 128>}, {transform_indices = @transform_3, window_bounds = array<i64: 1, 128>}, {transform_indices = @transform_4, window_bounds = array<i64: 8, 128>}]} {
    %c0_i32 = arith.constant 0 : i32
    %0 = arith.cmpi eq, %arg2, %c0_i32 : i32
    %1 = arith.extui %0 : i1 to i32
    %c0_i32_0 = arith.constant 0 : i32
    %2 = arith.cmpi ne, %1, %c0_i32_0 : i32
    scf.if %2 {
      %cst_10 = arith.constant 0.000000e+00 : f32
      %12 = vector.broadcast %cst_10 : f32 to vector<8x128xf32>
      %c0_11 = arith.constant 0 : index
      %c0_12 = arith.constant 0 : index
      %13 = vector.load %arg8[%c0_11, %c0_12] : memref<8x128xf32, #tpu.memory_space<vmem>>, vector<8x128xf32>
      tpu.vector_store %arg8[%c0_11, %c0_12], %12 {strides = array<i32>} : memref<8x128xf32, #tpu.memory_space<vmem>>, vector<8x128xf32>,
    } else {
    }
    %c0 = arith.constant 0 : index
    %c0_1 = arith.constant 0 : index
    %3 = vector.load %arg8[%c0, %c0_1] : memref<8x128xf32, #tpu.memory_space<vmem>>, vector<8x128xf32>
    %c0_2 = arith.constant 0 : index
    %c0_3 = arith.constant 0 : index
    %4 = vector.load %arg3[%c0_2, %c0_3] : memref<8x1152xbf16, #tpu.memory_space<vmem>>, vector<8x1152xbf16>
    %c0_4 = arith.constant 0 : index
    %c0_5 = arith.constant 0 : index
    %5 = vector.load %arg4[%c0_4, %c0_5] : memref<1152x128xbf16, #tpu.memory_space<vmem>>, vector<1152x128xbf16>
    %cst = arith.constant dense<0.000000e+00> : vector<8x128xf32>
    %6 = tpu.matmul %4, %5, %cst {dimension_numbers = #tpu.dot_dimension_numbers<[1], [0], [0], [1], [0, 0, 1, 1], [], []>} : vector<8x1152xbf16>, vector<1152x128xbf16>, vector<8x128xf32> -> vector<8x128xf32>
    %7 = arith.addf %3, %6 : vector<8x128xf32>
    %c0_6 = arith.constant 0 : index
    %c0_7 = arith.constant 0 : index
    %8 = vector.load %arg8[%c0_6, %c0_7] : memref<8x128xf32, #tpu.memory_space<vmem>>, vector<8x128xf32>
    tpu.vector_store %arg8[%c0_6, %c0_7], %7 {strides = array<i32>} : memref<8x128xf32, #tpu.memory_space<vmem>>, vector<8x128xf32>,
    %c0_i32_8 = arith.constant 0 : i32
    %9 = arith.cmpi eq, %arg2, %c0_i32_8 : i32
    %10 = arith.extui %9 : i1 to i32
    %c0_i32_9 = arith.constant 0 : i32
    %11 = arith.cmpi ne, %10, %c0_i32_9 : i32
    scf.if %11 {
      %c0_10 = arith.constant 0 : index
      %c0_11 = arith.constant 0 : index
      %12 = vector.load %arg8[%c0_10, %c0_11] : memref<8x128xf32, #tpu.memory_space<vmem>>, vector<8x128xf32>
      %c0_12 = arith.constant 0 : index
      %c0_13 = arith.constant 0 : index
      %13 = vector.load %arg5[%c0_12, %c0_13] : memref<1x128xf32, #tpu.memory_space<vmem>>, vector<1x128xf32>
      %14 = vector.broadcast %13 : vector<1x128xf32> to vector<8x128xf32>
      %15 = arith.mulf %12, %14 : vector<8x128xf32>
      %c0_14 = arith.constant 0 : index
      %c0_15 = arith.constant 0 : index
      %16 = vector.load %arg6[%c0_14, %c0_15] : memref<1x128xf32, #tpu.memory_space<vmem>>, vector<1x128xf32>
      %17 = vector.broadcast %16 : vector<1x128xf32> to vector<8x128xf32>
      %18 = arith.addf %15, %17 : vector<8x128xf32>
      %cst_16 = arith.constant 0.000000e+00 : f32
      %19 = vector.broadcast %cst_16 : f32 to vector<8x128xf32>
      %20 = arith.maximumf %18, %19 : vector<8x128xf32>
      %21 = arith.truncf %20 : vector<8x128xf32> to vector<8x128xbf16>
      %c0_17 = arith.constant 0 : index
      %c0_18 = arith.constant 0 : index
      %22 = vector.load %arg7[%c0_17, %c0_18] : memref<8x128xbf16, #tpu.memory_space<vmem>>, vector<8x128xbf16>
      tpu.vector_store %arg7[%c0_17, %c0_18], %21 {strides = array<i32>} : memref<8x128xbf16, #tpu.memory_space<vmem>>, vector<8x128xbf16>,
    } else {
    }
    return
  }
  func.func @transform_0(%arg0: i32, %arg1: i32, %arg2: i32) -> (i32, i32) {
    %c0_i32 = arith.constant 0 : i32
    return %arg0, %arg2 : i32, i32
  }
  func.func @transform_1(%arg0: i32, %arg1: i32, %arg2: i32) -> (i32, i32) {
    %c0_i32 = arith.constant 0 : i32
    return %arg2, %arg1 : i32, i32
  }
  func.func @transform_2(%arg0: i32, %arg1: i32, %arg2: i32) -> (i32, i32) {
    %c0_i32 = arith.constant 0 : i32
    %c0_i32_0 = arith.constant 0 : i32
    return %c0_i32, %arg1 : i32, i32
  }
  func.func @transform_3(%arg0: i32, %arg1: i32, %arg2: i32) -> (i32, i32) {
    %c0_i32 = arith.constant 0 : i32
    %c0_i32_0 = arith.constant 0 : i32
    return %c0_i32, %arg1 : i32, i32
  }
  func.func @transform_4(%arg0: i32, %arg1: i32, %arg2: i32) -> (i32, i32) {
    %c0_i32 = arith.constant 0 : i32
    return %arg0, %arg1 : i32, i32
  }
}

module attributes {stable_mosaic.version = 11 : i64} {
  func.func @_fc_head_kernel(%arg0: i32, %arg1: memref<2x4x128xbf16, #tpu.memory_space<vmem>>, %arg2: memref<128x256xbf16, #tpu.memory_space<vmem>>, %arg3: memref<1x256xf32, #tpu.memory_space<vmem>>, %arg4: memref<1x256xf32, #tpu.memory_space<vmem>>, %arg5: memref<256x256xbf16, #tpu.memory_space<vmem>>, %arg6: memref<1x256xf32, #tpu.memory_space<vmem>>, %arg7: memref<1x256xf32, #tpu.memory_space<vmem>>, %arg8: memref<256x32xbf16, #tpu.memory_space<vmem>>, %arg9: memref<1x32xf32, #tpu.memory_space<vmem>>, %arg10: memref<2x32xf32, #tpu.memory_space<vmem>>) attributes {dimension_semantics = [#tpu.dimension_semantics<arbitrary>], iteration_bounds = array<i64: 1>, scalar_prefetch = 0 : i64, scratch_operands = 0 : i64, tpu.core_type = #tpu.core_type<tc>, window_params = [{pipeline_mode = #tpu.pipeline_mode<synchronous>, transform_indices = @transform_0, window_bounds = array<i64: 2, 4, 128>}, {pipeline_mode = #tpu.pipeline_mode<synchronous>, transform_indices = @transform_1, window_bounds = array<i64: 128, 256>}, {pipeline_mode = #tpu.pipeline_mode<synchronous>, transform_indices = @transform_2, window_bounds = array<i64: 1, 256>}, {pipeline_mode = #tpu.pipeline_mode<synchronous>, transform_indices = @transform_3, window_bounds = array<i64: 1, 256>}, {pipeline_mode = #tpu.pipeline_mode<synchronous>, transform_indices = @transform_4, window_bounds = array<i64: 256, 256>}, {pipeline_mode = #tpu.pipeline_mode<synchronous>, transform_indices = @transform_5, window_bounds = array<i64: 1, 256>}, {pipeline_mode = #tpu.pipeline_mode<synchronous>, transform_indices = @transform_6, window_bounds = array<i64: 1, 256>}, {pipeline_mode = #tpu.pipeline_mode<synchronous>, transform_indices = @transform_7, window_bounds = array<i64: 256, 32>}, {pipeline_mode = #tpu.pipeline_mode<synchronous>, transform_indices = @transform_8, window_bounds = array<i64: 1, 32>}, {pipeline_mode = #tpu.pipeline_mode<synchronous>, transform_indices = @transform_9, window_bounds = array<i64: 2, 32>}]} {
    %c0 = arith.constant 0 : index
    %c0_0 = arith.constant 0 : index
    %c0_1 = arith.constant 0 : index
    %0 = vector.load %arg1[%c0, %c0_0, %c0_1] : memref<2x4x128xbf16, #tpu.memory_space<vmem>>, vector<2x4x128xbf16>
    %1 = arith.extf %0 : vector<2x4x128xbf16> to vector<2x4x128xf32>
    %cst = arith.constant dense<0.000000e+00> : vector<2x128xf32>
    %2 = vector.multi_reduction <add>, %1, %cst [1] : vector<2x4x128xf32> to vector<2x128xf32>
    %cst_2 = arith.constant 4.000000e+00 : f32
    %3 = vector.broadcast %cst_2 : f32 to vector<2x128xf32>
    %4 = arith.divf %2, %3 : vector<2x128xf32>
    %5 = arith.truncf %4 : vector<2x128xf32> to vector<2x128xbf16>
    %c0_3 = arith.constant 0 : index
    %c0_4 = arith.constant 0 : index
    %6 = vector.load %arg2[%c0_3, %c0_4] : memref<128x256xbf16, #tpu.memory_space<vmem>>, vector<128x256xbf16>
    %cst_5 = arith.constant dense<0.000000e+00> : vector<2x256xf32>
    %7 = tpu.matmul %5, %6, %cst_5 {dimension_numbers = #tpu.dot_dimension_numbers<[1], [0], [0], [1], [0, 0, 1, 1], [], []>} : vector<2x128xbf16>, vector<128x256xbf16>, vector<2x256xf32> -> vector<2x256xf32>
    %c0_6 = arith.constant 0 : index
    %c0_7 = arith.constant 0 : index
    %8 = vector.load %arg3[%c0_6, %c0_7] : memref<1x256xf32, #tpu.memory_space<vmem>>, vector<1x256xf32>
    %9 = vector.broadcast %8 : vector<1x256xf32> to vector<2x256xf32>
    %10 = arith.mulf %7, %9 : vector<2x256xf32>
    %c0_8 = arith.constant 0 : index
    %c0_9 = arith.constant 0 : index
    %11 = vector.load %arg4[%c0_8, %c0_9] : memref<1x256xf32, #tpu.memory_space<vmem>>, vector<1x256xf32>
    %12 = vector.broadcast %11 : vector<1x256xf32> to vector<2x256xf32>
    %13 = arith.addf %10, %12 : vector<2x256xf32>
    %cst_10 = arith.constant 0.000000e+00 : f32
    %14 = vector.broadcast %cst_10 : f32 to vector<2x256xf32>
    %15 = arith.maximumf %13, %14 : vector<2x256xf32>
    %16 = arith.truncf %15 : vector<2x256xf32> to vector<2x256xbf16>
    %c0_11 = arith.constant 0 : index
    %c0_12 = arith.constant 0 : index
    %17 = vector.load %arg5[%c0_11, %c0_12] : memref<256x256xbf16, #tpu.memory_space<vmem>>, vector<256x256xbf16>
    %cst_13 = arith.constant dense<0.000000e+00> : vector<2x256xf32>
    %18 = tpu.matmul %16, %17, %cst_13 {dimension_numbers = #tpu.dot_dimension_numbers<[1], [0], [0], [1], [0, 0, 1, 1], [], []>} : vector<2x256xbf16>, vector<256x256xbf16>, vector<2x256xf32> -> vector<2x256xf32>
    %c0_14 = arith.constant 0 : index
    %c0_15 = arith.constant 0 : index
    %19 = vector.load %arg6[%c0_14, %c0_15] : memref<1x256xf32, #tpu.memory_space<vmem>>, vector<1x256xf32>
    %20 = vector.broadcast %19 : vector<1x256xf32> to vector<2x256xf32>
    %21 = arith.mulf %18, %20 : vector<2x256xf32>
    %c0_16 = arith.constant 0 : index
    %c0_17 = arith.constant 0 : index
    %22 = vector.load %arg7[%c0_16, %c0_17] : memref<1x256xf32, #tpu.memory_space<vmem>>, vector<1x256xf32>
    %23 = vector.broadcast %22 : vector<1x256xf32> to vector<2x256xf32>
    %24 = arith.addf %21, %23 : vector<2x256xf32>
    %cst_18 = arith.constant 0.000000e+00 : f32
    %25 = vector.broadcast %cst_18 : f32 to vector<2x256xf32>
    %26 = arith.maximumf %24, %25 : vector<2x256xf32>
    %27 = arith.truncf %26 : vector<2x256xf32> to vector<2x256xbf16>
    %c0_19 = arith.constant 0 : index
    %c0_20 = arith.constant 0 : index
    %28 = vector.load %arg8[%c0_19, %c0_20] : memref<256x32xbf16, #tpu.memory_space<vmem>>, vector<256x32xbf16>
    %cst_21 = arith.constant dense<0.000000e+00> : vector<2x32xf32>
    %29 = tpu.matmul %27, %28, %cst_21 {dimension_numbers = #tpu.dot_dimension_numbers<[1], [0], [0], [1], [0, 0, 1, 1], [], []>} : vector<2x256xbf16>, vector<256x32xbf16>, vector<2x32xf32> -> vector<2x32xf32>
    %c0_22 = arith.constant 0 : index
    %c0_23 = arith.constant 0 : index
    %30 = vector.load %arg9[%c0_22, %c0_23] : memref<1x32xf32, #tpu.memory_space<vmem>>, vector<1x32xf32>
    %31 = vector.broadcast %30 : vector<1x32xf32> to vector<2x32xf32>
    %32 = arith.addf %29, %31 : vector<2x32xf32>
    %c0_24 = arith.constant 0 : index
    %c0_25 = arith.constant 0 : index
    %33 = vector.load %arg10[%c0_24, %c0_25] : memref<2x32xf32, #tpu.memory_space<vmem>>, vector<2x32xf32>
    tpu.vector_store %arg10[%c0_24, %c0_25], %32 {strides = array<i32>} : memref<2x32xf32, #tpu.memory_space<vmem>>, vector<2x32xf32>,
    return
  }
  func.func @transform_0(%arg0: i32) -> (i32, i32, i32) {
    %c0_i32 = arith.constant 0 : i32
    %c0_i32_0 = arith.constant 0 : i32
    %c0_i32_1 = arith.constant 0 : i32
    %c0_i32_2 = arith.constant 0 : i32
    return %c0_i32, %c0_i32_0, %c0_i32_1 : i32, i32, i32
  }
  func.func @transform_1(%arg0: i32) -> (i32, i32) {
    %c0_i32 = arith.constant 0 : i32
    %c0_i32_0 = arith.constant 0 : i32
    %c0_i32_1 = arith.constant 0 : i32
    return %c0_i32, %c0_i32_0 : i32, i32
  }
  func.func @transform_2(%arg0: i32) -> (i32, i32) {
    %c0_i32 = arith.constant 0 : i32
    %c0_i32_0 = arith.constant 0 : i32
    %c0_i32_1 = arith.constant 0 : i32
    return %c0_i32, %c0_i32_0 : i32, i32
  }
  func.func @transform_3(%arg0: i32) -> (i32, i32) {
    %c0_i32 = arith.constant 0 : i32
    %c0_i32_0 = arith.constant 0 : i32
    %c0_i32_1 = arith.constant 0 : i32
    return %c0_i32, %c0_i32_0 : i32, i32
  }
  func.func @transform_4(%arg0: i32) -> (i32, i32) {
    %c0_i32 = arith.constant 0 : i32
    %c0_i32_0 = arith.constant 0 : i32
    %c0_i32_1 = arith.constant 0 : i32
    return %c0_i32, %c0_i32_0 : i32, i32
  }
  func.func @transform_5(%arg0: i32) -> (i32, i32) {
    %c0_i32 = arith.constant 0 : i32
    %c0_i32_0 = arith.constant 0 : i32
    %c0_i32_1 = arith.constant 0 : i32
    return %c0_i32, %c0_i32_0 : i32, i32
  }
  func.func @transform_6(%arg0: i32) -> (i32, i32) {
    %c0_i32 = arith.constant 0 : i32
    %c0_i32_0 = arith.constant 0 : i32
    %c0_i32_1 = arith.constant 0 : i32
    return %c0_i32, %c0_i32_0 : i32, i32
  }
  func.func @transform_7(%arg0: i32) -> (i32, i32) {
    %c0_i32 = arith.constant 0 : i32
    %c0_i32_0 = arith.constant 0 : i32
    %c0_i32_1 = arith.constant 0 : i32
    return %c0_i32, %c0_i32_0 : i32, i32
  }
  func.func @transform_8(%arg0: i32) -> (i32, i32) {
    %c0_i32 = arith.constant 0 : i32
    %c0_i32_0 = arith.constant 0 : i32
    %c0_i32_1 = arith.constant 0 : i32
    return %c0_i32, %c0_i32_0 : i32, i32
  }
  func.func @transform_9(%arg0: i32) -> (i32, i32) {
    %c0_i32 = arith.constant 0 : i32
    %c0_i32_0 = arith.constant 0 : i32
    %c0_i32_1 = arith.constant 0 : i32
    return %c0_i32, %c0_i32_0 : i32, i32
  }
}

</mosaic_0001>

<bundles_post_ra>
// kernel: patch2d_forward.13
= control target key start
LH: loop header
LB: loop body
LE: loop exit
PB: predicated region body
PF: predicated region fallthrough
CT: control target
= control target key end

     0   :  { %s815_s6 = smov 0   ;;  %s1006_s0 = inlined_call_operand.vmem [shape: bf16[2,4,2,4,2,64], index: 0, kind: input, shape index: {}]   ;;  %s1007_s1 = inlined_call_operand.vmem [shape: bf16[2,4,1,4,1,64], index: 1, kind: output, shape index: {}]  }
   0x1 LB: > { %s780_s7 = sadd.s32 4294967295, %s803_s6   ;;  %p784_p0 = scmp.ge.s32.totalorder %s803_s6, 1  ;;  %s803_s6 = sphi %s815_s6, %s11_s6  }
   0x2   : > { %p86_p1 = scmp.lt.s32.totalorder %s803_s6, 3 }
   0x4   : > { %p87_p2 = pnand %p784_p0, %p86_p1 }
   0x5   : > { %p104_p3 = scmp.lt.s32.totalorder (!%p87_p2), %s780_s7, 1 }
   0x6   : > { %90 = sbr.rel (%p87_p2) target bundleno = 132 (0x84), region = 24 }
   0xb   : > { %s1011_s7 = smov (!%p104_p3, %s780_s7), 1  ;;  %vm145_vm0 = vcmask 516096   ;;  %vm563_vm1 = vcmask 523264   ;;  %vm677_vm2 = vsmask.f32 256 }
   0xc   : > { %s785_s8 = sshll.u32 %s1011_s7, 5  ;;  %s786_s12 = sshll.u32 %s1011_s7, 4  ;;  %vm858_vm3 = vmand %vm145_vm0, %vm677_vm2 }
   0xd   : > { %s829_s11 = scalar_lea.vmem %s1006_s0, %s785_s8  ;;  %s851_s15 = scalar_lea.vmem %s1007_s1, %s786_s12 }
   0xe   : > { %v113_v0 = vld [vmem:[%s829_s11] sm:$0x1]  ;;  %v117_v1 = vld [vmem:[%s829_s11 + $0x4] sm:$0x1]  ;;  %v114_v4 = vld [vmem:[%s829_s11 + $0x1] sm:$0x1] }
   0xf   : > { %v148_v2 = vsel %vm145_vm0, %v113_v0, 4286644096  ;;  %v200_v3 = vsel %vm145_vm0, %v117_v1, 4286644096  ;;  %v118_v9 = vld [vmem:[%s829_s11 + $0x5] sm:$0x1] }
  0x10   : > { %v150_v5 = vunpack.i.l.bf16 %v148_v2  ;;  %v151_v6 = vunpack.i.h.bf16 %v148_v2  ;;  %v202_v7 = vunpack.i.l.bf16 %v200_v3  ;;  %v203_v8 = vunpack.i.h.bf16 %v200_v3  ;;  %v115_v10 = vld [vmem:[%s829_s11 + $0x2] sm:$0x1]  ;;  %v119_v13 = vld [vmem:[%s829_s11 + $0x6] sm:$0x1]  ;;  %v116_v22 = vld [vmem:[%s829_s11 + $0x3] sm:$0x1] }
  0x11   : > { %v161_v11 = vsel %vm145_vm0, %v114_v4, 4286644096  ;;  %v213_v12 = vsel %vm145_vm0, %v118_v9, 4286644096  ;;  %v174_v20 = vsel %vm145_vm0, %v115_v10, 4286644096 }
  0x12   : > { %v152_v14 = vmax.f32 %v150_v5, %v151_v6  ;;  %v204_v15 = vmax.f32 %v202_v7, %v203_v8  ;;  %v163_v16 = vunpack.i.l.bf16 %v161_v11  ;;  %v164_v17 = vunpack.i.h.bf16 %v161_v11  ;;  %v120_v34 = vld [vmem:[%s829_s11 + $0x7] sm:$0x1] }
  0x13   : > { %v215_v18 = vunpack.i.l.bf16 %v213_v12  ;;  %v216_v19 = vunpack.i.h.bf16 %v213_v12  ;;  %v226_v21 = vsel %vm145_vm0, %v119_v13, 4286644096  ;;  %v176_v26 = vunpack.i.l.bf16 %v174_v20 }
  0x14   : > { %v153_v23 = vrot.slane %v152_v14, 4  ;;  %v205_v24 = vrot.slane %v204_v15, 4  ;;  %v165_v25 = vmax.f32 %v163_v16, %v164_v17  ;;  %v177_v28 = vunpack.i.h.bf16 %v174_v20  ;;  %v121_v16 = vld [vmem:[%s829_s11 + $0x8] sm:$0x1]  ;;  %v679_v20 = vld [vmem:[%s851_s15] sm:$0x1] }
  0x15   : > { %v217_v27 = vmax.f32 %v215_v18, %v216_v19  ;;  %v228_v29 = vunpack.i.l.bf16 %v226_v21  ;;  %v229_v30 = vunpack.i.h.bf16 %v226_v21  ;;  %v187_v35 = vsel %vm145_vm0, %v116_v22, 4286644096 }
  0x16   : > { %v154_v31 = vmax.f32 %v152_v14, %v153_v23  ;;  %v206_v32 = vmax.f32 %v204_v15, %v205_v24  ;;  %v166_v33 = vrot.slane %v165_v25, 4  ;;  %v178_v37 = vmax.f32 %v176_v26, %v177_v28 }
  0x17   : > { %v218_v36 = vrot.slane %v217_v27, 4  ;;  %v230_v38 = vmax.f32 %v228_v29, %v229_v30  ;;  %v189_v39 = vunpack.i.l.bf16 %v187_v35  ;;  %v190_v43 = vunpack.i.h.bf16 %v187_v35 }
  0x18   : > { %v155_v40 = vrot.slane %v154_v31, 2  ;;  %v207_v41 = vrot.slane %v206_v32, 2  ;;  %v167_v42 = vmax.f32 %v165_v25, %v166_v33  ;;  %v179_v45 = vrot.slane %v178_v37, 4 }
  0x19   : > { %v219_v44 = vmax.f32 %v217_v27, %v218_v36  ;;  %v231_v46 = vrot.slane %v230_v38, 4  ;;  %v239_v47 = vsel %vm145_vm0, %v120_v34, 4286644096  ;;  %v191_v51 = vmax.f32 %v189_v39, %v190_v43  ;;  %v125_v27 = vld [vmem:[%s829_s11 + $0xc] sm:$0x1] }
  0x1a   : > { %v156_v48 = vmax.f32 %v154_v31, %v155_v40  ;;  %v208_v49 = vmax.f32 %v206_v32, %v207_v41  ;;  %v168_v50 = vrot.slane %v167_v42, 2  ;;  %v180_v53 = vmax.f32 %v178_v37, %v179_v45  ;;  %v682_v34 = vld [vmem:[%s851_s15 + $0x1] sm:$0x1] }
  0x1b   : > { %v220_v52 = vrot.slane %v219_v44, 2  ;;  %v232_v54 = vmax.f32 %v230_v38, %v231_v46  ;;  %v241_v55 = vunpack.i.l.bf16 %v239_v47  ;;  %v192_v59 = vrot.slane %v191_v51, 4  ;;  %v685_v38 = vld [vmem:[%s851_s15 + $0x2] sm:$0x1] }
  0x1c   : > { %v157_v56 = vrot.slane %v156_v48, 1  ;;  %v209_v57 = vrot.slane %v208_v49, 1  ;;  %v169_v58 = vmax.f32 %v167_v42, %v168_v50  ;;  %v181_v61 = vrot.slane %v180_v53, 2  ;;  %v122_v42 = vld [vmem:[%s829_s11 + $0x9] sm:$0x1] }
  0x1d   : > { %v221_v60 = vmax.f32 %v219_v44, %v220_v52  ;;  %v233_v62 = vrot.slane %v232_v54, 2  ;;  %v242_v63 = vunpack.i.h.bf16 %v239_v47  ;;  %v193_v3 = vmax.f32 %v191_v51, %v192_v59  ;;  %v126_v51 = vld [vmem:[%s829_s11 + $0xd] sm:$0x1] }
  0x1e   : > { %v158_v0 = vmax.f32 %v156_v48, %v157_v56  ;;  %v210_v1 = vmax.f32 %v208_v49, %v209_v57  ;;  %v170_v2 = vrot.slane %v169_v58, 1  ;;  %v182_v5 = vmax.f32 %v180_v53, %v181_v61  ;;  %v123_v56 = vld [vmem:[%s829_s11 + $0xa] sm:$0x1] }
  0x1f   : > { %v222_v4 = vrot.slane %v221_v60, 1  ;;  %v234_v6 = vmax.f32 %v232_v54, %v233_v62  ;;  %v243_v7 = vmax.f32 %v241_v55, %v242_v63  ;;  %v194_v11 = vrot.slane %v193_v3, 2 }
  0x20   : > { %v159_v8 = vpack.i.bf16 %v158_v0, %v158_v0  ;;  %v211_v9 = vpack.i.bf16 %v210_v1, %v210_v1  ;;  %v171_v10 = vmax.f32 %v169_v58, %v170_v2  ;;  %v183_v13 = vrot.slane %v182_v5, 1  ;;  %v127_v1 = vld [vmem:[%s829_s11 + $0xe] sm:$0x1] }
  0x21   : > { %v223_v12 = vmax.f32 %v221_v60, %v222_v4  ;;  %v235_v14 = vrot.slane %v234_v6, 1  ;;  %v244_v15 = vrot.slane %v243_v7, 4  ;;  %v195_v22 = vmax.f32 %v193_v3, %v194_v11 }
  0x22   : > { %v565_v17 = vsel %vm563_vm1, %v159_v8, 4286644096  ;;  %v568_v18 = vsel %vm563_vm1, %v211_v9, 4286644096  ;;  %v172_v21 = vpack.i.bf16 %v171_v10, %v171_v10  ;;  %v184_v25 = vmax.f32 %v182_v5, %v183_v13 }
  0x23   : > { %v570_v23 = vmax.bf16 %v568_v18, %v565_v17  ;;  %v224_v24 = vpack.i.bf16 %v223_v12, %v223_v12  ;;  %v236_v26 = vmax.f32 %v234_v6, %v235_v14  ;;  %v196_v29 = vrot.slane %v195_v22, 1  ;;  %v124_v18 = vld [vmem:[%s829_s11 + $0xb] sm:$0x1] }
  0x24   : > { %v572_v28 = vsel %vm563_vm1, %v172_v21, 4286644096  ;;  %v245_v30 = vmax.f32 %v243_v7, %v244_v15  ;;  %v252_v31 = vsel %vm145_vm0, %v121_v16, 4286644096  ;;  %v185_v35 = vpack.i.bf16 %v184_v25, %v184_v25  ;;  %v688_v21 = vld [vmem:[%s851_s15 + $0x3] sm:$0x1] }
  0x25   : > { %v680_v32 = vsel %vm858_vm3, %v570_v23, %v679_v20  ;;  %v575_v33 = vsel %vm563_vm1, %v224_v24, 4286644096  ;;  %v237_v36 = vpack.i.bf16 %v236_v26, %v236_v26  ;;  %v197_v39 = vmax.f32 %v195_v22, %v196_v29 }
  0x26   : > { %681 = vst [vmem:[%s851_s15] sm:$0x1] %v680_v32  ;;  %v577_v37 = vmax.bf16 %v575_v33, %v572_v28  ;;  %v246_v40 = vrot.slane %v245_v30, 2  ;;  %v254_v41 = vunpack.i.l.bf16 %v252_v31  ;;  %v579_v43 = vsel %vm563_vm1, %v185_v35, 4286644096 }
  0x27   : > { %v582_v44 = vsel %vm563_vm1, %v237_v36, 4286644096  ;;  %v255_v45 = vunpack.i.h.bf16 %v252_v31  ;;  %v304_v46 = vsel %vm145_vm0, %v125_v27, 4286644096  ;;  %v198_v49 = vpack.i.bf16 %v197_v39, %v197_v39 }
  0x28   : > { %v683_v47 = vsel %vm858_vm3, %v577_v37, %v682_v34  ;;  %v584_v48 = vmax.bf16 %v582_v44, %v579_v43  ;;  %v247_v50 = vmax.f32 %v245_v30, %v246_v40  ;;  %v306_v53 = vunpack.i.l.bf16 %v304_v46  ;;  %v128_v37 = vld [vmem:[%s829_s11 + $0xf] sm:$0x1] }
  0x29   : > { %684 = vst [vmem:[%s851_s15 + $0x1] sm:$0x1] %v683_v47  ;;  %v256_v52 = vmax.f32 %v254_v41, %v255_v45  ;;  %v307_v54 = vunpack.i.h.bf16 %v304_v46  ;;  %v265_v55 = vsel %vm145_vm0, %v122_v42, 4286644096  ;;  %v586_v59 = vsel %vm563_vm1, %v198_v49, 4286644096 }
  0x2a   : > { %v686_v57 = vsel %vm858_vm3, %v584_v48, %v685_v38  ;;  %v248_v58 = vrot.slane %v247_v50, 1  ;;  %v267_v60 = vunpack.i.l.bf16 %v265_v55  ;;  %v268_v63 = vunpack.i.h.bf16 %v265_v55 }
  0x2b   : > { %687 = vst [vmem:[%s851_s15 + $0x2] sm:$0x1] %v686_v57  ;;  %v257_v61 = vrot.slane %v256_v52, 4  ;;  %v308_v62 = vmax.f32 %v306_v53, %v307_v54  ;;  %v317_v0 = vsel %vm145_vm0, %v126_v51, 4286644096 }
  0x2c   : > { %v249_v2 = vmax.f32 %v247_v50, %v248_v58  ;;  %v319_v3 = vunpack.i.l.bf16 %v317_v0  ;;  %v320_v4 = vunpack.i.h.bf16 %v317_v0  ;;  %v278_v5 = vsel %vm145_vm0, %v123_v56, 4286644096  ;;  %v129_v58 = vld [vmem:[%s829_s11 + $0x10] sm:$0x1] }
  0x2d   : > { %v258_v6 = vmax.f32 %v256_v52, %v257_v61  ;;  %v309_v7 = vrot.slane %v308_v62, 4  ;;  %v269_v8 = vmax.f32 %v267_v60, %v268_v63  ;;  %v280_v9 = vunpack.i.l.bf16 %v278_v5 }
  0x2e   : > { %v250_v10 = vpack.i.bf16 %v249_v2, %v249_v2  ;;  %v321_v11 = vmax.f32 %v319_v3, %v320_v4  ;;  %v281_v12 = vunpack.i.h.bf16 %v278_v5  ;;  %v330_v13 = vsel %vm145_vm0, %v127_v1, 4286644096  ;;  %v691_v4 = vld [vmem:[%s851_s15 + $0x4] sm:$0x1] }
  0x2f   : > { %v259_v14 = vrot.slane %v258_v6, 2  ;;  %v310_v15 = vmax.f32 %v308_v62, %v309_v7  ;;  %v270_v16 = vrot.slane %v269_v8, 4  ;;  %v332_v17 = vunpack.i.l.bf16 %v330_v13 }
  0x30   : > { %v589_v20 = vsel %vm563_vm1, %v250_v10, 4286644096  ;;  %v322_v22 = vrot.slane %v321_v11, 4  ;;  %v282_v23 = vmax.f32 %v280_v9, %v281_v12  ;;  %v333_v24 = vunpack.i.h.bf16 %v330_v13  ;;  %v133_v12 = vld [vmem:[%s829_s11 + $0x14] sm:$0x1] }
  0x31   : > { %v591_v25 = vmax.bf16 %v589_v20, %v586_v59  ;;  %v260_v26 = vmax.f32 %v258_v6, %v259_v14  ;;  %v311_v27 = vrot.slane %v310_v15, 2  ;;  %v271_v28 = vmax.f32 %v269_v8, %v270_v16 }
  0x32   : > { %v323_v29 = vmax.f32 %v321_v11, %v322_v22  ;;  %v283_v30 = vrot.slane %v282_v23, 4  ;;  %v334_v31 = vmax.f32 %v332_v17, %v333_v24  ;;  %v291_v32 = vsel %vm145_vm0, %v124_v18, 4286644096  ;;  %v130_v17 = vld [vmem:[%s829_s11 + $0x11] sm:$0x1] }
  0x33   : > { %v689_v33 = vsel %vm858_vm3, %v591_v25, %v688_v21  ;;  %v261_v34 = vrot.slane %v260_v26, 1  ;;  %v312_v35 = vmax.f32 %v310_v15, %v311_v27  ;;  %v272_v36 = vrot.slane %v271_v28, 2  ;;  %v694_v21 = vld [vmem:[%s851_s15 + $0x5] sm:$0x1] }
  0x34   : > { %690 = vst [vmem:[%s851_s15 + $0x3] sm:$0x1] %v689_v33  ;;  %v324_v38 = vrot.slane %v323_v29, 2  ;;  %v284_v39 = vmax.f32 %v282_v23, %v283_v30  ;;  %v335_v40 = vrot.slane %v334_v31, 4  ;;  %v293_v41 = vunpack.i.l.bf16 %v291_v32 }
  0x35   : > { %v262_v42 = vmax.f32 %v260_v26, %v261_v34  ;;  %v313_v43 = vrot.slane %v312_v35, 1  ;;  %v273_v44 = vmax.f32 %v271_v28, %v272_v36  ;;  %v294_v45 = vunpack.i.h.bf16 %v291_v32  ;;  %v134_v36 = vld [vmem:[%s829_s11 + $0x15] sm:$0x1] }
  0x36   : > { %v325_v46 = vmax.f32 %v323_v29, %v324_v38  ;;  %v285_v47 = vrot.slane %v284_v39, 2  ;;  %v336_v48 = vmax.f32 %v334_v31, %v335_v40  ;;  %v343_v49 = vsel %vm145_vm0, %v128_v37, 4286644096  ;;  %v131_v37 = vld [vmem:[%s829_s11 + $0x12] sm:$0x1] }
  0x37   : > { %v263_v50 = vpack.i.bf16 %v262_v42, %v262_v42  ;;  %v314_v51 = vmax.f32 %v312_v35, %v313_v43  ;;  %v274_v52 = vrot.slane %v273_v44, 1  ;;  %v295_v53 = vmax.f32 %v293_v41, %v294_v45 }
  0x38   : > { %v326_v54 = vrot.slane %v325_v46, 1  ;;  %v286_v55 = vmax.f32 %v284_v39, %v285_v47  ;;  %v337_v56 = vrot.slane %v336_v48, 2  ;;  %v345_v57 = vunpack.i.l.bf16 %v343_v49  ;;  %v697_v39 = vld [vmem:[%s851_s15 + $0x6] sm:$0x1] }
  0x39   : > { %v315_v59 = vpack.i.bf16 %v314_v51, %v314_v51  ;;  %v593_v60 = vsel %vm563_vm1, %v263_v50, 4286644096  ;;  %v275_v61 = vmax.f32 %v273_v44, %v274_v52  ;;  %v296_v62 = vrot.slane %v295_v53, 4 }
  0x3a   : > { %v327_v63 = vmax.f32 %v325_v46, %v326_v54  ;;  %v287_v0 = vrot.slane %v286_v55, 1  ;;  %v338_v1 = vmax.f32 %v336_v48, %v337_v56  ;;  %v346_v2 = vunpack.i.h.bf16 %v343_v49 }
  0x3b   : > { %v596_v3 = vsel %vm563_vm1, %v315_v59, 4286644096  ;;  %v276_v5 = vpack.i.bf16 %v275_v61, %v275_v61  ;;  %v297_v6 = vmax.f32 %v295_v53, %v296_v62  ;;  %v356_v7 = vsel %vm145_vm0, %v129_v58, 4286644096  ;;  %v135_v59 = vld [vmem:[%s829_s11 + $0x16] sm:$0x1] }
  0x3c   : > { %v598_v8 = vmax.bf16 %v596_v3, %v593_v60  ;;  %v328_v9 = vpack.i.bf16 %v327_v63, %v327_v63  ;;  %v288_v10 = vmax.f32 %v286_v55, %v287_v0  ;;  %v339_v11 = vrot.slane %v338_v1, 1  ;;  %v132_v60 = vld [vmem:[%s829_s11 + $0x13] sm:$0x1] }
  0x3d   : > { %v600_v13 = vsel %vm563_vm1, %v276_v5, 4286644096  ;;  %v298_v14 = vrot.slane %v297_v6, 2  ;;  %v347_v15 = vmax.f32 %v345_v57, %v346_v2  ;;  %v358_v16 = vunpack.i.l.bf16 %v356_v7 }
  0x3e   : > { %v692_v18 = vsel %vm858_vm3, %v598_v8, %v691_v4  ;;  %v603_v20 = vsel %vm563_vm1, %v328_v9, 4286644096  ;;  %v289_v22 = vpack.i.bf16 %v288_v10, %v288_v10  ;;  %v340_v23 = vmax.f32 %v338_v1, %v339_v11 }
  0x3f   : > { %693 = vst [vmem:[%s851_s15 + $0x4] sm:$0x1] %v692_v18  ;;  %v605_v24 = vmax.bf16 %v603_v20, %v600_v13  ;;  %v299_v25 = vmax.f32 %v297_v6, %v298_v14  ;;  %v348_v26 = vrot.slane %v347_v15, 4  ;;  %v359_v27 = vunpack.i.h.bf16 %v356_v7 }
  0x40   : > { %v341_v28 = vpack.i.bf16 %v340_v23, %v340_v23  ;;  %v607_v29 = vsel %vm563_vm1, %v289_v22, 4286644096  ;;  %v408_v30 = vsel %vm145_vm0, %v133_v12, 4286644096  ;;  %v369_v31 = vsel %vm145_vm0, %v130_v17, 4286644096 }
  0x41   : > { %v695_v32 = vsel %vm858_vm3, %v605_v24, %v694_v21  ;;  %v300_v33 = vrot.slane %v299_v25, 1  ;;  %v349_v34 = vmax.f32 %v347_v15, %v348_v26  ;;  %v360_v35 = vmax.f32 %v358_v16, %v359_v27  ;;  %v700_v23 = vld [vmem:[%s851_s15 + $0x7] sm:$0x1] }
  0x42   : > { %696 = vst [vmem:[%s851_s15 + $0x5] sm:$0x1] %v695_v32  ;;  %v610_v38 = vsel %vm563_vm1, %v341_v28, 4286644096  ;;  %v410_v40 = vunpack.i.l.bf16 %v408_v30  ;;  %v411_v41 = vunpack.i.h.bf16 %v408_v30  ;;  %v371_v42 = vunpack.i.l.bf16 %v369_v31 }
  0x43   : > { %v612_v43 = vmax.bf16 %v610_v38, %v607_v29  ;;  %v301_v44 = vmax.f32 %v299_v25, %v300_v33  ;;  %v350_v45 = vrot.slane %v349_v34, 2  ;;  %v361_v46 = vrot.slane %v360_v35, 4 }
  0x44   : > { %v412_v47 = vmax.f32 %v410_v40, %v411_v41  ;;  %v372_v48 = vunpack.i.h.bf16 %v369_v31  ;;  %v421_v49 = vsel %vm145_vm0, %v134_v36, 4286644096  ;;  %v382_v50 = vsel %vm145_vm0, %v131_v37, 4286644096 }
  0x45   : > { %v698_v51 = vsel %vm858_vm3, %v612_v43, %v697_v39  ;;  %v302_v52 = vpack.i.bf16 %v301_v44, %v301_v44  ;;  %v351_v53 = vmax.f32 %v349_v34, %v350_v45  ;;  %v362_v54 = vmax.f32 %v360_v35, %v361_v46  ;;  %v136_v34 = vld [vmem:[%s829_s11 + $0x17] sm:$0x1] }
  0x46   : > { %699 = vst [vmem:[%s851_s15 + $0x6] sm:$0x1] %v698_v51  ;;  %v413_v55 = vrot.slane %v412_v47, 4  ;;  %v373_v56 = vmax.f32 %v371_v42, %v372_v48  ;;  %v423_v57 = vunpack.i.l.bf16 %v421_v49  ;;  %v424_v58 = vunpack.i.h.bf16 %v421_v49 }
  0x47   : > { %v352_v61 = vrot.slane %v351_v53, 1  ;;  %v614_v62 = vsel %vm563_vm1, %v302_v52, 4286644096  ;;  %v363_v63 = vrot.slane %v362_v54, 2  ;;  %v384_v0 = vunpack.i.l.bf16 %v382_v50  ;;  %v137_v52 = vld [vmem:[%s829_s11 + $0x18] sm:$0x1] }
  0x48   : > { %v414_v1 = vmax.f32 %v412_v47, %v413_v55  ;;  %v374_v2 = vrot.slane %v373_v56, 4  ;;  %v425_v3 = vmax.f32 %v423_v57, %v424_v58  ;;  %v385_v4 = vunpack.i.h.bf16 %v382_v50 }
  0x49   : > { %v353_v5 = vmax.f32 %v351_v53, %v352_v61  ;;  %v364_v6 = vmax.f32 %v362_v54, %v363_v63  ;;  %v434_v7 = vsel %vm145_vm0, %v135_v59, 4286644096  ;;  %v395_v8 = vsel %vm145_vm0, %v132_v60, 4286644096  ;;  %v703_v54 = vld [vmem:[%s851_s15 + $0x8] sm:$0x1] }
  0x4a   : > { %v415_v9 = vrot.slane %v414_v1, 2  ;;  %v375_v10 = vmax.f32 %v373_v56, %v374_v2  ;;  %v426_v11 = vrot.slane %v425_v3, 4  ;;  %v386_v12 = vmax.f32 %v384_v0, %v385_v4 }
  0x4b   : > { %v354_v13 = vpack.i.bf16 %v353_v5, %v353_v5  ;;  %v365_v14 = vrot.slane %v364_v6, 1  ;;  %v436_v15 = vunpack.i.l.bf16 %v434_v7  ;;  %v437_v16 = vunpack.i.h.bf16 %v434_v7  ;;  %v138_v7 = vld [vmem:[%s829_s11 + $0x19] sm:$0x1] }
  0x4c   : > { %v416_v17 = vmax.f32 %v414_v1, %v415_v9  ;;  %v376_v18 = vrot.slane %v375_v10, 2  ;;  %v427_v20 = vmax.f32 %v425_v3, %v426_v11  ;;  %v387_v21 = vrot.slane %v386_v12, 4  ;;  %v706_v9 = vld [vmem:[%s851_s15 + $0x9] sm:$0x1] }
  0x4d   : > { %v617_v22 = vsel %vm563_vm1, %v354_v13, 4286644096  ;;  %v366_v24 = vmax.f32 %v364_v6, %v365_v14  ;;  %v438_v25 = vmax.f32 %v436_v15, %v437_v16  ;;  %v397_v26 = vunpack.i.l.bf16 %v395_v8  ;;  %v141_v6 = vld [vmem:[%s829_s11 + $0x1c] sm:$0x1] }
  0x4e   : > { %v619_v27 = vmax.bf16 %v617_v22, %v614_v62  ;;  %v417_v28 = vrot.slane %v416_v17, 1  ;;  %v377_v29 = vmax.f32 %v375_v10, %v376_v18  ;;  %v428_v30 = vrot.slane %v427_v20, 2 }
  0x4f   : > { %v367_v31 = vpack.i.bf16 %v366_v24, %v366_v24  ;;  %v388_v32 = vmax.f32 %v386_v12, %v387_v21  ;;  %v439_v33 = vrot.slane %v438_v25, 4  ;;  %v398_v35 = vunpack.i.h.bf16 %v395_v8 }
  0x50   : > { %v701_v36 = vsel %vm858_vm3, %v619_v27, %v700_v23  ;;  %v418_v37 = vmax.f32 %v416_v17, %v417_v28  ;;  %v378_v38 = vrot.slane %v377_v29, 1  ;;  %v429_v39 = vmax.f32 %v427_v20, %v428_v30  ;;  %v142_v30 = vld [vmem:[%s829_s11 + $0x1d] sm:$0x1] }
  0x51   : > { %702 = vst [vmem:[%s851_s15 + $0x7] sm:$0x1] %v701_v36  ;;  %v621_v40 = vsel %vm563_vm1, %v367_v31, 4286644096  ;;  %v389_v41 = vrot.slane %v388_v32, 2  ;;  %v440_v42 = vmax.f32 %v438_v25, %v439_v33  ;;  %v399_v43 = vmax.f32 %v397_v26, %v398_v35 }
  0x52   : > { %v419_v44 = vpack.i.bf16 %v418_v37, %v418_v37  ;;  %v379_v45 = vmax.f32 %v377_v29, %v378_v38  ;;  %v430_v46 = vrot.slane %v429_v39, 1  ;;  %v447_v47 = vsel %vm145_vm0, %v136_v34, 4286644096  ;;  %v139_v31 = vld [vmem:[%s829_s11 + $0x1a] sm:$0x1] }
  0x53   : > { %v390_v48 = vmax.f32 %v388_v32, %v389_v41  ;;  %v441_v49 = vrot.slane %v440_v42, 2  ;;  %v400_v50 = vrot.slane %v399_v43, 4  ;;  %v449_v51 = vunpack.i.l.bf16 %v447_v47  ;;  %v709_v33 = vld [vmem:[%s851_s15 + $0xa] sm:$0x1] }
  0x54   : > { %v624_v53 = vsel %vm563_vm1, %v419_v44, 4286644096  ;;  %v380_v55 = vpack.i.bf16 %v379_v45, %v379_v45  ;;  %v431_v56 = vmax.f32 %v429_v39, %v430_v46  ;;  %v450_v57 = vunpack.i.h.bf16 %v447_v47 }
  0x55   : > { %v626_v58 = vmax.bf16 %v624_v53, %v621_v40  ;;  %v391_v59 = vrot.slane %v390_v48, 1  ;;  %v442_v60 = vmax.f32 %v440_v42, %v441_v49  ;;  %v401_v61 = vmax.f32 %v399_v43, %v400_v50  ;;  %v143_v49 = vld [vmem:[%s829_s11 + $0x1e] sm:$0x1] }
  0x56   : > { %v432_v62 = vpack.i.bf16 %v431_v56, %v431_v56  ;;  %v628_v63 = vsel %vm563_vm1, %v380_v55, 4286644096  ;;  %v451_v0 = vmax.f32 %v449_v51, %v450_v57  ;;  %v460_v1 = vsel %vm145_vm0, %v137_v52, 4286644096 }
  0x57   : > { %v704_v2 = vsel %vm858_vm3, %v626_v58, %v703_v54  ;;  %v392_v3 = vmax.f32 %v390_v48, %v391_v59  ;;  %v443_v4 = vrot.slane %v442_v60, 1  ;;  %v402_v5 = vrot.slane %v401_v61, 2 }
  0x58   : > { %705 = vst [vmem:[%s851_s15 + $0x8] sm:$0x1] %v704_v2  ;;  %v631_v8 = vsel %vm563_vm1, %v432_v62, 4286644096  ;;  %v452_v10 = vrot.slane %v451_v0, 4  ;;  %v462_v11 = vunpack.i.l.bf16 %v460_v1  ;;  %v463_v12 = vunpack.i.h.bf16 %v460_v1 }
  0x59   : > { %v633_v13 = vmax.bf16 %v631_v8, %v628_v63  ;;  %v393_v14 = vpack.i.bf16 %v392_v3, %v392_v3  ;;  %v444_v15 = vmax.f32 %v442_v60, %v443_v4  ;;  %v403_v16 = vmax.f32 %v401_v61, %v402_v5  ;;  %v140_v62 = vld [vmem:[%s829_s11 + $0x1b] sm:$0x1]  ;;  %v712_v8 = vld [vmem:[%s851_s15 + $0xb] sm:$0x1] }
  0x5a   : > { %v453_v17 = vmax.f32 %v451_v0, %v452_v10  ;;  %v464_v18 = vmax.f32 %v462_v11, %v463_v12  ;;  %v512_v20 = vsel %vm145_vm0, %v141_v6, 4286644096  ;;  %v473_v21 = vsel %vm145_vm0, %v138_v7, 4286644096 }
  0x5b   : > { %v707_v22 = vsel %vm858_vm3, %v633_v13, %v706_v9  ;;  %v445_v23 = vpack.i.bf16 %v444_v15, %v444_v15  ;;  %v635_v24 = vsel %vm563_vm1, %v393_v14, 4286644096  ;;  %v404_v25 = vrot.slane %v403_v16, 1 }
  0x5c   : > { %708 = vst [vmem:[%s851_s15 + $0x9] sm:$0x1] %v707_v22  ;;  %v454_v26 = vrot.slane %v453_v17, 2  ;;  %v465_v27 = vrot.slane %v464_v18, 4  ;;  %v514_v28 = vunpack.i.l.bf16 %v512_v20  ;;  %v515_v29 = vunpack.i.h.bf16 %v512_v20  ;;  %v144_v20 = vld [vmem:[%s829_s11 + $0x1f] sm:$0x1] }
  0x5d   : > { %v638_v32 = vsel %vm563_vm1, %v445_v23, 4286644096  ;;  %v405_v34 = vmax.f32 %v403_v16, %v404_v25  ;;  %v475_v35 = vunpack.i.l.bf16 %v473_v21  ;;  %v476_v36 = vunpack.i.h.bf16 %v473_v21 }
  0x5e   : > { %v640_v37 = vmax.bf16 %v638_v32, %v635_v24  ;;  %v455_v38 = vmax.f32 %v453_v17, %v454_v26  ;;  %v466_v39 = vmax.f32 %v464_v18, %v465_v27  ;;  %v516_v40 = vmax.f32 %v514_v28, %v515_v29 }
  0x5f   : > { %v406_v41 = vpack.i.bf16 %v405_v34, %v405_v34  ;;  %v477_v42 = vmax.f32 %v475_v35, %v476_v36  ;;  %v525_v43 = vsel %vm145_vm0, %v142_v30, 4286644096  ;;  %v486_v44 = vsel %vm145_vm0, %v139_v31, 4286644096 }
  0x60   : > { %v710_v45 = vsel %vm858_vm3, %v640_v37, %v709_v33  ;;  %v456_v46 = vrot.slane %v455_v38, 1  ;;  %v467_v47 = vrot.slane %v466_v39, 2  ;;  %v517_v48 = vrot.slane %v516_v40, 4 }
  0x61   : > { %711 = vst [vmem:[%s851_s15 + $0xa] sm:$0x1] %v710_v45  ;;  %v642_v50 = vsel %vm563_vm1, %v406_v41, 4286644096  ;;  %v478_v51 = vrot.slane %v477_v42, 4  ;;  %v527_v52 = vunpack.i.l.bf16 %v525_v43  ;;  %v528_v53 = vunpack.i.h.bf16 %v525_v43 }
  0x62   : > { %v457_v54 = vmax.f32 %v455_v38, %v456_v46  ;;  %v468_v55 = vmax.f32 %v466_v39, %v467_v47  ;;  %v518_v56 = vmax.f32 %v516_v40, %v517_v48  ;;  %v488_v57 = vunpack.i.l.bf16 %v486_v44  ;;  %v715_v43 = vld [vmem:[%s851_s15 + $0xc] sm:$0x1] }
  0x63   : > { %v479_v58 = vmax.f32 %v477_v42, %v478_v51  ;;  %v529_v59 = vmax.f32 %v527_v52, %v528_v53  ;;  %v489_v60 = vunpack.i.h.bf16 %v486_v44  ;;  %v538_v61 = vsel %vm145_vm0, %v143_v49, 4286644096 }
  0x64   : > { %v458_v63 = vpack.i.bf16 %v457_v54, %v457_v54  ;;  %v469_v0 = vrot.slane %v468_v55, 1  ;;  %v519_v1 = vrot.slane %v518_v56, 2  ;;  %v540_v2 = vunpack.i.l.bf16 %v538_v61 }
  0x65   : > { %v480_v3 = vrot.slane %v479_v58, 2  ;;  %v530_v4 = vrot.slane %v529_v59, 4  ;;  %v490_v5 = vmax.f32 %v488_v57, %v489_v60  ;;  %v541_v6 = vunpack.i.h.bf16 %v538_v61  ;;  %v718_v60 = vld [vmem:[%s851_s15 + $0xd] sm:$0x1] }
  0x66   : > { %v645_v7 = vsel %vm563_vm1, %v458_v63, 4286644096  ;;  %v470_v9 = vmax.f32 %v468_v55, %v469_v0  ;;  %v520_v10 = vmax.f32 %v518_v56, %v519_v1  ;;  %v499_v11 = vsel %vm145_vm0, %v140_v62, 4286644096 }
  0x67   : > { %v647_v12 = vmax.bf16 %v645_v7, %v642_v50  ;;  %v481_v13 = vmax.f32 %v479_v58, %v480_v3  ;;  %v531_v14 = vmax.f32 %v529_v59, %v530_v4  ;;  %v491_v15 = vrot.slane %v490_v5, 4 }
  0x68   : > { %v471_v16 = vpack.i.bf16 %v470_v9, %v470_v9  ;;  %v521_v17 = vrot.slane %v520_v10, 1  ;;  %v542_v18 = vmax.f32 %v540_v2, %v541_v6  ;;  %v501_v21 = vunpack.i.l.bf16 %v499_v11 }
  0x69   : > { %v713_v22 = vsel %vm858_vm3, %v647_v12, %v712_v8  ;;  %v482_v23 = vrot.slane %v481_v13, 1  ;;  %v532_v24 = vrot.slane %v531_v14, 2  ;;  %v492_v25 = vmax.f32 %v490_v5, %v491_v15  ;;  %v721_v8 = vld [vmem:[%s851_s15 + $0xe] sm:$0x1] }
  0x6a   : > { %714 = vst [vmem:[%s851_s15 + $0xb] sm:$0x1] %v713_v22  ;;  %v522_v26 = vmax.f32 %v520_v10, %v521_v17  ;;  %v649_v27 = vsel %vm563_vm1, %v471_v16, 4286644096  ;;  %v543_v28 = vrot.slane %v542_v18, 4  ;;  %v502_v29 = vunpack.i.h.bf16 %v499_v11 }
  0x6b   : > { %v483_v30 = vmax.f32 %v481_v13, %v482_v23  ;;  %v533_v31 = vmax.f32 %v531_v14, %v532_v24  ;;  %v493_v32 = vrot.slane %v492_v25, 2  ;;  %v551_v33 = vsel %vm145_vm0, %v144_v20, 4286644096  ;;  %v724_v20 = vld [vmem:[%s851_s15 + $0xf] sm:$0x1] }
  0x6c   : > { %v523_v34 = vpack.i.bf16 %v522_v26, %v522_v26  ;;  %v544_v35 = vmax.f32 %v542_v18, %v543_v28  ;;  %v503_v36 = vmax.f32 %v501_v21, %v502_v29  ;;  %v553_v37 = vunpack.i.l.bf16 %v551_v33 }
  0x6d   : > { %v484_v38 = vpack.i.bf16 %v483_v30, %v483_v30  ;;  %v534_v39 = vrot.slane %v533_v31, 1  ;;  %v494_v40 = vmax.f32 %v492_v25, %v493_v32  ;;  %v554_v41 = vunpack.i.h.bf16 %v551_v33 }
  0x6e   : > { %v652_v42 = vsel %vm563_vm1, %v523_v34, 4286644096  ;;  %v545_v44 = vrot.slane %v544_v35, 2  ;;  %v504_v45 = vrot.slane %v503_v36, 4 }
  0x6f   : > { %v654_v46 = vmax.bf16 %v652_v42, %v649_v27  ;;  %v535_v47 = vmax.f32 %v533_v31, %v534_v39  ;;  %v495_v48 = vrot.slane %v494_v40, 1  ;;  %v555_v51 = vmax.f32 %v553_v37, %v554_v41 }
  0x70   : > { %v546_v49 = vmax.f32 %v544_v35, %v545_v44  ;;  %v505_v50 = vmax.f32 %v503_v36, %v504_v45  ;;  %v656_v54 = vsel %vm563_vm1, %v484_v38, 4286644096 }
  0x71   : > { %v716_v52 = vsel %vm858_vm3, %v654_v46, %v715_v43  ;;  %v536_v53 = vpack.i.bf16 %v535_v47, %v535_v47  ;;  %v496_v55 = vmax.f32 %v494_v40, %v495_v48  ;;  %v556_v58 = vrot.slane %v555_v51, 4 }
  0x72   : > { %717 = vst [vmem:[%s851_s15 + $0xc] sm:$0x1] %v716_v52  ;;  %v547_v56 = vrot.slane %v546_v49, 1  ;;  %v506_v57 = vrot.slane %v505_v50, 2 }
  0x73   : > { %v659_v59 = vsel %vm563_vm1, %v536_v53, 4286644096  ;;  %v497_v61 = vpack.i.bf16 %v496_v55, %v496_v55  ;;  %v557_v1 = vmax.f32 %v555_v51, %v556_v58 }
  0x74   : > { %v661_v62 = vmax.bf16 %v659_v59, %v656_v54  ;;  %v548_v63 = vmax.f32 %v546_v49, %v547_v56  ;;  %v507_v0 = vmax.f32 %v505_v50, %v506_v57 }
  0x75   : > { %v663_v2 = vsel %vm563_vm1, %v497_v61, 4286644096  ;;  %v558_v6 = vrot.slane %v557_v1, 2 }
  0x76   : > { %v719_v3 = vsel %vm858_vm3, %v661_v62, %v718_v60  ;;  %v549_v4 = vpack.i.bf16 %v548_v63, %v548_v63  ;;  %v508_v5 = vrot.slane %v507_v0, 1 }
  0x77   : > { %720 = vst [vmem:[%s851_s15 + $0xd] sm:$0x1] %v719_v3  ;;  %v559_v10 = vmax.f32 %v557_v1, %v558_v6 }
  0x78   : > { %v666_v7 = vsel %vm563_vm1, %v549_v4, 4286644096  ;;  %v509_v9 = vmax.f32 %v507_v0, %v508_v5 }
  0x79   : > { %v668_v11 = vmax.bf16 %v666_v7, %v663_v2  ;;  %v560_v13 = vrot.slane %v559_v10, 1 }
  0x7a   : > { %v510_v12 = vpack.i.bf16 %v509_v9, %v509_v9 }
  0x7b   : > { %v722_v14 = vsel %vm858_vm3, %v668_v11, %v721_v8  ;;  %v561_v15 = vmax.f32 %v559_v10, %v560_v13 }
  0x7c   : > { %723 = vst [vmem:[%s851_s15 + $0xe] sm:$0x1] %v722_v14  ;;  %v670_v17 = vsel %vm563_vm1, %v510_v12, 4286644096 }
  0x7d   : > { %v562_v16 = vpack.i.bf16 %v561_v15, %v561_v15 }
  0x7f   : > { %v673_v18 = vsel %vm563_vm1, %v562_v16, 4286644096 }
  0x80   : > { %v675_v21 = vmax.bf16 %v673_v18, %v670_v17 }
  0x82   : > { %v725_v22 = vsel %vm858_vm3, %v675_v21, %v724_v20 }
  0x83   : > { %726 = vst [vmem:[%s851_s15 + $0xf] sm:$0x1] %v725_v22 }
  0x84 PF: > { %s11_s6 = sadd.s32 1, %s803_s6  }
  0x85   : > { %p8_p4 = scmp.ge.s32.totalorder %s11_s6, 4  }
  0x87   :  { %10 = sbr.rel (!%p8_p4) target bundleno = 1 (0x1), region = 54 }

// kernel: patch2d_forward.12
= control target key start
LH: loop header
LB: loop body
LE: loop exit
PB: predicated region body
PF: predicated region fallthrough
CT: control target
= control target key end

     0   :  { %vm22_vm0 = vcmask 523264   ;;  %v704_v0 = vmov 0   ;;  %v705_v2 = vmov 0.0   ;;  %vm243_vm1 = vcmask 556032   ;;  %s990_s1 = inlined_call_operand.vmem [shape: bf16[196,64], index: 1, kind: input, shape index: {}]   ;;  %s991_s0 = inlined_call_operand.vmem [shape: bf16[128,196], index: 0, kind: input, shape index: {}]   ;;  %s992_s2 = inlined_call_operand.vmem [shape: f32[1,64], index: 2, kind: input, shape index: {}]   ;;  %s993_s3 = inlined_call_operand.vmem [shape: f32[1,64], index: 3, kind: input, shape index: {}]   ;;  %s994_s4 = inlined_call_operand.vmem [shape: bf16[128,64], index: 4, kind: output, shape index: {}]  }
   0x1   :  { %272 = vmatprep.subr.bf16.mxu0 %v704_v0  ;;  %639 = vmatprep.subr.bf16.mxu1 %v704_v0  ;;  %v667_v1 = vld [vmem:[%s990_s1 + $0x38] sm:$0xff]   ;;  %23 = vst.msk [vmem:[#allocation2] sm:$0xff] %vm22_vm0, %v705_v2  ;;  %24 = vst.msk [vmem:[#allocation2 + $0x8] sm:$0xff] %vm22_vm0, %v705_v2  ;;  %v668_v3 = vld [vmem:[%s990_s1 + $0x30] sm:$0xff]   ;;  %vm268_vm2 = vcmask 1041408   ;;  %vm547_vm3 = vcmask 519168  }
   0x2   :  { %25 = vst.msk [vmem:[#allocation2 + $0x10] sm:$0xff] %vm22_vm0, %v705_v2  ;;  %26 = vst.msk [vmem:[#allocation2 + $0x18] sm:$0xff] %vm22_vm0, %v705_v2  ;;  %273 = vmatpush1.bf16.msra.mxu0 %v667_v1  ;;  %652 = vmatpush1.bf16.msra.mxu1 %v667_v1  ;;  %v669_v4 = vld [vmem:[%s990_s1 + $0x28] sm:$0xff]   ;;  %v670_v5 = vld [vmem:[%s990_s1 + $0x20] sm:$0xff]  }
   0x3   :  { %27 = vst.msk [vmem:[#allocation2 + $0x20] sm:$0xff] %vm22_vm0, %v705_v2  ;;  %28 = vst.msk [vmem:[#allocation2 + $0x28] sm:$0xff] %vm22_vm0, %v705_v2  ;;  %274 = vmatprep.subr.bf16.mxu0 %v704_v0  ;;  %640 = vmatprep.subr.bf16.mxu1 %v704_v0  ;;  %v682_v6 = vld [vmem:[%s991_s0 + $0x4] ss:$8 sps:$4 sm:$0xff]   ;;  %v671_v7 = vld [vmem:[%s990_s1 + $0x18] sm:$0xff]  }
   0x4   :  { %29 = vst.msk [vmem:[#allocation2 + $0x30] sm:$0xff] %vm22_vm0, %v705_v2  ;;  %30 = vst.msk [vmem:[#allocation2 + $0x38] sm:$0xff] %vm22_vm0, %v705_v2  ;;  %v685_v8 = vld [vmem:[%s991_s0 + $0x44] ss:$8 sps:$4 sm:$0xff]   ;;  %597 = vmatprep.mubr.msk.bf16.mxu0 %vm243_vm1, %v682_v6  ;;  %v672_v9 = vld [vmem:[%s990_s1 + $0x10] sm:$0xff]  }
   0x5   :  { %31 = vst.msk [vmem:[#allocation2 + $0x40] sm:$0xff] %vm22_vm0, %v705_v2  ;;  %32 = vst.msk [vmem:[#allocation2 + $0x48] sm:$0xff] %vm22_vm0, %v705_v2  ;;  %601 = vmatprep.mubr.msk.bf16.mxu1 %vm243_vm1, %v685_v8  ;;  %v673_v10 = vld [vmem:[%s990_s1 + $0x8] sm:$0xff]   ;;  %v674_v11 = vld [vmem:[%s990_s1] sm:$0xff]  }
   0x6   :  { %33 = vst.msk [vmem:[#allocation2 + $0x50] sm:$0xff] %vm22_vm0, %v705_v2  ;;  %34 = vst.msk [vmem:[#allocation2 + $0x58] sm:$0xff] %vm22_vm0, %v705_v2  ;;  %275 = vmatpush1.bf16.msra.mxu0 %v668_v3  ;;  %653 = vmatpush1.bf16.msra.mxu1 %v668_v3  ;;  %v675_v12 = vld [vmem:[%s990_s1 + $0x60] ss:$0 sps:$4 sm:$0x33]   ;;  %v676_v14 = vld [vmem:[%s990_s1 + $0x58] sm:$0xff]  }
   0x7   :  { %35 = vst.msk [vmem:[#allocation2 + $0x60] sm:$0xff] %vm22_vm0, %v705_v2  ;;  %36 = vst.msk [vmem:[#allocation2 + $0x68] sm:$0xff] %vm22_vm0, %v705_v2  ;;  %276 = vmatprep.subr.bf16.mxu0 %v704_v0  ;;  %641 = vmatprep.subr.bf16.mxu1 %v704_v0  ;;  %v270_v13 = vsel %vm268_vm2, %v675_v12, 0  ;;  %v677_v15 = vld [vmem:[%s990_s1 + $0x50] sm:$0xff]   ;;  %v678_v16 = vld [vmem:[%s990_s1 + $0x48] sm:$0xff]  }
   0x8   :  { %37 = vst.msk [vmem:[#allocation2 + $0x70] sm:$0xff] %vm22_vm0, %v705_v2  ;;  %38 = vst.msk [vmem:[#allocation2 + $0x78] sm:$0xff] %vm22_vm0, %v705_v2  ;;  %v679_v17 = vld [vmem:[%s990_s1 + $0x40] sm:$0xff]   ;;  %v686_v20 = vld [vmem:[%s991_s0 + $0x14] ss:$8 sps:$4 sm:$0xff]  }
   0x9   :  { %v680_v18 = vld [vmem:[%s991_s0] ss:$8 sps:$4 sm:$0xff]   ;;  %v688_v21 = vld [vmem:[%s991_s0 + $0x54] ss:$8 sps:$4 sm:$0xff]   ;;  %v690_v22 = vld [vmem:[%s991_s0 + $0x10] ss:$8 sps:$4 sm:$0xff]  }
   0xa   :  { %277 = vmatpush1.bf16.msra.mxu0 %v669_v4  ;;  %654 = vmatpush1.bf16.msra.mxu1 %v669_v4  ;;  %v683_v19 = vld [vmem:[%s991_s0 + $0x40] ss:$8 sps:$4 sm:$0xff]   ;;  %v691_v23 = vld [vmem:[%s991_s0 + $0x50] ss:$8 sps:$4 sm:$0xff]   ;;  %v692_v24 = vld [vmem:[%s991_s0 + $0x24] ss:$8 sps:$4 sm:$0xff]  }
   0xb   :  { %278 = vmatprep.subr.bf16.mxu0 %v704_v0  ;;  %642 = vmatprep.subr.bf16.mxu1 %v704_v0  ;;  %v694_v25 = vld [vmem:[%s991_s0 + $0x64] ss:$8 sps:$4 sm:$0xff]   ;;  %v696_v26 = vld [vmem:[%s991_s0 + $0x20] ss:$8 sps:$4 sm:$0xff]   ;;  %v698_v28 = vld [vmem:[%s991_s0 + $0x34] ss:$8 sps:$4 sm:$0xff]  }
   0xc   :  { %v697_v27 = vld [vmem:[%s991_s0 + $0x60] ss:$8 sps:$4 sm:$0xff]   ;;  %v700_v29 = vld [vmem:[%s991_s0 + $0x74] ss:$8 sps:$4 sm:$0xff]   ;;  %v702_v30 = vld [vmem:[%s991_s0 + $0x30] ss:$8 sps:$4 sm:$0xff]  }
   0xd   :  { %v703_v31 = vld [vmem:[%s991_s0 + $0x70] ss:$8 sps:$4 sm:$0xff]   ;;  %v39_v32 = vld [vmem:[#allocation2] sm:$0xff]  ;;  %v40_v40 = vld [vmem:[#allocation2 + $0x8] sm:$0xff] }
   0xe   :  { %279 = vmatpush1.bf16.msra.mxu0 %v670_v5  ;;  %655 = vmatpush1.bf16.msra.mxu1 %v670_v5  ;;  %v47_v33 = vld [vmem:[#allocation2 + $0x40] sm:$0xff]  ;;  %v48_v41 = vld [vmem:[#allocation2 + $0x48] sm:$0xff]  ;;  %v41_v48 = vld [vmem:[#allocation2 + $0x10] sm:$0xff] }
   0xf   :  { %280 = vmatprep.subr.bf16.mxu0 %v704_v0  ;;  %643 = vmatprep.subr.bf16.mxu1 %v704_v0  ;;  %v49_v49 = vld [vmem:[#allocation2 + $0x50] sm:$0xff]  ;;  %v875_v50 = vld [vmem:[%s992_s2] ss:$0 sm:$0xff]  ;;  %v42_v56 = vld [vmem:[#allocation2 + $0x18] sm:$0xff] }
  0x10   :  { %v880_v53 = vld [vmem:[%s993_s3] ss:$0 sm:$0xff]  ;;  %v50_v61 = vld [vmem:[#allocation2 + $0x58] sm:$0xff] }
  0x12   :  { %281 = vmatpush1.bf16.msra.mxu0 %v671_v7  ;;  %656 = vmatpush1.bf16.msra.mxu1 %v671_v7 }
  0x13   :  { %282 = vmatprep.subr.bf16.mxu0 %v704_v0  ;;  %644 = vmatprep.subr.bf16.mxu1 %v704_v0 }
  0x16   :  { %283 = vmatpush1.bf16.msra.mxu0 %v672_v9  ;;  %657 = vmatpush1.bf16.msra.mxu1 %v672_v9 }
  0x17   :  { %284 = vmatprep.subr.bf16.mxu0 %v704_v0  ;;  %645 = vmatprep.subr.bf16.mxu1 %v704_v0 }
  0x1a   :  { %285 = vmatpush1.bf16.msra.mxu0 %v673_v10  ;;  %658 = vmatpush1.bf16.msra.mxu1 %v673_v10 }
  0x1b   :  { %286 = vmatprep.subr.bf16.mxu0 %v704_v0  ;;  %646 = vmatprep.subr.bf16.mxu1 %v704_v0 }
  0x1e   :  { %287 = vmatpush1.bf16.msra.mxu0 %v674_v11  ;;  %659 = vmatpush1.bf16.msra.mxu1 %v674_v11 }
  0x1f   :  { %294 = vmatprep.subr.bf16.mxu0 %v704_v0  ;;  %647 = vmatprep.subr.bf16.mxu1 %v704_v0 }
  0x22   :  { %295 = vmatpush2.bf16.msra.mxu0 %v270_v13  ;;  %660 = vmatpush2.bf16.msra.mxu1 %v270_v13 }
  0x23   :  { %296 = vmatprep.subr.bf16.mxu0 %v704_v0  ;;  %648 = vmatprep.subr.bf16.mxu1 %v704_v0 }
  0x26   :  { %297 = vmatpush2.bf16.msra.mxu0 %v676_v14  ;;  %661 = vmatpush2.bf16.msra.mxu1 %v676_v14  ;;  %v43_v14 = vld [vmem:[#allocation2 + $0x20] sm:$0xff] }
  0x27   :  { %298 = vmatprep.subr.bf16.mxu0 %v704_v0  ;;  %649 = vmatprep.subr.bf16.mxu1 %v704_v0 }
  0x2a   :  { %299 = vmatpush2.bf16.msra.mxu0 %v677_v15  ;;  %662 = vmatpush2.bf16.msra.mxu1 %v677_v15  ;;  %v51_v15 = vld [vmem:[#allocation2 + $0x60] sm:$0xff] }
  0x2b   :  { %300 = vmatprep.subr.bf16.mxu0 %v704_v0  ;;  %650 = vmatprep.subr.bf16.mxu1 %v704_v0 }
  0x2e   :  { %301 = vmatpush2.bf16.msra.mxu0 %v678_v16  ;;  %663 = vmatpush2.bf16.msra.mxu1 %v678_v16 }
  0x2f   :  { %302 = vmatprep.subr.bf16.mxu0 %v704_v0  ;;  %651 = vmatprep.subr.bf16.mxu1 %v704_v0 }
  0x32   :  { %303 = vmatpush2.bf16.msra.mxu0 %v679_v17  ;;  %664 = vmatpush2.bf16.msra.mxu1 %v679_v17 }
  0x35   :  { %305 = vmatmul.mubr.bf16.vlgmr.msra.gmra.mxu0 %v680_v18  ;;  %337 = vmatmul.mubr.bf16.vlgmr.msra.gmra.mxu1 %v683_v19 }
  0x36   :  { %598 = vmatprep.mubr.msk.bf16.mxu0 %vm243_vm1, %v686_v20  ;;  %602 = vmatprep.mubr.msk.bf16.mxu1 %vm243_vm1, %v688_v21 }
  0x3d   :  { %313 = vmatmul.mubr.bf16.gmra.mxu0 %v690_v22  ;;  %345 = vmatmul.mubr.bf16.gmra.mxu1 %v691_v23 }
  0x3e   :  { %599 = vmatprep.mubr.msk.bf16.mxu0 %vm243_vm1, %v692_v24  ;;  %603 = vmatprep.mubr.msk.bf16.mxu1 %vm243_vm1, %v694_v25 }
  0x45   :  { %321 = vmatmul.mubr.bf16.gmra.mxu0 %v696_v26  ;;  %353 = vmatmul.mubr.bf16.gmra.mxu1 %v697_v27 }
  0x46   :  { %600 = vmatprep.mubr.msk.bf16.mxu0 %vm243_vm1, %v698_v28  ;;  %604 = vmatprep.mubr.msk.bf16.mxu1 %vm243_vm1, %v700_v29 }
  0x4d   :  { %329 = vmatmul.mubr.bf16.gmra.mxu0 %v702_v30  ;;  %361 = vmatmul.mubr.bf16.gmra.mxu1 %v703_v31 }
  0xf5   :  { %v306_v34 = vpop.f32.mrf.mxu0  ;;  %v338_v35 = vpop.f32.mrf.mxu1 }
  0xf6   :  { %v369_v36 = vadd.f32 %v306_v34, %v39_v32  ;;  %v377_v37 = vadd.f32 %v338_v35, %v47_v33  ;;  %v44_v32 = vld [vmem:[#allocation2 + $0x28] sm:$0xff] }
  0xf7   :  { %v308_v38 = vpop.f32.mrf.mxu0  ;;  %v340_v39 = vpop.f32.mrf.mxu1  ;;  %v52_v33 = vld [vmem:[#allocation2 + $0x68] sm:$0xff] }
  0xf8   :  { %386 = vst.msk [vmem:[#allocation2] sm:$0xff] %vm22_vm0, %v369_v36  ;;  %394 = vst.msk [vmem:[#allocation2 + $0x40] sm:$0xff] %vm22_vm0, %v377_v37 }
  0xf9   :  { %v309_v42 = vpop.f32.mrf.mxu0  ;;  %v341_v43 = vpop.f32.mrf.mxu1 }
  0xfa   :  { %v370_v44 = vadd.f32 %v309_v42, %v40_v40  ;;  %v378_v45 = vadd.f32 %v341_v43, %v48_v41 }
  0xfb   :  { %v311_v46 = vpop.f32.mrf.mxu0  ;;  %v343_v47 = vpop.f32.mrf.mxu1 }
  0xfc   :  { %387 = vst.msk [vmem:[#allocation2 + $0x8] sm:$0xff] %vm22_vm0, %v370_v44  ;;  %395 = vst.msk [vmem:[#allocation2 + $0x48] sm:$0xff] %vm22_vm0, %v378_v45 }
  0xfd   :  { %v314_v51 = vpop.f32.mrf.mxu0  ;;  %v346_v52 = vpop.f32.mrf.mxu1 }
  0xfe   :  { %v371_v54 = vadd.f32 %v314_v51, %v41_v48  ;;  %v379_v55 = vadd.f32 %v346_v52, %v49_v49  ;;  %v45_v51 = vld [vmem:[#allocation2 + $0x30] sm:$0xff] }
  0xff   :  { %v405_v57 = vld [vmem:[#allocation2] sm:$0xff]  ;;  %v316_v59 = vpop.f32.mrf.mxu0  ;;  %v348_v60 = vpop.f32.mrf.mxu1  ;;  %v53_v52 = vld [vmem:[#allocation2 + $0x70] sm:$0xff] }
 0x100   :  { %v413_v58 = vld [vmem:[#allocation2 + $0x40] sm:$0xff]  ;;  %v428_v62 = vmul.f32 %v875_v50, %v405_v57  ;;  %388 = vst.msk [vmem:[#allocation2 + $0x10] sm:$0xff] %vm22_vm0, %v371_v54  ;;  %396 = vst.msk [vmem:[#allocation2 + $0x50] sm:$0xff] %vm22_vm0, %v379_v55 }
 0x101   :  { %v436_v63 = vmul.f32 %v875_v50, %v413_v58  ;;  %v317_v0 = vpop.f32.mrf.mxu0  ;;  %v349_v1 = vpop.f32.mrf.mxu1 }
 0x102   :  { %v451_v2 = vadd.f32 %v880_v53, %v428_v62  ;;  %v372_v4 = vadd.f32 %v317_v0, %v42_v56  ;;  %v380_v5 = vadd.f32 %v349_v1, %v50_v61  ;;  %v46_v0 = vld [vmem:[#allocation2 + $0x38] sm:$0xff] }
 0x103   :  { %v459_v3 = vadd.f32 %v880_v53, %v436_v63  ;;  %v406_v6 = vld [vmem:[#allocation2 + $0x8] sm:$0xff]  ;;  %v319_v8 = vpop.f32.mrf.mxu0  ;;  %v351_v9 = vpop.f32.mrf.mxu1  ;;  %v54_v1 = vld [vmem:[#allocation2 + $0x78] sm:$0xff] }
 0x104   :  { %v414_v7 = vld [vmem:[#allocation2 + $0x48] sm:$0xff]  ;;  %v467_v10 = vmax.f32 %v451_v2, 0.0  ;;  %v429_v12 = vmul.f32 %v875_v50, %v406_v6  ;;  %389 = vst.msk [vmem:[#allocation2 + $0x18] sm:$0xff] %vm22_vm0, %v372_v4  ;;  %397 = vst.msk [vmem:[#allocation2 + $0x58] sm:$0xff] %vm22_vm0, %v380_v5 }
 0x105   :  { %v475_v11 = vmax.f32 %v459_v3, 0.0  ;;  %v437_v13 = vmul.f32 %v875_v50, %v414_v7  ;;  %v322_v16 = vpop.f32.mrf.mxu0  ;;  %v354_v17 = vpop.f32.mrf.mxu1 }
 0x106   :  { %v623_v18 = vpack.c.bf16 %v467_v10, %v467_v10  ;;  %v452_v20 = vadd.f32 %v880_v53, %v429_v12  ;;  %v373_v24 = vadd.f32 %v322_v16, %v43_v14  ;;  %v381_v25 = vadd.f32 %v354_v17, %v51_v15 }
 0x107   :  { %v631_v19 = vpack.c.bf16 %v475_v11, %v475_v11  ;;  %v460_v21 = vadd.f32 %v880_v53, %v437_v13  ;;  %v407_v22 = vld [vmem:[#allocation2 + $0x10] sm:$0xff]  ;;  %v324_v26 = vpop.f32.mrf.mxu0  ;;  %v356_v27 = vpop.f32.mrf.mxu1 }
 0x108   :  { %v415_v23 = vld [vmem:[#allocation2 + $0x50] sm:$0xff]  ;;  %548 = vst.msk [vmem:[%s994_s4] sm:$0xf] %vm547_vm3, %v623_v18  ;;  %v468_v28 = vmax.f32 %v452_v20, 0.0  ;;  %v430_v30 = vmul.f32 %v875_v50, %v407_v22 }
 0x109   :  { %556 = vst.msk [vmem:[%s994_s4 + $0x20] sm:$0xf] %vm547_vm3, %v631_v19  ;;  %v476_v29 = vmax.f32 %v460_v21, 0.0  ;;  %v438_v31 = vmul.f32 %v875_v50, %v415_v23  ;;  %v325_v34 = vpop.f32.mrf.mxu0  ;;  %v357_v35 = vpop.f32.mrf.mxu1 }
 0x10a   :  { %390 = vst.msk [vmem:[#allocation2 + $0x20] sm:$0xff] %vm22_vm0, %v373_v24  ;;  %398 = vst.msk [vmem:[#allocation2 + $0x60] sm:$0xff] %vm22_vm0, %v381_v25  ;;  %v624_v36 = vpack.c.bf16 %v468_v28, %v468_v28  ;;  %v453_v38 = vadd.f32 %v880_v53, %v430_v30  ;;  %v374_v42 = vadd.f32 %v325_v34, %v44_v32 }
 0x10b   :  { %v632_v37 = vpack.c.bf16 %v476_v29, %v476_v29  ;;  %v461_v39 = vadd.f32 %v880_v53, %v438_v31  ;;  %v408_v40 = vld [vmem:[#allocation2 + $0x18] sm:$0xff]  ;;  %v382_v43 = vadd.f32 %v357_v35, %v52_v33  ;;  %v327_v44 = vpop.f32.mrf.mxu0  ;;  %v359_v45 = vpop.f32.mrf.mxu1 }
 0x10c   :  { %v416_v41 = vld [vmem:[#allocation2 + $0x58] sm:$0xff]  ;;  %549 = vst.msk [vmem:[%s994_s4 + $0x4] sm:$0xf] %vm547_vm3, %v624_v36  ;;  %v469_v46 = vmax.f32 %v453_v38, 0.0  ;;  %v431_v48 = vmul.f32 %v875_v50, %v408_v40 }
 0x10d   :  { %557 = vst.msk [vmem:[%s994_s4 + $0x24] sm:$0xf] %vm547_vm3, %v632_v37  ;;  %v477_v47 = vmax.f32 %v461_v39, 0.0  ;;  %v439_v49 = vmul.f32 %v875_v50, %v416_v41  ;;  %v330_v54 = vpop.f32.mrf.mxu0  ;;  %v362_v55 = vpop.f32.mrf.mxu1 }
 0x10e   :  { %391 = vst.msk [vmem:[#allocation2 + $0x28] sm:$0xff] %vm22_vm0, %v374_v42  ;;  %399 = vst.msk [vmem:[#allocation2 + $0x68] sm:$0xff] %vm22_vm0, %v382_v43  ;;  %v625_v56 = vpack.c.bf16 %v469_v46, %v469_v46  ;;  %v454_v58 = vadd.f32 %v880_v53, %v431_v48  ;;  %v375_v60 = vadd.f32 %v330_v54, %v45_v51 }
 0x10f   :  { %v633_v57 = vpack.c.bf16 %v477_v47, %v477_v47  ;;  %v462_v59 = vadd.f32 %v880_v53, %v439_v49  ;;  %v383_v61 = vadd.f32 %v362_v55, %v53_v52  ;;  %v332_v62 = vpop.f32.mrf.mxu0  ;;  %v364_v63 = vpop.f32.mrf.mxu1 }
 0x110   :  { %550 = vst.msk [vmem:[%s994_s4 + $0x8] sm:$0xf] %vm547_vm3, %v625_v56  ;;  %v470_v2 = vmax.f32 %v454_v58, 0.0 }
 0x111   :  { %558 = vst.msk [vmem:[%s994_s4 + $0x28] sm:$0xf] %vm547_vm3, %v633_v57  ;;  %v478_v3 = vmax.f32 %v462_v59, 0.0  ;;  %v409_v4 = vld [vmem:[#allocation2 + $0x20] sm:$0xff]  ;;  %v333_v8 = vpop.f32.mrf.mxu0  ;;  %v365_v9 = vpop.f32.mrf.mxu1 }
 0x112   :  { %v417_v5 = vld [vmem:[#allocation2 + $0x60] sm:$0xff]  ;;  %v432_v6 = vmul.f32 %v875_v50, %v409_v4  ;;  %392 = vst.msk [vmem:[#allocation2 + $0x30] sm:$0xff] %vm22_vm0, %v375_v60  ;;  %400 = vst.msk [vmem:[#allocation2 + $0x70] sm:$0xff] %vm22_vm0, %v383_v61  ;;  %v626_v10 = vpack.c.bf16 %v470_v2, %v470_v2  ;;  %v376_v12 = vadd.f32 %v333_v8, %v46_v0 }
 0x113   :  { %v440_v7 = vmul.f32 %v875_v50, %v417_v5  ;;  %v634_v11 = vpack.c.bf16 %v478_v3, %v478_v3  ;;  %v384_v13 = vadd.f32 %v365_v9, %v54_v1  ;;  %v335_v16 = vpop.f32.mrf.mxu0  ;;  %v367_v17 = vpop.f32.mrf.mxu1 }
 0x114   :  { %v455_v14 = vadd.f32 %v880_v53, %v432_v6  ;;  %551 = vst.msk [vmem:[%s994_s4 + $0xc] sm:$0xf] %vm547_vm3, %v626_v10 }
 0x115   :  { %v463_v15 = vadd.f32 %v880_v53, %v440_v7  ;;  %559 = vst.msk [vmem:[%s994_s4 + $0x2c] sm:$0xf] %vm547_vm3, %v634_v11  ;;  %v410_v18 = vld [vmem:[#allocation2 + $0x28] sm:$0xff] }
 0x116   :  { %v418_v19 = vld [vmem:[#allocation2 + $0x68] sm:$0xff]  ;;  %393 = vst.msk [vmem:[#allocation2 + $0x38] sm:$0xff] %vm22_vm0, %v376_v12  ;;  %401 = vst.msk [vmem:[#allocation2 + $0x78] sm:$0xff] %vm22_vm0, %v384_v13  ;;  %v471_v20 = vmax.f32 %v455_v14, 0.0  ;;  %v433_v22 = vmul.f32 %v875_v50, %v410_v18 }
 0x117   :  { %v479_v21 = vmax.f32 %v463_v15, 0.0  ;;  %v441_v23 = vmul.f32 %v875_v50, %v418_v19 }
 0x118   :  { %v627_v24 = vpack.c.bf16 %v471_v20, %v471_v20  ;;  %v456_v26 = vadd.f32 %v880_v53, %v433_v22 }
 0x119   :  { %v635_v25 = vpack.c.bf16 %v479_v21, %v479_v21  ;;  %v464_v27 = vadd.f32 %v880_v53, %v441_v23  ;;  %v411_v28 = vld [vmem:[#allocation2 + $0x30] sm:$0xff] }
 0x11a   :  { %v419_v29 = vld [vmem:[#allocation2 + $0x70] sm:$0xff]  ;;  %552 = vst.msk [vmem:[%s994_s4 + $0x10] sm:$0xf] %vm547_vm3, %v627_v24  ;;  %v472_v30 = vmax.f32 %v456_v26, 0.0  ;;  %v434_v32 = vmul.f32 %v875_v50, %v411_v28 }
 0x11b   :  { %560 = vst.msk [vmem:[%s994_s4 + $0x30] sm:$0xf] %vm547_vm3, %v635_v25  ;;  %v480_v31 = vmax.f32 %v464_v27, 0.0  ;;  %v442_v33 = vmul.f32 %v875_v50, %v419_v29 }
 0x11c   :  { %v628_v34 = vpack.c.bf16 %v472_v30, %v472_v30  ;;  %v457_v36 = vadd.f32 %v880_v53, %v434_v32 }
 0x11d   :  { %v636_v35 = vpack.c.bf16 %v480_v31, %v480_v31  ;;  %v465_v37 = vadd.f32 %v880_v53, %v442_v33  ;;  %v412_v38 = vld [vmem:[#allocation2 + $0x38] sm:$0xff] }
 0x11e   :  { %v420_v39 = vld [vmem:[#allocation2 + $0x78] sm:$0xff]  ;;  %v435_v40 = vmul.f32 %v875_v50, %v412_v38  ;;  %553 = vst.msk [vmem:[%s994_s4 + $0x14] sm:$0xf] %vm547_vm3, %v628_v34  ;;  %v473_v42 = vmax.f32 %v457_v36, 0.0 }
 0x11f   :  { %v443_v41 = vmul.f32 %v875_v50, %v420_v39  ;;  %561 = vst.msk [vmem:[%s994_s4 + $0x34] sm:$0xf] %vm547_vm3, %v636_v35  ;;  %v481_v43 = vmax.f32 %v465_v37, 0.0 }
 0x120   :  { %v458_v44 = vadd.f32 %v880_v53, %v435_v40  ;;  %v629_v46 = vpack.c.bf16 %v473_v42, %v473_v42 }
 0x121   :  { %v466_v45 = vadd.f32 %v880_v53, %v443_v41  ;;  %v637_v47 = vpack.c.bf16 %v481_v43, %v481_v43 }
 0x122   :  { %v474_v48 = vmax.f32 %v458_v44, 0.0  ;;  %554 = vst.msk [vmem:[%s994_s4 + $0x18] sm:$0xf] %vm547_vm3, %v629_v46 }
 0x123   :  { %v482_v50 = vmax.f32 %v466_v45, 0.0  ;;  %562 = vst.msk [vmem:[%s994_s4 + $0x38] sm:$0xf] %vm547_vm3, %v637_v47 }
 0x124   :  { %v630_v49 = vpack.c.bf16 %v474_v48, %v474_v48 }
 0x125   :  { %v638_v51 = vpack.c.bf16 %v482_v50, %v482_v50 }
 0x126   :  { %555 = vst.msk [vmem:[%s994_s4 + $0x1c] sm:$0xf] %vm547_vm3, %v630_v49 }
 0x127   :  { %563 = vst.msk [vmem:[%s994_s4 + $0x3c] sm:$0xf] %vm547_vm3, %v638_v51 }

// kernel: patch2d_forward.14
= control target key start
LH: loop header
LB: loop body
LE: loop exit
PB: predicated region body
PF: predicated region fallthrough
CT: control target
= control target key end

     0   :  { %vm22_vm0 = vcmask 523264   ;;  %v784_v46 = vmov 0.0   ;;  %vm592_vm1 = vcmask 519168   ;;  %s976_s1 = inlined_call_operand.vmem [shape: bf16[576,64], index: 1, kind: input, shape index: {}]   ;;  %s977_s0 = inlined_call_operand.vmem [shape: bf16[32,576], index: 0, kind: input, shape index: {}]   ;;  %s978_s2 = inlined_call_operand.vmem [shape: f32[1,64], index: 2, kind: input, shape index: {}]   ;;  %s979_s3 = inlined_call_operand.vmem [shape: f32[1,64], index: 3, kind: input, shape index: {}]   ;;  %s980_s4 = inlined_call_operand.vmem [shape: bf16[32,64], index: 4, kind: output, shape index: {}]  }
   0x1   :  { %v734_v0 = vld [vmem:[%s976_s1 + $0x78] sm:$0xff]   ;;  %v738_v4 = vld [vmem:[%s976_s1 + $0x70] sm:$0xff]   ;;  %v742_v8 = vld [vmem:[%s976_s1 + $0x68] sm:$0xff]   ;;  %25 = vst.msk [vmem:[#allocation2 + $0x10] sm:$0xff] %vm22_vm0, %v784_v46 }
   0x2   :  { %v735_v1 = vld [vmem:[%s976_s1 + $0xf8] sm:$0xff]   ;;  %659 = vmatprep.subr.bf16.mxu0 %v734_v0  ;;  %v739_v5 = vld [vmem:[%s976_s1 + $0xf0] sm:$0xff]   ;;  %v743_v9 = vld [vmem:[%s976_s1 + $0xe8] sm:$0xff]   ;;  %23 = vst.msk [vmem:[#allocation2] sm:$0xff] %vm22_vm0, %v784_v46 }
   0x3   :  { %v736_v2 = vld [vmem:[%s976_s1 + $0x38] sm:$0xff]   ;;  %687 = vmatprep.subr.bf16.mxu1 %v735_v1  ;;  %v740_v6 = vld [vmem:[%s976_s1 + $0x30] sm:$0xff]   ;;  %v744_v10 = vld [vmem:[%s976_s1 + $0x28] sm:$0xff]   ;;  %24 = vst.msk [vmem:[#allocation2 + $0x8] sm:$0xff] %vm22_vm0, %v784_v46 }
   0x4   :  { %v737_v3 = vld [vmem:[%s976_s1 + $0xb8] sm:$0xff]   ;;  %660 = vmatpush3.bf16.msra.mxu0 %v736_v2  ;;  %v741_v7 = vld [vmem:[%s976_s1 + $0xb0] sm:$0xff]   ;;  %v745_v11 = vld [vmem:[%s976_s1 + $0xa8] sm:$0xff]   ;;  %26 = vst.msk [vmem:[#allocation2 + $0x18] sm:$0xff] %vm22_vm0, %v784_v46 }
   0x5   :  { %688 = vmatpush3.bf16.msra.mxu1 %v737_v3  ;;  %661 = vmatprep.subr.bf16.mxu0 %v738_v4  ;;  %v746_v12 = vld [vmem:[%s976_s1 + $0x60] sm:$0xff]   ;;  %v750_v16 = vld [vmem:[%s976_s1 + $0x58] sm:$0xff]   ;;  %v754_v20 = vld [vmem:[%s976_s1 + $0x50] sm:$0xff]  }
   0x6   :  { %689 = vmatprep.subr.bf16.mxu1 %v739_v5  ;;  %v747_v13 = vld [vmem:[%s976_s1 + $0xe0] sm:$0xff]   ;;  %v751_v17 = vld [vmem:[%s976_s1 + $0xd8] sm:$0xff]   ;;  %v755_v21 = vld [vmem:[%s976_s1 + $0xd0] sm:$0xff]  }
   0x7   :  { %v748_v14 = vld [vmem:[%s976_s1 + $0x20] sm:$0xff]   ;;  %v752_v18 = vld [vmem:[%s976_s1 + $0x18] sm:$0xff]   ;;  %v756_v22 = vld [vmem:[%s976_s1 + $0x10] sm:$0xff]  }
   0x8   :  { %662 = vmatpush3.bf16.msra.mxu0 %v740_v6  ;;  %v749_v15 = vld [vmem:[%s976_s1 + $0xa0] sm:$0xff]   ;;  %v753_v19 = vld [vmem:[%s976_s1 + $0x98] sm:$0xff]   ;;  %v757_v23 = vld [vmem:[%s976_s1 + $0x90] sm:$0xff]  }
   0x9   :  { %690 = vmatpush3.bf16.msra.mxu1 %v741_v7  ;;  %663 = vmatprep.subr.bf16.mxu0 %v742_v8  ;;  %v758_v24 = vld [vmem:[%s976_s1 + $0x48] sm:$0xff]   ;;  %v762_v28 = vld [vmem:[%s976_s1 + $0x40] sm:$0xff]   ;;  %v772_v36 = vld [vmem:[%s976_s1 + $0x118] sm:$0xff]  }
   0xa   :  { %691 = vmatprep.subr.bf16.mxu1 %v743_v9  ;;  %v759_v25 = vld [vmem:[%s976_s1 + $0xc8] sm:$0xff]   ;;  %v763_v29 = vld [vmem:[%s976_s1 + $0xc0] sm:$0xff]   ;;  %v773_v37 = vld [vmem:[%s976_s1 + $0x110] sm:$0xff]  }
   0xb   :  { %v760_v26 = vld [vmem:[%s976_s1 + $0x8] sm:$0xff]   ;;  %v764_v30 = vld [vmem:[%s976_s1] sm:$0xff]   ;;  %v29_v6 = vld [vmem:[#allocation2 + $0x10] sm:$0xff] }
   0xc   :  { %664 = vmatpush3.bf16.msra.mxu0 %v744_v10  ;;  %v761_v27 = vld [vmem:[%s976_s1 + $0x88] sm:$0xff]   ;;  %v765_v31 = vld [vmem:[%s976_s1 + $0x80] sm:$0xff]  }
   0xd   :  { %692 = vmatpush3.bf16.msra.mxu1 %v745_v11  ;;  %665 = vmatprep.subr.bf16.mxu0 %v746_v12  ;;  %v766_v32 = vld [vmem:[%s977_s0] ss:$20 sps:$4 sm:$0xff]   ;;  %v768_v33 = vld [vmem:[%s977_s0 + $0x4] ss:$20 sps:$4 sm:$0xff]   ;;  %v769_v34 = vld [vmem:[%s977_s0 + $0x8] ss:$20 sps:$4 sm:$0xff]  }
   0xe   :  { %693 = vmatprep.subr.bf16.mxu1 %v747_v13  ;;  %v771_v35 = vld [vmem:[%s977_s0 + $0xc] ss:$20 sps:$4 sm:$0xff]   ;;  %420 = vmatprep.mubr.bf16.mxu0 %v768_v33  ;;  %v776_v39 = vld [vmem:[%s977_s0 + $0x34] ss:$20 sps:$4 sm:$0xff]   ;;  %v779_v42 = vld [vmem:[%s977_s0 + $0x30] ss:$20 sps:$4 sm:$0xff]  }
   0xf   :  { %469 = vmatprep.mubr.bf16.mxu1 %v771_v35  ;;  %v774_v38 = vld [vmem:[%s977_s0 + $0x2c] ss:$20 sps:$4 sm:$0xff]   ;;  %v778_v40 = vld [vmem:[%s977_s0 + $0x28] ss:$20 sps:$4 sm:$0xff]   ;;  %v782_v43 = vld [vmem:[%s977_s0 + $0x10] ss:$20 sps:$4 sm:$0xff]  }
  0x10   :  { %666 = vmatpush3.bf16.msra.mxu0 %v748_v14  ;;  %v780_v41 = vld [vmem:[%s976_s1 + $0x108] sm:$0xff]   ;;  %v781_v44 = vld [vmem:[%s976_s1 + $0x100] sm:$0xff]  }
  0x11   :  { %694 = vmatpush3.bf16.msra.mxu1 %v749_v15  ;;  %667 = vmatprep.subr.bf16.mxu0 %v750_v16  ;;  %v783_v45 = vld [vmem:[%s977_s0 + $0x38] ss:$20 sps:$4 sm:$0xff]   ;;  %v27_v12 = vld [vmem:[#allocation2] sm:$0xff] }
  0x12   :  { %695 = vmatprep.subr.bf16.mxu1 %v751_v17  ;;  %v30_v17 = vld [vmem:[#allocation2 + $0x18] sm:$0xff] }
  0x14   :  { %668 = vmatpush3.bf16.msra.mxu0 %v752_v18 }
  0x15   :  { %696 = vmatpush3.bf16.msra.mxu1 %v753_v19  ;;  %669 = vmatprep.subr.bf16.mxu0 %v754_v20 }
  0x16   :  { %697 = vmatprep.subr.bf16.mxu1 %v755_v21 }
  0x18   :  { %670 = vmatpush3.bf16.msra.mxu0 %v756_v22  ;;  %v28_v22 = vld [vmem:[#allocation2 + $0x8] sm:$0xff] }
  0x19   :  { %698 = vmatpush3.bf16.msra.mxu1 %v757_v23  ;;  %671 = vmatprep.subr.bf16.mxu0 %v758_v24 }
  0x1a   :  { %699 = vmatprep.subr.bf16.mxu1 %v759_v25 }
  0x1c   :  { %672 = vmatpush3.bf16.msra.mxu0 %v760_v26 }
  0x1d   :  { %700 = vmatpush3.bf16.msra.mxu1 %v761_v27  ;;  %673 = vmatprep.subr.bf16.mxu0 %v762_v28  ;;  %v649_v27 = vld [vmem:[%s978_s2] ss:$0 sm:$0xff] }
  0x1e   :  { %701 = vmatprep.subr.bf16.mxu1 %v763_v29  ;;  %v650_v29 = vld [vmem:[%s979_s3] ss:$0 sm:$0xff] }
  0x20   :  { %674 = vmatpush3.bf16.msra.mxu0 %v764_v30 }
  0x21   :  { %702 = vmatpush3.bf16.msra.mxu1 %v765_v31  ;;  %721 = vmatprep.subr.bf16.mxu0 %v772_v36 }
  0x23   :  { %421 = vmatmul.mubr.bf16.vlgmr.msra.gmra.mxu0 %v766_v32 }
  0x24   :  { %470 = vmatmul.mubr.bf16.vlgmr.msra.gmra.mxu1 %v769_v34  ;;  %722 = vmatpush3.bf16.msra.mxu0 %v772_v36 }
  0x25   :  { %723 = vmatprep.subr.bf16.mxu0 %v773_v37  ;;  %428 = vmatprep.mubr.bf16.mxu0 %v774_v38 }
  0x26   :  { %477 = vmatprep.mubr.bf16.mxu1 %v776_v39 }
  0x28   :  { %724 = vmatpush3.bf16.msra.mxu0 %v773_v37 }
  0x29   :  { %725 = vmatprep.subr.bf16.mxu0 %v780_v41 }
  0x2b   :  { %429 = vmatmul.mubr.bf16.gmra.mxu0 %v778_v40 }
  0x2c   :  { %478 = vmatmul.mubr.bf16.gmra.mxu1 %v779_v42  ;;  %729 = vmatprep.mubr.msk.bf16.mxu0 %vm22_vm0, %v782_v43 }
  0x2d   :  { %726 = vmatpush3.bf16.msra.mxu0 %v780_v41 }
  0x2e   :  { %727 = vmatprep.subr.bf16.mxu0 %v781_v44 }
  0x31   :  { %728 = vmatpush3.bf16.msra.mxu0 %v781_v44 }
  0x34   :  { %730 = vmatmul.mubr.msk.bf16.vlgmr.msra.gmra.mxu0 %vm22_vm0, %v783_v45 }
  0xe3   :  { %v675_v47 = vpop.f32.mrf.mxu0 }
  0xe4   :  { %v703_v48 = vpop.f32.mrf.mxu1 }
  0xe5   :  { %v676_v49 = vpop.f32.mrf.mxu0 }
  0xe6   :  { %v704_v50 = vpop.f32.mrf.mxu1  ;;  %v677_v63 = vadd.f32 %v676_v49, %v675_v47 }
  0xe7   :  { %v678_v51 = vpop.f32.mrf.mxu0  ;;  %v705_v0 = vadd.f32 %v704_v50, %v703_v48 }
  0xe8   :  { %v706_v52 = vpop.f32.mrf.mxu1 }
  0xe9   :  { %v679_v53 = vpop.f32.mrf.mxu0  ;;  %v472_v11 = vadd.f32 %v705_v0, %v677_v63 }
  0xea   :  { %v707_v54 = vpop.f32.mrf.mxu1  ;;  %v680_v8 = vadd.f32 %v679_v53, %v678_v51 }
  0xeb   :  { %v681_v55 = vpop.f32.mrf.mxu0  ;;  %v708_v9 = vadd.f32 %v707_v54, %v706_v52 }
  0xec   :  { %v709_v56 = vpop.f32.mrf.mxu1 }
  0xed   :  { %v682_v57 = vpop.f32.mrf.mxu0  ;;  %v475_v21 = vadd.f32 %v708_v9, %v680_v8 }
  0xee   :  { %v710_v58 = vpop.f32.mrf.mxu1  ;;  %v683_v59 = vadd.f32 %v682_v57, %v681_v55 }
  0xef   :  { %v711_v60 = vadd.f32 %v710_v58, %v709_v56  ;;  %v684_v61 = vpop.f32.mrf.mxu0 }
  0xf0   :  { %v712_v62 = vpop.f32.mrf.mxu1 }
  0xf1   :  { %v685_v1 = vpop.f32.mrf.mxu0  ;;  %v480_v5 = vadd.f32 %v711_v60, %v683_v59 }
  0xf2   :  { %v713_v2 = vpop.f32.mrf.mxu1  ;;  %v686_v3 = vadd.f32 %v685_v1, %v684_v61 }
  0xf3   :  { %v714_v4 = vadd.f32 %v713_v2, %v712_v62 }
  0xf4   :  { %v731_v7 = vpop.f32.mrf.mxu0 }
  0xf5   :  { %v529_v10 = vadd.f32 %v731_v7, %v480_v5  ;;  %v483_v16 = vadd.f32 %v714_v4, %v686_v3 }
  0xf6   :  { %v520_v13 = vpop.f32.mrf.mxu0 }
  0xf7   :  { %v537_v14 = vadd.f32 %v529_v10, %v29_v6  ;;  %v521_v15 = vadd.f32 %v520_v13, %v472_v11 }
  0xf8   :  { %v732_v18 = vpop.f32.mrf.mxu0 }
  0xf9   :  { %541 = vst.msk [vmem:[#allocation2 + $0x10] sm:$0xff] %vm22_vm0, %v537_v14  ;;  %v535_v19 = vadd.f32 %v521_v15, %v27_v12  ;;  %v532_v20 = vadd.f32 %v732_v18, %v483_v16 }
  0xfa   :  { %v523_v23 = vpop.f32.mrf.mxu0 }
  0xfb   :  { %539 = vst.msk [vmem:[#allocation2] sm:$0xff] %vm22_vm0, %v535_v19  ;;  %v538_v24 = vadd.f32 %v532_v20, %v30_v17  ;;  %v524_v25 = vadd.f32 %v523_v23, %v475_v21 }
  0xfd   :  { %542 = vst.msk [vmem:[#allocation2 + $0x18] sm:$0xff] %vm22_vm0, %v538_v24  ;;  %v536_v26 = vadd.f32 %v524_v25, %v28_v22 }
  0xff   :  { %540 = vst.msk [vmem:[#allocation2 + $0x8] sm:$0xff] %vm22_vm0, %v536_v26 }
 0x100   :  { %v548_v28 = vld [vmem:[#allocation2 + $0x10] sm:$0xff] }
 0x101   :  { %v559_v30 = vmul.f32 %v649_v27, %v548_v28 }
 0x102   :  { %v546_v31 = vld [vmem:[#allocation2] sm:$0xff] }
 0x103   :  { %v570_v32 = vadd.f32 %v650_v29, %v559_v30  ;;  %v557_v33 = vmul.f32 %v649_v27, %v546_v31 }
 0x104   :  { %v549_v34 = vld [vmem:[#allocation2 + $0x18] sm:$0xff] }
 0x105   :  { %v574_v35 = vmax.f32 %v570_v32, 0.0  ;;  %v568_v36 = vadd.f32 %v650_v29, %v557_v33  ;;  %v560_v37 = vmul.f32 %v649_v27, %v549_v34 }
 0x106   :  { %v547_v38 = vld [vmem:[#allocation2 + $0x8] sm:$0xff] }
 0x107   :  { %v657_v39 = vpack.c.bf16 %v574_v35, %v574_v35  ;;  %v572_v40 = vmax.f32 %v568_v36, 0.0  ;;  %v571_v41 = vadd.f32 %v650_v29, %v560_v37  ;;  %v558_v42 = vmul.f32 %v649_v27, %v547_v38 }
 0x109   :  { %595 = vst.msk [vmem:[%s980_s4 + $0x8] sm:$0xf] %vm592_vm1, %v657_v39  ;;  %v655_v43 = vpack.c.bf16 %v572_v40, %v572_v40  ;;  %v575_v44 = vmax.f32 %v571_v41, 0.0  ;;  %v569_v45 = vadd.f32 %v650_v29, %v558_v42 }
 0x10b   :  { %593 = vst.msk [vmem:[%s980_s4] sm:$0xf] %vm592_vm1, %v655_v43  ;;  %v658_v46 = vpack.c.bf16 %v575_v44, %v575_v44  ;;  %v573_v47 = vmax.f32 %v569_v45, 0.0 }
 0x10d   :  { %596 = vst.msk [vmem:[%s980_s4 + $0xc] sm:$0xf] %vm592_vm1, %v658_v46  ;;  %v656_v48 = vpack.c.bf16 %v573_v47, %v573_v47 }
 0x10f   :  { %594 = vst.msk [vmem:[%s980_s4 + $0x4] sm:$0xf] %vm592_vm1, %v656_v48 }

// kernel: patch2d_forward.15
= control target key start
LH: loop header
LB: loop body
LE: loop exit
PB: predicated region body
PF: predicated region fallthrough
CT: control target
= control target key end

     0   :  { %vm25_vm0 = vcmask 523264   ;;  %v812_v46 = vmov 0.0   ;;  %vm611_vm1 = vcmask 519168   ;;  %s1015_s1 = inlined_call_operand.vmem [shape: bf16[576,64], index: 1, kind: input, shape index: {}]   ;;  %s1016_s0 = inlined_call_operand.vmem [shape: bf16[32,576], index: 0, kind: input, shape index: {}]   ;;  %s1017_s2 = inlined_call_operand.vmem [shape: f32[1,64], index: 2, kind: input, shape index: {}]   ;;  %s1018_s3 = inlined_call_operand.vmem [shape: f32[1,64], index: 3, kind: input, shape index: {}]   ;;  %s1019_s4 = inlined_call_operand.vmem [shape: bf16[32,64], index: 4, kind: input, shape index: {}]   ;;  %s1020_s5 = inlined_call_operand.vmem [shape: bf16[32,64], index: 5, kind: output, shape index: {}]  }
   0x1   :  { %v762_v0 = vld [vmem:[%s1015_s1 + $0x78] sm:$0xff]   ;;  %v766_v4 = vld [vmem:[%s1015_s1 + $0x70] sm:$0xff]   ;;  %v770_v8 = vld [vmem:[%s1015_s1 + $0x68] sm:$0xff]   ;;  %28 = vst.msk [vmem:[#allocation2 + $0x10] sm:$0xff] %vm25_vm0, %v812_v46 }
   0x2   :  { %v763_v1 = vld [vmem:[%s1015_s1 + $0xf8] sm:$0xff]   ;;  %687 = vmatprep.subr.bf16.mxu0 %v762_v0  ;;  %v767_v5 = vld [vmem:[%s1015_s1 + $0xf0] sm:$0xff]   ;;  %v771_v9 = vld [vmem:[%s1015_s1 + $0xe8] sm:$0xff]   ;;  %26 = vst.msk [vmem:[#allocation2] sm:$0xff] %vm25_vm0, %v812_v46 }
   0x3   :  { %v764_v2 = vld [vmem:[%s1015_s1 + $0x38] sm:$0xff]   ;;  %715 = vmatprep.subr.bf16.mxu1 %v763_v1  ;;  %v768_v6 = vld [vmem:[%s1015_s1 + $0x30] sm:$0xff]   ;;  %v772_v10 = vld [vmem:[%s1015_s1 + $0x28] sm:$0xff]   ;;  %27 = vst.msk [vmem:[#allocation2 + $0x8] sm:$0xff] %vm25_vm0, %v812_v46 }
   0x4   :  { %v765_v3 = vld [vmem:[%s1015_s1 + $0xb8] sm:$0xff]   ;;  %688 = vmatpush3.bf16.msra.mxu0 %v764_v2  ;;  %v769_v7 = vld [vmem:[%s1015_s1 + $0xb0] sm:$0xff]   ;;  %v773_v11 = vld [vmem:[%s1015_s1 + $0xa8] sm:$0xff]   ;;  %29 = vst.msk [vmem:[#allocation2 + $0x18] sm:$0xff] %vm25_vm0, %v812_v46 }
   0x5   :  { %716 = vmatpush3.bf16.msra.mxu1 %v765_v3  ;;  %689 = vmatprep.subr.bf16.mxu0 %v766_v4  ;;  %v774_v12 = vld [vmem:[%s1015_s1 + $0x60] sm:$0xff]   ;;  %v778_v16 = vld [vmem:[%s1015_s1 + $0x58] sm:$0xff]   ;;  %v782_v20 = vld [vmem:[%s1015_s1 + $0x50] sm:$0xff]  }
   0x6   :  { %717 = vmatprep.subr.bf16.mxu1 %v767_v5  ;;  %v775_v13 = vld [vmem:[%s1015_s1 + $0xe0] sm:$0xff]   ;;  %v779_v17 = vld [vmem:[%s1015_s1 + $0xd8] sm:$0xff]   ;;  %v783_v21 = vld [vmem:[%s1015_s1 + $0xd0] sm:$0xff]  }
   0x7   :  { %v776_v14 = vld [vmem:[%s1015_s1 + $0x20] sm:$0xff]   ;;  %v780_v18 = vld [vmem:[%s1015_s1 + $0x18] sm:$0xff]   ;;  %v784_v22 = vld [vmem:[%s1015_s1 + $0x10] sm:$0xff]  }
   0x8   :  { %690 = vmatpush3.bf16.msra.mxu0 %v768_v6  ;;  %v777_v15 = vld [vmem:[%s1015_s1 + $0xa0] sm:$0xff]   ;;  %v781_v19 = vld [vmem:[%s1015_s1 + $0x98] sm:$0xff]   ;;  %v785_v23 = vld [vmem:[%s1015_s1 + $0x90] sm:$0xff]  }
   0x9   :  { %718 = vmatpush3.bf16.msra.mxu1 %v769_v7  ;;  %691 = vmatprep.subr.bf16.mxu0 %v770_v8  ;;  %v786_v24 = vld [vmem:[%s1015_s1 + $0x48] sm:$0xff]   ;;  %v790_v28 = vld [vmem:[%s1015_s1 + $0x40] sm:$0xff]   ;;  %v800_v36 = vld [vmem:[%s1015_s1 + $0x118] sm:$0xff]  }
   0xa   :  { %719 = vmatprep.subr.bf16.mxu1 %v771_v9  ;;  %v787_v25 = vld [vmem:[%s1015_s1 + $0xc8] sm:$0xff]   ;;  %v791_v29 = vld [vmem:[%s1015_s1 + $0xc0] sm:$0xff]   ;;  %v801_v37 = vld [vmem:[%s1015_s1 + $0x110] sm:$0xff]  }
   0xb   :  { %v788_v26 = vld [vmem:[%s1015_s1 + $0x8] sm:$0xff]   ;;  %v792_v30 = vld [vmem:[%s1015_s1] sm:$0xff]   ;;  %v32_v6 = vld [vmem:[#allocation2 + $0x10] sm:$0xff] }
   0xc   :  { %692 = vmatpush3.bf16.msra.mxu0 %v772_v10  ;;  %v789_v27 = vld [vmem:[%s1015_s1 + $0x88] sm:$0xff]   ;;  %v793_v31 = vld [vmem:[%s1015_s1 + $0x80] sm:$0xff]  }
   0xd   :  { %720 = vmatpush3.bf16.msra.mxu1 %v773_v11  ;;  %693 = vmatprep.subr.bf16.mxu0 %v774_v12  ;;  %v794_v32 = vld [vmem:[%s1016_s0] ss:$20 sps:$4 sm:$0xff]   ;;  %v796_v33 = vld [vmem:[%s1016_s0 + $0x4] ss:$20 sps:$4 sm:$0xff]   ;;  %v797_v34 = vld [vmem:[%s1016_s0 + $0x8] ss:$20 sps:$4 sm:$0xff]  }
   0xe   :  { %721 = vmatprep.subr.bf16.mxu1 %v775_v13  ;;  %v799_v35 = vld [vmem:[%s1016_s0 + $0xc] ss:$20 sps:$4 sm:$0xff]   ;;  %423 = vmatprep.mubr.bf16.mxu0 %v796_v33  ;;  %v804_v39 = vld [vmem:[%s1016_s0 + $0x34] ss:$20 sps:$4 sm:$0xff]   ;;  %v807_v42 = vld [vmem:[%s1016_s0 + $0x30] ss:$20 sps:$4 sm:$0xff]  }
   0xf   :  { %472 = vmatprep.mubr.bf16.mxu1 %v799_v35  ;;  %v802_v38 = vld [vmem:[%s1016_s0 + $0x2c] ss:$20 sps:$4 sm:$0xff]   ;;  %v806_v40 = vld [vmem:[%s1016_s0 + $0x28] ss:$20 sps:$4 sm:$0xff]   ;;  %v810_v43 = vld [vmem:[%s1016_s0 + $0x10] ss:$20 sps:$4 sm:$0xff]  }
  0x10   :  { %694 = vmatpush3.bf16.msra.mxu0 %v776_v14  ;;  %v808_v41 = vld [vmem:[%s1015_s1 + $0x108] sm:$0xff]   ;;  %v809_v44 = vld [vmem:[%s1015_s1 + $0x100] sm:$0xff]  }
  0x11   :  { %722 = vmatpush3.bf16.msra.mxu1 %v777_v15  ;;  %695 = vmatprep.subr.bf16.mxu0 %v778_v16  ;;  %v811_v45 = vld [vmem:[%s1016_s0 + $0x38] ss:$20 sps:$4 sm:$0xff]   ;;  %v30_v12 = vld [vmem:[#allocation2] sm:$0xff] }
  0x12   :  { %723 = vmatprep.subr.bf16.mxu1 %v779_v17  ;;  %v33_v17 = vld [vmem:[#allocation2 + $0x18] sm:$0xff]  ;;  %v679_v33 = vld [vmem:[%s1019_s4] sm:$0xff]  }
  0x14   :  { %696 = vmatpush3.bf16.msra.mxu0 %v780_v18 }
  0x15   :  { %724 = vmatpush3.bf16.msra.mxu1 %v781_v19  ;;  %697 = vmatprep.subr.bf16.mxu0 %v782_v20 }
  0x16   :  { %725 = vmatprep.subr.bf16.mxu1 %v783_v21 }
  0x18   :  { %698 = vmatpush3.bf16.msra.mxu0 %v784_v22  ;;  %v31_v22 = vld [vmem:[#allocation2 + $0x8] sm:$0xff] }
  0x19   :  { %726 = vmatpush3.bf16.msra.mxu1 %v785_v23  ;;  %699 = vmatprep.subr.bf16.mxu0 %v786_v24 }
  0x1a   :  { %727 = vmatprep.subr.bf16.mxu1 %v787_v25 }
  0x1c   :  { %700 = vmatpush3.bf16.msra.mxu0 %v788_v26 }
  0x1d   :  { %728 = vmatpush3.bf16.msra.mxu1 %v789_v27  ;;  %701 = vmatprep.subr.bf16.mxu0 %v790_v28  ;;  %v668_v27 = vld [vmem:[%s1017_s2] ss:$0 sm:$0xff] }
  0x1e   :  { %729 = vmatprep.subr.bf16.mxu1 %v791_v29  ;;  %v669_v29 = vld [vmem:[%s1018_s3] ss:$0 sm:$0xff] }
  0x20   :  { %702 = vmatpush3.bf16.msra.mxu0 %v792_v30  ;;  %v686_v30 = vld [vmem:[%s1019_s4 + $0x8] sm:$0xff]  }
  0x21   :  { %730 = vmatpush3.bf16.msra.mxu1 %v793_v31  ;;  %749 = vmatprep.subr.bf16.mxu0 %v800_v36  ;;  %v684_v35 = vunpack.c.l.bf16 %v686_v30 }
  0x23   :  { %424 = vmatmul.mubr.bf16.vlgmr.msra.gmra.mxu0 %v794_v32 }
  0x24   :  { %473 = vmatmul.mubr.bf16.vlgmr.msra.gmra.mxu1 %v797_v34  ;;  %750 = vmatpush3.bf16.msra.mxu0 %v800_v36 }
  0x25   :  { %751 = vmatprep.subr.bf16.mxu0 %v801_v37  ;;  %431 = vmatprep.mubr.bf16.mxu0 %v802_v38 }
  0x26   :  { %480 = vmatprep.mubr.bf16.mxu1 %v804_v39 }
  0x28   :  { %752 = vmatpush3.bf16.msra.mxu0 %v801_v37 }
  0x29   :  { %753 = vmatprep.subr.bf16.mxu0 %v808_v41 }
  0x2b   :  { %432 = vmatmul.mubr.bf16.gmra.mxu0 %v806_v40  ;;  %v680_v40 = vunpack.c.l.bf16 %v679_v33 }
  0x2c   :  { %481 = vmatmul.mubr.bf16.gmra.mxu1 %v807_v42  ;;  %757 = vmatprep.mubr.msk.bf16.mxu0 %vm25_vm0, %v810_v43  ;;  %v685_v42 = vunpack.c.h.bf16 %v686_v30 }
  0x2d   :  { %754 = vmatpush3.bf16.msra.mxu0 %v808_v41 }
  0x2e   :  { %755 = vmatprep.subr.bf16.mxu0 %v809_v44 }
  0x31   :  { %756 = vmatpush3.bf16.msra.mxu0 %v809_v44 }
  0x34   :  { %758 = vmatmul.mubr.msk.bf16.vlgmr.msra.gmra.mxu0 %vm25_vm0, %v811_v45 }
  0xe3   :  { %v703_v47 = vpop.f32.mrf.mxu0 }
  0xe4   :  { %v731_v48 = vpop.f32.mrf.mxu1 }
  0xe5   :  { %v704_v49 = vpop.f32.mrf.mxu0 }
  0xe6   :  { %v732_v50 = vpop.f32.mrf.mxu1  ;;  %v705_v63 = vadd.f32 %v704_v49, %v703_v47 }
  0xe7   :  { %v706_v51 = vpop.f32.mrf.mxu0  ;;  %v733_v0 = vadd.f32 %v732_v50, %v731_v48  ;;  %v681_v48 = vunpack.c.h.bf16 %v679_v33 }
  0xe8   :  { %v734_v52 = vpop.f32.mrf.mxu1 }
  0xe9   :  { %v707_v53 = vpop.f32.mrf.mxu0  ;;  %v475_v11 = vadd.f32 %v733_v0, %v705_v63 }
  0xea   :  { %v735_v54 = vpop.f32.mrf.mxu1  ;;  %v708_v8 = vadd.f32 %v707_v53, %v706_v51 }
  0xeb   :  { %v709_v55 = vpop.f32.mrf.mxu0  ;;  %v736_v9 = vadd.f32 %v735_v54, %v734_v52 }
  0xec   :  { %v737_v56 = vpop.f32.mrf.mxu1 }
  0xed   :  { %v710_v57 = vpop.f32.mrf.mxu0  ;;  %v478_v21 = vadd.f32 %v736_v9, %v708_v8 }
  0xee   :  { %v738_v58 = vpop.f32.mrf.mxu1  ;;  %v711_v59 = vadd.f32 %v710_v57, %v709_v55 }
  0xef   :  { %v739_v60 = vadd.f32 %v738_v58, %v737_v56  ;;  %v712_v61 = vpop.f32.mrf.mxu0 }
  0xf0   :  { %v740_v62 = vpop.f32.mrf.mxu1 }
  0xf1   :  { %v713_v1 = vpop.f32.mrf.mxu0  ;;  %v483_v5 = vadd.f32 %v739_v60, %v711_v59 }
  0xf2   :  { %v741_v2 = vpop.f32.mrf.mxu1  ;;  %v714_v3 = vadd.f32 %v713_v1, %v712_v61 }
  0xf3   :  { %v742_v4 = vadd.f32 %v741_v2, %v740_v62 }
  0xf4   :  { %v759_v7 = vpop.f32.mrf.mxu0 }
  0xf5   :  { %v532_v10 = vadd.f32 %v759_v7, %v483_v5  ;;  %v486_v16 = vadd.f32 %v742_v4, %v714_v3 }
  0xf6   :  { %v523_v13 = vpop.f32.mrf.mxu0 }
  0xf7   :  { %v540_v14 = vadd.f32 %v532_v10, %v32_v6  ;;  %v524_v15 = vadd.f32 %v523_v13, %v475_v11 }
  0xf8   :  { %v760_v18 = vpop.f32.mrf.mxu0 }
  0xf9   :  { %544 = vst.msk [vmem:[#allocation2 + $0x10] sm:$0xff] %vm25_vm0, %v540_v14  ;;  %v538_v19 = vadd.f32 %v524_v15, %v30_v12  ;;  %v535_v20 = vadd.f32 %v760_v18, %v486_v16 }
  0xfa   :  { %v526_v23 = vpop.f32.mrf.mxu0 }
  0xfb   :  { %542 = vst.msk [vmem:[#allocation2] sm:$0xff] %vm25_vm0, %v538_v19  ;;  %v541_v24 = vadd.f32 %v535_v20, %v33_v17  ;;  %v527_v25 = vadd.f32 %v526_v23, %v478_v21 }
  0xfd   :  { %545 = vst.msk [vmem:[#allocation2 + $0x18] sm:$0xff] %vm25_vm0, %v541_v24  ;;  %v539_v26 = vadd.f32 %v527_v25, %v31_v22 }
  0xff   :  { %543 = vst.msk [vmem:[#allocation2 + $0x8] sm:$0xff] %vm25_vm0, %v539_v26 }
 0x100   :  { %v551_v28 = vld [vmem:[#allocation2 + $0x10] sm:$0xff] }
 0x101   :  { %v562_v31 = vmul.f32 %v668_v27, %v551_v28 }
 0x102   :  { %v549_v32 = vld [vmem:[#allocation2] sm:$0xff] }
 0x103   :  { %v573_v34 = vadd.f32 %v669_v29, %v562_v31  ;;  %v560_v36 = vmul.f32 %v668_v27, %v549_v32 }
 0x104   :  { %v552_v37 = vld [vmem:[#allocation2 + $0x18] sm:$0xff] }
 0x105   :  { %v577_v38 = vmax.f32 %v573_v34, 0.0  ;;  %v571_v39 = vadd.f32 %v669_v29, %v560_v36  ;;  %v563_v41 = vmul.f32 %v668_v27, %v552_v37 }
 0x106   :  { %v550_v43 = vld [vmem:[#allocation2 + $0x8] sm:$0xff] }
 0x107   :  { %v589_v44 = vadd.f32 %v684_v35, %v577_v38  ;;  %v575_v45 = vmax.f32 %v571_v39, 0.0  ;;  %v574_v46 = vadd.f32 %v669_v29, %v563_v41  ;;  %v561_v47 = vmul.f32 %v668_v27, %v550_v43 }
 0x109   :  { %v593_v49 = vmax.f32 %v589_v44, 0.0  ;;  %v587_v50 = vadd.f32 %v680_v40, %v575_v45  ;;  %v578_v51 = vmax.f32 %v574_v46, 0.0  ;;  %v572_v52 = vadd.f32 %v669_v29, %v561_v47 }
 0x10b   :  { %v676_v53 = vpack.c.bf16 %v593_v49, %v593_v49  ;;  %v591_v54 = vmax.f32 %v587_v50, 0.0  ;;  %v590_v55 = vadd.f32 %v685_v42, %v578_v51  ;;  %v576_v56 = vmax.f32 %v572_v52, 0.0 }
 0x10d   :  { %614 = vst.msk [vmem:[%s1020_s5 + $0x8] sm:$0xf] %vm611_vm1, %v676_v53  ;;  %v674_v57 = vpack.c.bf16 %v591_v54, %v591_v54  ;;  %v594_v58 = vmax.f32 %v590_v55, 0.0  ;;  %v588_v59 = vadd.f32 %v681_v48, %v576_v56 }
 0x10f   :  { %612 = vst.msk [vmem:[%s1020_s5] sm:$0xf] %vm611_vm1, %v674_v57  ;;  %v677_v60 = vpack.c.bf16 %v594_v58, %v594_v58  ;;  %v592_v61 = vmax.f32 %v588_v59, 0.0 }
 0x111   :  { %615 = vst.msk [vmem:[%s1020_s5 + $0xc] sm:$0xf] %vm611_vm1, %v677_v60  ;;  %v675_v62 = vpack.c.bf16 %v592_v61, %v592_v61 }
 0x113   :  { %613 = vst.msk [vmem:[%s1020_s5 + $0x4] sm:$0xf] %vm611_vm1, %v675_v62 }

// kernel: patch2d_forward.18
= control target key start
LH: loop header
LB: loop body
LE: loop exit
PB: predicated region body
PF: predicated region fallthrough
CT: control target
= control target key end

     0   :  { %vm380_vm0 = vcmask 523264   ;;  %s967_s1 = inlined_call_operand.vmem [shape: bf16[576,128], index: 1, kind: input, shape index: {}]   ;;  %s968_s0 = inlined_call_operand.vmem [shape: bf16[32,576], index: 0, kind: input, shape index: {}]   ;;  %s969_s2 = inlined_call_operand.vmem [shape: f32[1,128], index: 2, kind: input, shape index: {}]   ;;  %s970_s3 = inlined_call_operand.vmem [shape: f32[1,128], index: 3, kind: input, shape index: {}]   ;;  %s971_s4 = inlined_call_operand.vmem [shape: bf16[32,128], index: 4, kind: output, shape index: {}]  }
   0x1   :  { %v742_v0 = vld [vmem:[%s967_s1 + $0x78] sm:$0xff]   ;;  %v746_v4 = vld [vmem:[%s967_s1 + $0x70] sm:$0xff]   ;;  %v750_v8 = vld [vmem:[%s967_s1 + $0x68] sm:$0xff]  }
   0x2   :  { %v743_v1 = vld [vmem:[%s967_s1 + $0xf8] sm:$0xff]   ;;  %668 = vmatprep.subr.bf16.mxu0 %v742_v0  ;;  %v747_v5 = vld [vmem:[%s967_s1 + $0xf0] sm:$0xff]   ;;  %v751_v9 = vld [vmem:[%s967_s1 + $0xe8] sm:$0xff]  }
   0x3   :  { %v744_v2 = vld [vmem:[%s967_s1 + $0x38] sm:$0xff]   ;;  %696 = vmatprep.subr.bf16.mxu1 %v743_v1  ;;  %v748_v6 = vld [vmem:[%s967_s1 + $0x30] sm:$0xff]   ;;  %v752_v10 = vld [vmem:[%s967_s1 + $0x28] sm:$0xff]  }
   0x4   :  { %v745_v3 = vld [vmem:[%s967_s1 + $0xb8] sm:$0xff]   ;;  %669 = vmatpush3.bf16.msra.mxu0 %v744_v2  ;;  %v749_v7 = vld [vmem:[%s967_s1 + $0xb0] sm:$0xff]   ;;  %v753_v11 = vld [vmem:[%s967_s1 + $0xa8] sm:$0xff]  }
   0x5   :  { %697 = vmatpush3.bf16.msra.mxu1 %v745_v3  ;;  %670 = vmatprep.subr.bf16.mxu0 %v746_v4  ;;  %v754_v12 = vld [vmem:[%s967_s1 + $0x60] sm:$0xff]   ;;  %v758_v16 = vld [vmem:[%s967_s1 + $0x58] sm:$0xff]   ;;  %v762_v20 = vld [vmem:[%s967_s1 + $0x50] sm:$0xff]  }
   0x6   :  { %698 = vmatprep.subr.bf16.mxu1 %v747_v5  ;;  %v755_v13 = vld [vmem:[%s967_s1 + $0xe0] sm:$0xff]   ;;  %v759_v17 = vld [vmem:[%s967_s1 + $0xd8] sm:$0xff]   ;;  %v763_v21 = vld [vmem:[%s967_s1 + $0xd0] sm:$0xff]  }
   0x7   :  { %v756_v14 = vld [vmem:[%s967_s1 + $0x20] sm:$0xff]   ;;  %v760_v18 = vld [vmem:[%s967_s1 + $0x18] sm:$0xff]   ;;  %v764_v22 = vld [vmem:[%s967_s1 + $0x10] sm:$0xff]  }
   0x8   :  { %671 = vmatpush3.bf16.msra.mxu0 %v748_v6  ;;  %v757_v15 = vld [vmem:[%s967_s1 + $0xa0] sm:$0xff]   ;;  %v761_v19 = vld [vmem:[%s967_s1 + $0x98] sm:$0xff]   ;;  %v765_v23 = vld [vmem:[%s967_s1 + $0x90] sm:$0xff]  }
   0x9   :  { %699 = vmatpush3.bf16.msra.mxu1 %v749_v7  ;;  %672 = vmatprep.subr.bf16.mxu0 %v750_v8  ;;  %v766_v24 = vld [vmem:[%s967_s1 + $0x48] sm:$0xff]   ;;  %v770_v28 = vld [vmem:[%s967_s1 + $0x40] sm:$0xff]   ;;  %v780_v36 = vld [vmem:[%s967_s1 + $0x118] sm:$0xff]  }
   0xa   :  { %700 = vmatprep.subr.bf16.mxu1 %v751_v9  ;;  %v767_v25 = vld [vmem:[%s967_s1 + $0xc8] sm:$0xff]   ;;  %v771_v29 = vld [vmem:[%s967_s1 + $0xc0] sm:$0xff]   ;;  %v781_v37 = vld [vmem:[%s967_s1 + $0x110] sm:$0xff]  }
   0xb   :  { %v768_v26 = vld [vmem:[%s967_s1 + $0x8] sm:$0xff]   ;;  %v772_v30 = vld [vmem:[%s967_s1] sm:$0xff]  }
   0xc   :  { %673 = vmatpush3.bf16.msra.mxu0 %v752_v10  ;;  %v769_v27 = vld [vmem:[%s967_s1 + $0x88] sm:$0xff]   ;;  %v773_v31 = vld [vmem:[%s967_s1 + $0x80] sm:$0xff]  }
   0xd   :  { %701 = vmatpush3.bf16.msra.mxu1 %v753_v11  ;;  %674 = vmatprep.subr.bf16.mxu0 %v754_v12  ;;  %v774_v32 = vld [vmem:[%s968_s0] ss:$20 sps:$4 sm:$0xff]   ;;  %v776_v33 = vld [vmem:[%s968_s0 + $0x4] ss:$20 sps:$4 sm:$0xff]   ;;  %v777_v34 = vld [vmem:[%s968_s0 + $0x8] ss:$20 sps:$4 sm:$0xff]  }
   0xe   :  { %702 = vmatprep.subr.bf16.mxu1 %v755_v13  ;;  %v779_v35 = vld [vmem:[%s968_s0 + $0xc] ss:$20 sps:$4 sm:$0xff]   ;;  %419 = vmatprep.mubr.bf16.mxu0 %v776_v33  ;;  %v784_v39 = vld [vmem:[%s968_s0 + $0x34] ss:$20 sps:$4 sm:$0xff]   ;;  %v787_v42 = vld [vmem:[%s968_s0 + $0x30] ss:$20 sps:$4 sm:$0xff]  }
   0xf   :  { %468 = vmatprep.mubr.bf16.mxu1 %v779_v35  ;;  %v782_v38 = vld [vmem:[%s968_s0 + $0x2c] ss:$20 sps:$4 sm:$0xff]   ;;  %v786_v40 = vld [vmem:[%s968_s0 + $0x28] ss:$20 sps:$4 sm:$0xff]   ;;  %v790_v43 = vld [vmem:[%s968_s0 + $0x10] ss:$20 sps:$4 sm:$0xff]  }
  0x10   :  { %675 = vmatpush3.bf16.msra.mxu0 %v756_v14  ;;  %v788_v41 = vld [vmem:[%s967_s1 + $0x108] sm:$0xff]   ;;  %v789_v44 = vld [vmem:[%s967_s1 + $0x100] sm:$0xff]  }
  0x11   :  { %703 = vmatpush3.bf16.msra.mxu1 %v757_v15  ;;  %676 = vmatprep.subr.bf16.mxu0 %v758_v16  ;;  %v791_v45 = vld [vmem:[%s968_s0 + $0x38] ss:$20 sps:$4 sm:$0xff]   ;;  %v647_v6 = vld [vmem:[%s969_s2] ss:$0 sm:$0xff] }
  0x12   :  { %704 = vmatprep.subr.bf16.mxu1 %v759_v17  ;;  %v648_v15 = vld [vmem:[%s970_s3] ss:$0 sm:$0xff] }
  0x14   :  { %677 = vmatpush3.bf16.msra.mxu0 %v760_v18 }
  0x15   :  { %705 = vmatpush3.bf16.msra.mxu1 %v761_v19  ;;  %678 = vmatprep.subr.bf16.mxu0 %v762_v20 }
  0x16   :  { %706 = vmatprep.subr.bf16.mxu1 %v763_v21 }
  0x18   :  { %679 = vmatpush3.bf16.msra.mxu0 %v764_v22 }
  0x19   :  { %707 = vmatpush3.bf16.msra.mxu1 %v765_v23  ;;  %680 = vmatprep.subr.bf16.mxu0 %v766_v24 }
  0x1a   :  { %708 = vmatprep.subr.bf16.mxu1 %v767_v25 }
  0x1c   :  { %681 = vmatpush3.bf16.msra.mxu0 %v768_v26 }
  0x1d   :  { %709 = vmatpush3.bf16.msra.mxu1 %v769_v27  ;;  %682 = vmatprep.subr.bf16.mxu0 %v770_v28 }
  0x1e   :  { %710 = vmatprep.subr.bf16.mxu1 %v771_v29 }
  0x20   :  { %683 = vmatpush3.bf16.msra.mxu0 %v772_v30 }
  0x21   :  { %711 = vmatpush3.bf16.msra.mxu1 %v773_v31  ;;  %730 = vmatprep.subr.bf16.mxu0 %v780_v36 }
  0x23   :  { %420 = vmatmul.mubr.bf16.vlgmr.msra.gmra.mxu0 %v774_v32 }
  0x24   :  { %469 = vmatmul.mubr.bf16.vlgmr.msra.gmra.mxu1 %v777_v34  ;;  %731 = vmatpush3.bf16.msra.mxu0 %v780_v36 }
  0x25   :  { %732 = vmatprep.subr.bf16.mxu0 %v781_v37  ;;  %427 = vmatprep.mubr.bf16.mxu0 %v782_v38 }
  0x26   :  { %476 = vmatprep.mubr.bf16.mxu1 %v784_v39 }
  0x28   :  { %733 = vmatpush3.bf16.msra.mxu0 %v781_v37 }
  0x29   :  { %734 = vmatprep.subr.bf16.mxu0 %v788_v41 }
  0x2b   :  { %428 = vmatmul.mubr.bf16.gmra.mxu0 %v786_v40 }
  0x2c   :  { %477 = vmatmul.mubr.bf16.gmra.mxu1 %v787_v42  ;;  %738 = vmatprep.mubr.msk.bf16.mxu0 %vm380_vm0, %v790_v43 }
  0x2d   :  { %735 = vmatpush3.bf16.msra.mxu0 %v788_v41 }
  0x2e   :  { %736 = vmatprep.subr.bf16.mxu0 %v789_v44 }
  0x31   :  { %737 = vmatpush3.bf16.msra.mxu0 %v789_v44 }
  0x34   :  { %739 = vmatmul.mubr.msk.bf16.vlgmr.msra.gmra.mxu0 %vm380_vm0, %v791_v45 }
  0xe3   :  { %v684_v46 = vpop.f32.mrf.mxu0 }
  0xe4   :  { %v712_v47 = vpop.f32.mrf.mxu1 }
  0xe5   :  { %v685_v48 = vpop.f32.mrf.mxu0 }
  0xe6   :  { %v713_v49 = vpop.f32.mrf.mxu1  ;;  %v686_v62 = vadd.f32 %v685_v48, %v684_v46 }
  0xe7   :  { %v687_v50 = vpop.f32.mrf.mxu0  ;;  %v714_v63 = vadd.f32 %v713_v49, %v712_v47 }
  0xe8   :  { %v715_v51 = vpop.f32.mrf.mxu1 }
  0xe9   :  { %v688_v52 = vpop.f32.mrf.mxu0  ;;  %v471_v10 = vadd.f32 %v714_v63, %v686_v62 }
  0xea   :  { %v716_v53 = vpop.f32.mrf.mxu1  ;;  %v689_v7 = vadd.f32 %v688_v52, %v687_v50 }
  0xeb   :  { %v690_v54 = vpop.f32.mrf.mxu0  ;;  %v717_v8 = vadd.f32 %v716_v53, %v715_v51 }
  0xec   :  { %v718_v55 = vpop.f32.mrf.mxu1 }
  0xed   :  { %v691_v56 = vpop.f32.mrf.mxu0  ;;  %v474_v19 = vadd.f32 %v717_v8, %v689_v7 }
  0xee   :  { %v719_v57 = vpop.f32.mrf.mxu1  ;;  %v692_v58 = vadd.f32 %v691_v56, %v690_v54 }
  0xef   :  { %v720_v59 = vadd.f32 %v719_v57, %v718_v55  ;;  %v693_v60 = vpop.f32.mrf.mxu0 }
  0xf0   :  { %v721_v61 = vpop.f32.mrf.mxu1 }
  0xf1   :  { %v694_v0 = vpop.f32.mrf.mxu0  ;;  %v479_v4 = vadd.f32 %v720_v59, %v692_v58 }
  0xf2   :  { %v722_v1 = vpop.f32.mrf.mxu1  ;;  %v695_v2 = vadd.f32 %v694_v0, %v693_v60 }
  0xf3   :  { %v723_v3 = vadd.f32 %v722_v1, %v721_v61 }
  0xf4   :  { %v740_v5 = vpop.f32.mrf.mxu0 }
  0xf5   :  { %v528_v9 = vadd.f32 %v740_v5, %v479_v4  ;;  %v482_v14 = vadd.f32 %v723_v3, %v695_v2 }
  0xf6   :  { %v519_v11 = vpop.f32.mrf.mxu0 }
  0xf7   :  { %v558_v12 = vmul.f32 %v647_v6, %v528_v9  ;;  %v520_v13 = vadd.f32 %v519_v11, %v471_v10 }
  0xf8   :  { %v741_v16 = vpop.f32.mrf.mxu0 }
  0xf9   :  { %v556_v17 = vmul.f32 %v647_v6, %v520_v13  ;;  %v531_v18 = vadd.f32 %v741_v16, %v482_v14  ;;  %v569_v21 = vadd.f32 %v648_v15, %v558_v12 }
  0xfa   :  { %v522_v20 = vpop.f32.mrf.mxu0 }
  0xfb   :  { %v559_v22 = vmul.f32 %v647_v6, %v531_v18  ;;  %v523_v23 = vadd.f32 %v522_v20, %v474_v19  ;;  %v567_v24 = vadd.f32 %v648_v15, %v556_v17  ;;  %v573_v27 = vmax.f32 %v569_v21, 0.0 }
  0xfd   :  { %v570_v25 = vadd.f32 %v648_v15, %v559_v22  ;;  %v557_v26 = vmul.f32 %v647_v6, %v523_v23  ;;  %v571_v30 = vmax.f32 %v567_v24, 0.0 }
  0xff   :  { %v574_v28 = vmax.f32 %v570_v25, 0.0  ;;  %v568_v29 = vadd.f32 %v648_v15, %v557_v26 }
 0x101   :  { %v665_v31 = vpack.c.bf16 %v574_v28, %v573_v27  ;;  %v572_v32 = vmax.f32 %v568_v29, 0.0 }
 0x103   :  { %667 = vst [vmem:[%s971_s4 + $0x8] sm:$0xff] %v665_v31   ;;  %v660_v33 = vpack.c.bf16 %v572_v32, %v571_v30 }
 0x105   :  { %661 = vst [vmem:[%s971_s4] sm:$0xff] %v660_v33  }

// kernel: patch2d_forward.19
= control target key start
LH: loop header
LB: loop body
LE: loop exit
PB: predicated region body
PF: predicated region fallthrough
CT: control target
= control target key end

     0   :  { %v159_v0 = vmov 0.0   ;;  %vm160_vm0 = vmmov 0   ;;  %vm57_vm1 = vcmask 523264   ;;  %s210_s1 = inlined_call_operand.vmem [shape: bf16[64,128], index: 1, kind: input, shape index: {}]   ;;  %s211_s0 = inlined_call_operand.vmem [shape: bf16[8,64], index: 0, kind: input, shape index: {}]   ;;  %s212_s2 = inlined_call_operand.vmem [shape: f32[1,128], index: 2, kind: input, shape index: {}]   ;;  %s213_s3 = inlined_call_operand.vmem [shape: f32[1,128], index: 3, kind: input, shape index: {}]   ;;  %s214_s4 = inlined_call_operand.vmem [shape: bf16[8,128], index: 4, kind: output, shape index: {}]  }
   0x1   :  { %141 = vmatprep.subr.bf16.mxu0 %v159_v0  ;;  %v155_v1 = vld [vmem:[%s210_s1 + $0x18] sm:$0xff]   ;;  %149 = vmatprep.mubr.msk.bf16.mxu0 %vm160_vm0, %v159_v0  ;;  %v156_v2 = vld [vmem:[%s210_s1 + $0x10] sm:$0xff]   ;;  %v157_v3 = vld [vmem:[%s210_s1 + $0x8] sm:$0xff]  }
   0x2   :  { %142 = vmatpush3.bf16.msra.mxu0 %v155_v1  ;;  %v158_v4 = vld [vmem:[%s210_s1] sm:$0xff]  }
   0x3   :  { %143 = vmatprep.subr.bf16.mxu0 %v159_v0  ;;  %v24_v5 = vld [vmem:[%s211_s0] sm:$0xf] }
   0x4   :  { %v134_v6 = vld [vmem:[%s212_s2] ss:$0 sm:$0xff] }
   0x5   :  { %v135_v8 = vld [vmem:[%s213_s3] ss:$0 sm:$0xff] }
   0x6   :  { %144 = vmatpush3.bf16.msra.mxu0 %v156_v2 }
   0x7   :  { %145 = vmatprep.subr.bf16.mxu0 %v159_v0 }
   0xa   :  { %146 = vmatpush3.bf16.msra.mxu0 %v157_v3 }
   0xb   :  { %147 = vmatprep.subr.bf16.mxu0 %v159_v0 }
   0xe   :  { %148 = vmatpush3.bf16.msra.mxu0 %v158_v4 }
  0x11   :  { %150 = vmatmul.mubr.msk.bf16.vlgmr.msra.gmra.mxu0 %vm57_vm1, %v24_v5 }
  0xd1   :  { %v95_v7 = vpop.f32.mrf.mxu0 }
  0xd2   :  { %v114_v9 = vmul.f32 %v134_v6, %v95_v7 }
  0xd3   :  { %v151_v10 = vpop.f32.mrf.mxu0 }
  0xd4   :  { %v122_v11 = vadd.f32 %v135_v8, %v114_v9 }
  0xd5   :  { %v98_v12 = vpop.f32.mrf.mxu0 }
  0xd6   :  { %v123_v13 = vpack.c.bf16 %v122_v11, %v122_v11 }
  0xd7   :  { %v152_v14 = vpop.f32.mrf.mxu0 }
  0xd8   :  { %124 = vst [vmem:[%s214_s4] sm:$0xf] %v123_v13 }

// kernel: patch2d_forward.20
= control target key start
LH: loop header
LB: loop body
LE: loop exit
PB: predicated region body
PF: predicated region fallthrough
CT: control target
= control target key end

     0   :  { %vm1157_vm0 = vmmov 0   ;;  %s1431_s1 = inlined_call_operand.vmem [shape: bf16[1152,128], index: 1, kind: input, shape index: {}]   ;;  %s1432_s0 = inlined_call_operand.vmem [shape: bf16[8,1152], index: 0, kind: input, shape index: {}]   ;;  %s1433_s2 = inlined_call_operand.vmem [shape: f32[1,128], index: 2, kind: input, shape index: {}]   ;;  %s1434_s3 = inlined_call_operand.vmem [shape: f32[1,128], index: 3, kind: input, shape index: {}]   ;;  %s1435_s4 = inlined_call_operand.vmem [shape: bf16[8,128], index: 4, kind: input, shape index: {}]   ;;  %s1436_s5 = inlined_call_operand.vmem [shape: bf16[8,128], index: 5, kind: output, shape index: {}]  }
   0x1   :  { %v1075_v0 = vld [vmem:[%s1431_s1 + $0x78] sm:$0xff]   ;;  %v1079_v4 = vld [vmem:[%s1431_s1 + $0x70] sm:$0xff]   ;;  %v1083_v8 = vld [vmem:[%s1431_s1 + $0x68] sm:$0xff]  }
   0x2   :  { %v1076_v1 = vld [vmem:[%s1431_s1 + $0xf8] sm:$0xff]   ;;  %956 = vmatprep.subr.bf16.mxu0 %v1075_v0  ;;  %v1080_v5 = vld [vmem:[%s1431_s1 + $0xf0] sm:$0xff]   ;;  %v1084_v9 = vld [vmem:[%s1431_s1 + $0xe8] sm:$0xff]  }
   0x3   :  { %v1077_v2 = vld [vmem:[%s1431_s1 + $0x38] sm:$0xff]   ;;  %978 = vmatprep.subr.bf16.mxu1 %v1076_v1  ;;  %v1081_v6 = vld [vmem:[%s1431_s1 + $0x30] sm:$0xff]   ;;  %v1085_v10 = vld [vmem:[%s1431_s1 + $0x28] sm:$0xff]  }
   0x4   :  { %v1078_v3 = vld [vmem:[%s1431_s1 + $0xb8] sm:$0xff]   ;;  %957 = vmatpush3.bf16.msra.mxu0 %v1077_v2  ;;  %v1082_v7 = vld [vmem:[%s1431_s1 + $0xb0] sm:$0xff]   ;;  %v1086_v11 = vld [vmem:[%s1431_s1 + $0xa8] sm:$0xff]  }
   0x5   :  { %979 = vmatpush3.bf16.msra.mxu1 %v1078_v3  ;;  %958 = vmatprep.subr.bf16.mxu0 %v1079_v4  ;;  %v1087_v12 = vld [vmem:[%s1431_s1 + $0x60] sm:$0xff]   ;;  %v1091_v16 = vld [vmem:[%s1431_s1 + $0x58] sm:$0xff]   ;;  %v1095_v20 = vld [vmem:[%s1431_s1 + $0x50] sm:$0xff]  }
   0x6   :  { %980 = vmatprep.subr.bf16.mxu1 %v1080_v5  ;;  %v1088_v13 = vld [vmem:[%s1431_s1 + $0xe0] sm:$0xff]   ;;  %v1092_v17 = vld [vmem:[%s1431_s1 + $0xd8] sm:$0xff]   ;;  %v1096_v21 = vld [vmem:[%s1431_s1 + $0xd0] sm:$0xff]  }
   0x7   :  { %v1089_v14 = vld [vmem:[%s1431_s1 + $0x20] sm:$0xff]   ;;  %v1093_v18 = vld [vmem:[%s1431_s1 + $0x18] sm:$0xff]   ;;  %v1097_v22 = vld [vmem:[%s1431_s1 + $0x10] sm:$0xff]  }
   0x8   :  { %959 = vmatpush3.bf16.msra.mxu0 %v1081_v6  ;;  %v1090_v15 = vld [vmem:[%s1431_s1 + $0xa0] sm:$0xff]   ;;  %v1094_v19 = vld [vmem:[%s1431_s1 + $0x98] sm:$0xff]   ;;  %v1098_v23 = vld [vmem:[%s1431_s1 + $0x90] sm:$0xff]  }
   0x9   :  { %981 = vmatpush3.bf16.msra.mxu1 %v1082_v7  ;;  %960 = vmatprep.subr.bf16.mxu0 %v1083_v8  ;;  %v1099_v24 = vld [vmem:[%s1431_s1 + $0x48] sm:$0xff]   ;;  %v1103_v28 = vld [vmem:[%s1431_s1 + $0x40] sm:$0xff]   ;;  %v1111_v38 = vld [vmem:[%s1431_s1 + $0x178] sm:$0xff]  }
   0xa   :  { %982 = vmatprep.subr.bf16.mxu1 %v1084_v9  ;;  %v1100_v25 = vld [vmem:[%s1431_s1 + $0xc8] sm:$0xff]   ;;  %v1104_v29 = vld [vmem:[%s1431_s1 + $0xc0] sm:$0xff]   ;;  %v1112_v39 = vld [vmem:[%s1431_s1 + $0x138] sm:$0xff]  }
   0xb   :  { %v1101_v26 = vld [vmem:[%s1431_s1 + $0x8] sm:$0xff]   ;;  %v1105_v30 = vld [vmem:[%s1431_s1] sm:$0xff]   ;;  %v1113_v40 = vld [vmem:[%s1431_s1 + $0x1f8] sm:$0xff]  }
   0xc   :  { %961 = vmatpush3.bf16.msra.mxu0 %v1085_v10  ;;  %v1102_v27 = vld [vmem:[%s1431_s1 + $0x88] sm:$0xff]   ;;  %v1106_v31 = vld [vmem:[%s1431_s1 + $0x80] sm:$0xff]   ;;  %v1114_v41 = vld [vmem:[%s1431_s1 + $0x1b8] sm:$0xff]  }
   0xd   :  { %983 = vmatpush3.bf16.msra.mxu1 %v1086_v11  ;;  %962 = vmatprep.subr.bf16.mxu0 %v1087_v12  ;;  %v27_v32 = vld [vmem:[%s1432_s0] sm:$0xff]  ;;  %v28_v33 = vld [vmem:[%s1432_s0 + $0x8] sm:$0xff]  ;;  %v1115_v42 = vld [vmem:[%s1431_s1 + $0x170] sm:$0xff]  }
   0xe   :  { %984 = vmatprep.subr.bf16.mxu1 %v1088_v13  ;;  %v873_v34 = vcombine.low %v27_v32, %v27_v32  ;;  %v874_v35 = vcombine.high %v27_v32, %v27_v32  ;;  %v875_v36 = vcombine.low %v28_v33, %v28_v33  ;;  %v876_v37 = vcombine.high %v28_v33, %v28_v33  ;;  %v1116_v43 = vld [vmem:[%s1431_s1 + $0x130] sm:$0xff]   ;;  %v1119_v46 = vld [vmem:[%s1431_s1 + $0x168] sm:$0xff]   ;;  %v1123_v50 = vld [vmem:[%s1431_s1 + $0x160] sm:$0xff]  }
   0xf   :  { %v1117_v44 = vld [vmem:[%s1431_s1 + $0x1f0] sm:$0xff]   ;;  %v1120_v47 = vld [vmem:[%s1431_s1 + $0x128] sm:$0xff]   ;;  %v1124_v51 = vld [vmem:[%s1431_s1 + $0x120] sm:$0xff]   ;;  %v1156_v13 = vmov 0.0  }
  0x10   :  { %963 = vmatpush3.bf16.msra.mxu0 %v1089_v14  ;;  %672 = vmatprep.mubr.bf16.mxu0 %v874_v35  ;;  %v1118_v45 = vld [vmem:[%s1431_s1 + $0x1b0] sm:$0xff]   ;;  %v1121_v48 = vld [vmem:[%s1431_s1 + $0x1e8] sm:$0xff]   ;;  %v1125_v52 = vld [vmem:[%s1431_s1 + $0x1e0] sm:$0xff]  }
  0x11   :  { %985 = vmatpush3.bf16.msra.mxu1 %v1090_v15  ;;  %964 = vmatprep.subr.bf16.mxu0 %v1091_v16  ;;  %v1122_v49 = vld [vmem:[%s1431_s1 + $0x1a8] sm:$0xff]   ;;  %v1126_v53 = vld [vmem:[%s1431_s1 + $0x1a0] sm:$0xff]   ;;  %v1127_v54 = vld [vmem:[%s1431_s1 + $0x158] sm:$0xff]  }
  0x12   :  { %986 = vmatprep.subr.bf16.mxu1 %v1092_v17  ;;  %712 = vmatprep.mubr.bf16.mxu1 %v876_v37  ;;  %v1128_v55 = vld [vmem:[%s1431_s1 + $0x118] sm:$0xff]   ;;  %v1131_v58 = vld [vmem:[%s1431_s1 + $0x150] sm:$0xff]   ;;  %v1135_v62 = vld [vmem:[%s1431_s1 + $0x148] sm:$0xff]  }
  0x13   :  { %v1129_v56 = vld [vmem:[%s1431_s1 + $0x1d8] sm:$0xff]   ;;  %v1132_v59 = vld [vmem:[%s1431_s1 + $0x110] sm:$0xff]   ;;  %v1136_v63 = vld [vmem:[%s1431_s1 + $0x108] sm:$0xff]  }
  0x14   :  { %965 = vmatpush3.bf16.msra.mxu0 %v1093_v18  ;;  %v1130_v57 = vld [vmem:[%s1431_s1 + $0x198] sm:$0xff]   ;;  %v1133_v60 = vld [vmem:[%s1431_s1 + $0x1d0] sm:$0xff]   ;;  %v1137_v0 = vld [vmem:[%s1431_s1 + $0x1c8] sm:$0xff]  }
  0x15   :  { %987 = vmatpush3.bf16.msra.mxu1 %v1094_v19  ;;  %966 = vmatprep.subr.bf16.mxu0 %v1095_v20  ;;  %v1134_v61 = vld [vmem:[%s1431_s1 + $0x190] sm:$0xff]   ;;  %v1138_v1 = vld [vmem:[%s1431_s1 + $0x188] sm:$0xff]   ;;  %v1139_v2 = vld [vmem:[%s1431_s1 + $0x140] sm:$0xff]  }
  0x16   :  { %988 = vmatprep.subr.bf16.mxu1 %v1096_v21  ;;  %v1140_v3 = vld [vmem:[%s1431_s1 + $0x100] sm:$0xff]   ;;  %v29_v5 = vld [vmem:[%s1432_s0 + $0x10] sm:$0xff]  ;;  %v30_v9 = vld [vmem:[%s1432_s0 + $0x18] sm:$0xff] }
  0x17   :  { %v1141_v4 = vld [vmem:[%s1431_s1 + $0x1c0] sm:$0xff]   ;;  %v878_v6 = vcombine.high %v29_v5, %v29_v5  ;;  %v877_v8 = vcombine.low %v29_v5, %v29_v5  ;;  %v879_v10 = vcombine.low %v30_v9, %v30_v9  ;;  %v880_v11 = vcombine.high %v30_v9, %v30_v9  ;;  %v1147_v12 = vld [vmem:[%s1431_s1 + $0x238] sm:$0xff]   ;;  %v1148_v14 = vld [vmem:[%s1431_s1 + $0x230] sm:$0xff]  }
  0x18   :  { %967 = vmatpush3.bf16.msra.mxu0 %v1097_v22  ;;  %v1144_v7 = vld [vmem:[%s1431_s1 + $0x180] sm:$0xff]   ;;  %v1149_v15 = vld [vmem:[%s1431_s1 + $0x228] sm:$0xff]   ;;  %v1151_v17 = vld [vmem:[%s1431_s1 + $0x218] sm:$0xff]  }
  0x19   :  { %989 = vmatpush3.bf16.msra.mxu1 %v1098_v23  ;;  %968 = vmatprep.subr.bf16.mxu0 %v1099_v24  ;;  %v1150_v16 = vld [vmem:[%s1431_s1 + $0x220] sm:$0xff]   ;;  %v1152_v18 = vld [vmem:[%s1431_s1 + $0x210] sm:$0xff]   ;;  %v1153_v19 = vld [vmem:[%s1431_s1 + $0x208] sm:$0xff]  }
  0x1a   :  { %990 = vmatprep.subr.bf16.mxu1 %v1100_v25  ;;  %v1154_v20 = vld [vmem:[%s1431_s1 + $0x200] sm:$0xff]  }
  0x1b   :  { %v1155_v21 = vld [vmem:[%s1432_s0 + $0x20] ss:$0 sps:$4 sm:$0xff]  }
  0x1c   :  { %969 = vmatpush3.bf16.msra.mxu0 %v1101_v26 }
  0x1d   :  { %991 = vmatpush3.bf16.msra.mxu1 %v1102_v27  ;;  %970 = vmatprep.subr.bf16.mxu0 %v1103_v28 }
  0x1e   :  { %992 = vmatprep.subr.bf16.mxu1 %v1104_v29 }
  0x20   :  { %971 = vmatpush3.bf16.msra.mxu0 %v1105_v30 }
  0x21   :  { %993 = vmatpush3.bf16.msra.mxu1 %v1106_v31  ;;  %1000 = vmatprep.subr.bf16.mxu0 %v1111_v38 }
  0x22   :  { %1022 = vmatprep.subr.bf16.mxu1 %v1113_v40 }
  0x23   :  { %673 = vmatmul.mubr.bf16.vlgmr.msra.gmra.mxu0 %v873_v34 }
  0x24   :  { %713 = vmatmul.mubr.bf16.vlgmr.msra.gmra.mxu1 %v875_v36  ;;  %1001 = vmatpush3.bf16.msra.mxu0 %v1112_v39 }
  0x25   :  { %1023 = vmatpush3.bf16.msra.mxu1 %v1114_v41  ;;  %1002 = vmatprep.subr.bf16.mxu0 %v1115_v42 }
  0x26   :  { %1024 = vmatprep.subr.bf16.mxu1 %v1117_v44  ;;  %752 = vmatprep.mubr.bf16.mxu0 %v878_v6 }
  0x27   :  { %792 = vmatprep.mubr.bf16.mxu1 %v880_v11 }
  0x28   :  { %1003 = vmatpush3.bf16.msra.mxu0 %v1116_v43 }
  0x29   :  { %1025 = vmatpush3.bf16.msra.mxu1 %v1118_v45  ;;  %1004 = vmatprep.subr.bf16.mxu0 %v1119_v46  ;;  %v954_v46 = vld [vmem:[%s1433_s2] ss:$0 sm:$0xff] }
  0x2a   :  { %1026 = vmatprep.subr.bf16.mxu1 %v1121_v48  ;;  %v955_v48 = vld [vmem:[%s1434_s3] ss:$0 sm:$0xff] }
  0x2c   :  { %1005 = vmatpush3.bf16.msra.mxu0 %v1120_v47 }
  0x2d   :  { %1027 = vmatpush3.bf16.msra.mxu1 %v1122_v49  ;;  %1006 = vmatprep.subr.bf16.mxu0 %v1123_v50  ;;  %v863_v49 = vld [vmem:[%s1435_s4] sm:$0xf] }
  0x2e   :  { %1028 = vmatprep.subr.bf16.mxu1 %v1125_v52 }
  0x30   :  { %1007 = vmatpush3.bf16.msra.mxu0 %v1124_v51 }
  0x31   :  { %1029 = vmatpush3.bf16.msra.mxu1 %v1126_v53  ;;  %1008 = vmatprep.subr.bf16.mxu0 %v1127_v54  ;;  %v864_v54 = vunpack.c.l.bf16 %v863_v49 }
  0x32   :  { %1030 = vmatprep.subr.bf16.mxu1 %v1129_v56 }
  0x34   :  { %1009 = vmatpush3.bf16.msra.mxu0 %v1128_v55 }
  0x35   :  { %1031 = vmatpush3.bf16.msra.mxu1 %v1130_v57  ;;  %1010 = vmatprep.subr.bf16.mxu0 %v1131_v58 }
  0x36   :  { %1032 = vmatprep.subr.bf16.mxu1 %v1133_v60 }
  0x38   :  { %1011 = vmatpush3.bf16.msra.mxu0 %v1132_v59 }
  0x39   :  { %1033 = vmatpush3.bf16.msra.mxu1 %v1134_v61  ;;  %1012 = vmatprep.subr.bf16.mxu0 %v1135_v62 }
  0x3a   :  { %1034 = vmatprep.subr.bf16.mxu1 %v1137_v0 }
  0x3c   :  { %1013 = vmatpush3.bf16.msra.mxu0 %v1136_v63 }
  0x3d   :  { %1035 = vmatpush3.bf16.msra.mxu1 %v1138_v1  ;;  %1014 = vmatprep.subr.bf16.mxu0 %v1139_v2 }
  0x3e   :  { %1036 = vmatprep.subr.bf16.mxu1 %v1141_v4 }
  0x40   :  { %1015 = vmatpush3.bf16.msra.mxu0 %v1140_v3 }
  0x41   :  { %1037 = vmatpush3.bf16.msra.mxu1 %v1144_v7  ;;  %1053 = vmatprep.subr.bf16.mxu0 %v1156_v13 }
  0x43   :  { %753 = vmatmul.mubr.bf16.vlgmr.msra.gmra.mxu0 %v877_v8 }
  0x44   :  { %1054 = vmatpush3.bf16.msra.mxu0 %v1147_v12  ;;  %793 = vmatmul.mubr.bf16.vlgmr.msra.gmra.mxu1 %v879_v10 }
  0x45   :  { %1055 = vmatprep.subr.bf16.mxu0 %v1156_v13  ;;  %1069 = vmatprep.mubr.msk.bf16.mxu0 %vm1157_vm0, %v1156_v13 }
  0x48   :  { %1056 = vmatpush3.bf16.msra.mxu0 %v1148_v14 }
  0x49   :  { %1057 = vmatprep.subr.bf16.mxu0 %v1156_v13 }
  0x4c   :  { %1058 = vmatpush3.bf16.msra.mxu0 %v1149_v15 }
  0x4d   :  { %1059 = vmatprep.subr.bf16.mxu0 %v1156_v13 }
  0x50   :  { %1060 = vmatpush3.bf16.msra.mxu0 %v1150_v16 }
  0x51   :  { %1061 = vmatprep.subr.bf16.mxu0 %v1156_v13 }
  0x54   :  { %1062 = vmatpush3.bf16.msra.mxu0 %v1151_v17 }
  0x55   :  { %1063 = vmatprep.subr.bf16.mxu0 %v1156_v13 }
  0x58   :  { %1064 = vmatpush3.bf16.msra.mxu0 %v1152_v18 }
  0x59   :  { %1065 = vmatprep.subr.bf16.mxu0 %v1156_v13 }
  0x5c   :  { %1066 = vmatpush3.bf16.msra.mxu0 %v1153_v19 }
  0x5d   :  { %1067 = vmatprep.subr.bf16.mxu0 %v1156_v13 }
  0x60   :  { %1068 = vmatpush3.bf16.msra.mxu0 %v1154_v20 }
  0x63   :  { %1070 = vmatmul.mubr.bf16.vlgmr.msra.gmra.mxu0 %v1155_v21 }
  0xe3   :  { %v972_v22 = vpop.f32.mrf.mxu0 }
  0xe4   :  { %v994_v23 = vpop.f32.mrf.mxu1 }
  0xe5   :  { %v973_v24 = vpop.f32.mrf.mxu0 }
  0xe6   :  { %v995_v25 = vpop.f32.mrf.mxu1  ;;  %v974_v38 = vadd.f32 %v973_v24, %v972_v22 }
  0xe7   :  { %v975_v26 = vpop.f32.mrf.mxu0  ;;  %v996_v39 = vadd.f32 %v995_v25, %v994_v23 }
  0xe8   :  { %v997_v27 = vpop.f32.mrf.mxu1 }
  0xe9   :  { %v976_v28 = vpop.f32.mrf.mxu0  ;;  %v715_v41 = vadd.f32 %v996_v39, %v974_v38 }
  0xea   :  { %v998_v29 = vpop.f32.mrf.mxu1 }
 0x103   :  { %v1016_v30 = vpop.f32.mrf.mxu0 }
 0x104   :  { %v1038_v31 = vpop.f32.mrf.mxu1 }
 0x105   :  { %v1017_v32 = vpop.f32.mrf.mxu0 }
 0x106   :  { %v1039_v33 = vpop.f32.mrf.mxu1  ;;  %v1018_v40 = vadd.f32 %v1017_v32, %v1016_v30 }
 0x107   :  { %v1019_v34 = vpop.f32.mrf.mxu0  ;;  %v1040_v43 = vadd.f32 %v1039_v33, %v1038_v31 }
 0x108   :  { %v1041_v35 = vpop.f32.mrf.mxu1  ;;  %v755_v42 = vadd.f32 %v1018_v40, %v715_v41 }
 0x109   :  { %v1020_v36 = vpop.f32.mrf.mxu0 }
 0x10a   :  { %v1042_v37 = vpop.f32.mrf.mxu1  ;;  %v795_v44 = vadd.f32 %v1040_v43, %v755_v42 }
 0x123   :  { %v834_v45 = vpop.f32.mrf.mxu0 }
 0x124   :  { %v835_v47 = vadd.f32 %v834_v45, %v795_v44 }
 0x125   :  { %v1071_v50 = vpop.f32.mrf.mxu0 }
 0x126   :  { %v853_v51 = vmul.f32 %v954_v46, %v835_v47 }
 0x127   :  { %v837_v52 = vpop.f32.mrf.mxu0 }
 0x128   :  { %v861_v53 = vadd.f32 %v955_v48, %v853_v51 }
 0x129   :  { %v1072_v55 = vpop.f32.mrf.mxu0 }
 0x12a   :  { %v862_v56 = vmax.f32 %v861_v53, 0.0 }
 0x12c   :  { %v865_v57 = vadd.f32 %v864_v54, %v862_v56 }
 0x12e   :  { %v866_v58 = vmax.f32 %v865_v57, 0.0 }
 0x130   :  { %v867_v59 = vpack.c.bf16 %v866_v58, %v866_v58 }
 0x132   :  { %868 = vst [vmem:[%s1436_s5] sm:$0xf] %v867_v59 }

// kernel: patch2d_forward.21
= control target key start
LH: loop header
LB: loop body
LE: loop exit
PB: predicated region body
PF: predicated region fallthrough
CT: control target
= control target key end

     0   :  { %vm1150_vm0 = vmmov 0   ;;  %s1416_s1 = inlined_call_operand.vmem [shape: bf16[1152,128], index: 1, kind: input, shape index: {}]   ;;  %s1417_s0 = inlined_call_operand.vmem [shape: bf16[8,1152], index: 0, kind: input, shape index: {}]   ;;  %s1418_s2 = inlined_call_operand.vmem [shape: f32[1,128], index: 2, kind: input, shape index: {}]   ;;  %s1419_s3 = inlined_call_operand.vmem [shape: f32[1,128], index: 3, kind: input, shape index: {}]   ;;  %s1420_s4 = inlined_call_operand.vmem [shape: bf16[8,128], index: 4, kind: output, shape index: {}]  }
   0x1   :  { %v1068_v0 = vld [vmem:[%s1416_s1 + $0x78] sm:$0xff]   ;;  %v1072_v4 = vld [vmem:[%s1416_s1 + $0x70] sm:$0xff]   ;;  %v1076_v8 = vld [vmem:[%s1416_s1 + $0x68] sm:$0xff]  }
   0x2   :  { %v1069_v1 = vld [vmem:[%s1416_s1 + $0xf8] sm:$0xff]   ;;  %949 = vmatprep.subr.bf16.mxu0 %v1068_v0  ;;  %v1073_v5 = vld [vmem:[%s1416_s1 + $0xf0] sm:$0xff]   ;;  %v1077_v9 = vld [vmem:[%s1416_s1 + $0xe8] sm:$0xff]  }
   0x3   :  { %v1070_v2 = vld [vmem:[%s1416_s1 + $0x38] sm:$0xff]   ;;  %971 = vmatprep.subr.bf16.mxu1 %v1069_v1  ;;  %v1074_v6 = vld [vmem:[%s1416_s1 + $0x30] sm:$0xff]   ;;  %v1078_v10 = vld [vmem:[%s1416_s1 + $0x28] sm:$0xff]  }
   0x4   :  { %v1071_v3 = vld [vmem:[%s1416_s1 + $0xb8] sm:$0xff]   ;;  %950 = vmatpush3.bf16.msra.mxu0 %v1070_v2  ;;  %v1075_v7 = vld [vmem:[%s1416_s1 + $0xb0] sm:$0xff]   ;;  %v1079_v11 = vld [vmem:[%s1416_s1 + $0xa8] sm:$0xff]  }
   0x5   :  { %972 = vmatpush3.bf16.msra.mxu1 %v1071_v3  ;;  %951 = vmatprep.subr.bf16.mxu0 %v1072_v4  ;;  %v1080_v12 = vld [vmem:[%s1416_s1 + $0x60] sm:$0xff]   ;;  %v1084_v16 = vld [vmem:[%s1416_s1 + $0x58] sm:$0xff]   ;;  %v1088_v20 = vld [vmem:[%s1416_s1 + $0x50] sm:$0xff]  }
   0x6   :  { %973 = vmatprep.subr.bf16.mxu1 %v1073_v5  ;;  %v1081_v13 = vld [vmem:[%s1416_s1 + $0xe0] sm:$0xff]   ;;  %v1085_v17 = vld [vmem:[%s1416_s1 + $0xd8] sm:$0xff]   ;;  %v1089_v21 = vld [vmem:[%s1416_s1 + $0xd0] sm:$0xff]  }
   0x7   :  { %v1082_v14 = vld [vmem:[%s1416_s1 + $0x20] sm:$0xff]   ;;  %v1086_v18 = vld [vmem:[%s1416_s1 + $0x18] sm:$0xff]   ;;  %v1090_v22 = vld [vmem:[%s1416_s1 + $0x10] sm:$0xff]  }
   0x8   :  { %952 = vmatpush3.bf16.msra.mxu0 %v1074_v6  ;;  %v1083_v15 = vld [vmem:[%s1416_s1 + $0xa0] sm:$0xff]   ;;  %v1087_v19 = vld [vmem:[%s1416_s1 + $0x98] sm:$0xff]   ;;  %v1091_v23 = vld [vmem:[%s1416_s1 + $0x90] sm:$0xff]  }
   0x9   :  { %974 = vmatpush3.bf16.msra.mxu1 %v1075_v7  ;;  %953 = vmatprep.subr.bf16.mxu0 %v1076_v8  ;;  %v1092_v24 = vld [vmem:[%s1416_s1 + $0x48] sm:$0xff]   ;;  %v1096_v28 = vld [vmem:[%s1416_s1 + $0x40] sm:$0xff]   ;;  %v1104_v38 = vld [vmem:[%s1416_s1 + $0x178] sm:$0xff]  }
   0xa   :  { %975 = vmatprep.subr.bf16.mxu1 %v1077_v9  ;;  %v1093_v25 = vld [vmem:[%s1416_s1 + $0xc8] sm:$0xff]   ;;  %v1097_v29 = vld [vmem:[%s1416_s1 + $0xc0] sm:$0xff]   ;;  %v1105_v39 = vld [vmem:[%s1416_s1 + $0x138] sm:$0xff]  }
   0xb   :  { %v1094_v26 = vld [vmem:[%s1416_s1 + $0x8] sm:$0xff]   ;;  %v1098_v30 = vld [vmem:[%s1416_s1] sm:$0xff]   ;;  %v1106_v40 = vld [vmem:[%s1416_s1 + $0x1f8] sm:$0xff]  }
   0xc   :  { %954 = vmatpush3.bf16.msra.mxu0 %v1078_v10  ;;  %v1095_v27 = vld [vmem:[%s1416_s1 + $0x88] sm:$0xff]   ;;  %v1099_v31 = vld [vmem:[%s1416_s1 + $0x80] sm:$0xff]   ;;  %v1107_v41 = vld [vmem:[%s1416_s1 + $0x1b8] sm:$0xff]  }
   0xd   :  { %976 = vmatpush3.bf16.msra.mxu1 %v1079_v11  ;;  %955 = vmatprep.subr.bf16.mxu0 %v1080_v12  ;;  %v24_v32 = vld [vmem:[%s1417_s0] sm:$0xff]  ;;  %v25_v33 = vld [vmem:[%s1417_s0 + $0x8] sm:$0xff]  ;;  %v1108_v42 = vld [vmem:[%s1416_s1 + $0x170] sm:$0xff]  }
   0xe   :  { %977 = vmatprep.subr.bf16.mxu1 %v1081_v13  ;;  %v866_v34 = vcombine.low %v24_v32, %v24_v32  ;;  %v867_v35 = vcombine.high %v24_v32, %v24_v32  ;;  %v868_v36 = vcombine.low %v25_v33, %v25_v33  ;;  %v869_v37 = vcombine.high %v25_v33, %v25_v33  ;;  %v1109_v43 = vld [vmem:[%s1416_s1 + $0x130] sm:$0xff]   ;;  %v1112_v46 = vld [vmem:[%s1416_s1 + $0x168] sm:$0xff]   ;;  %v1116_v50 = vld [vmem:[%s1416_s1 + $0x160] sm:$0xff]  }
   0xf   :  { %v1110_v44 = vld [vmem:[%s1416_s1 + $0x1f0] sm:$0xff]   ;;  %v1113_v47 = vld [vmem:[%s1416_s1 + $0x128] sm:$0xff]   ;;  %v1117_v51 = vld [vmem:[%s1416_s1 + $0x120] sm:$0xff]   ;;  %v1149_v13 = vmov 0.0  }
  0x10   :  { %956 = vmatpush3.bf16.msra.mxu0 %v1082_v14  ;;  %669 = vmatprep.mubr.bf16.mxu0 %v867_v35  ;;  %v1111_v45 = vld [vmem:[%s1416_s1 + $0x1b0] sm:$0xff]   ;;  %v1114_v48 = vld [vmem:[%s1416_s1 + $0x1e8] sm:$0xff]   ;;  %v1118_v52 = vld [vmem:[%s1416_s1 + $0x1e0] sm:$0xff]  }
  0x11   :  { %978 = vmatpush3.bf16.msra.mxu1 %v1083_v15  ;;  %957 = vmatprep.subr.bf16.mxu0 %v1084_v16  ;;  %v1115_v49 = vld [vmem:[%s1416_s1 + $0x1a8] sm:$0xff]   ;;  %v1119_v53 = vld [vmem:[%s1416_s1 + $0x1a0] sm:$0xff]   ;;  %v1120_v54 = vld [vmem:[%s1416_s1 + $0x158] sm:$0xff]  }
  0x12   :  { %979 = vmatprep.subr.bf16.mxu1 %v1085_v17  ;;  %709 = vmatprep.mubr.bf16.mxu1 %v869_v37  ;;  %v1121_v55 = vld [vmem:[%s1416_s1 + $0x118] sm:$0xff]   ;;  %v1124_v58 = vld [vmem:[%s1416_s1 + $0x150] sm:$0xff]   ;;  %v1128_v62 = vld [vmem:[%s1416_s1 + $0x148] sm:$0xff]  }
  0x13   :  { %v1122_v56 = vld [vmem:[%s1416_s1 + $0x1d8] sm:$0xff]   ;;  %v1125_v59 = vld [vmem:[%s1416_s1 + $0x110] sm:$0xff]   ;;  %v1129_v63 = vld [vmem:[%s1416_s1 + $0x108] sm:$0xff]  }
  0x14   :  { %958 = vmatpush3.bf16.msra.mxu0 %v1086_v18  ;;  %v1123_v57 = vld [vmem:[%s1416_s1 + $0x198] sm:$0xff]   ;;  %v1126_v60 = vld [vmem:[%s1416_s1 + $0x1d0] sm:$0xff]   ;;  %v1130_v0 = vld [vmem:[%s1416_s1 + $0x1c8] sm:$0xff]  }
  0x15   :  { %980 = vmatpush3.bf16.msra.mxu1 %v1087_v19  ;;  %959 = vmatprep.subr.bf16.mxu0 %v1088_v20  ;;  %v1127_v61 = vld [vmem:[%s1416_s1 + $0x190] sm:$0xff]   ;;  %v1131_v1 = vld [vmem:[%s1416_s1 + $0x188] sm:$0xff]   ;;  %v1132_v2 = vld [vmem:[%s1416_s1 + $0x140] sm:$0xff]  }
  0x16   :  { %981 = vmatprep.subr.bf16.mxu1 %v1089_v21  ;;  %v1133_v3 = vld [vmem:[%s1416_s1 + $0x100] sm:$0xff]   ;;  %v26_v5 = vld [vmem:[%s1417_s0 + $0x10] sm:$0xff]  ;;  %v27_v9 = vld [vmem:[%s1417_s0 + $0x18] sm:$0xff] }
  0x17   :  { %v1134_v4 = vld [vmem:[%s1416_s1 + $0x1c0] sm:$0xff]   ;;  %v871_v6 = vcombine.high %v26_v5, %v26_v5  ;;  %v870_v8 = vcombine.low %v26_v5, %v26_v5  ;;  %v872_v10 = vcombine.low %v27_v9, %v27_v9  ;;  %v873_v11 = vcombine.high %v27_v9, %v27_v9  ;;  %v1140_v12 = vld [vmem:[%s1416_s1 + $0x238] sm:$0xff]   ;;  %v1141_v14 = vld [vmem:[%s1416_s1 + $0x230] sm:$0xff]  }
  0x18   :  { %960 = vmatpush3.bf16.msra.mxu0 %v1090_v22  ;;  %v1137_v7 = vld [vmem:[%s1416_s1 + $0x180] sm:$0xff]   ;;  %v1142_v15 = vld [vmem:[%s1416_s1 + $0x228] sm:$0xff]   ;;  %v1144_v17 = vld [vmem:[%s1416_s1 + $0x218] sm:$0xff]  }
  0x19   :  { %982 = vmatpush3.bf16.msra.mxu1 %v1091_v23  ;;  %961 = vmatprep.subr.bf16.mxu0 %v1092_v24  ;;  %v1143_v16 = vld [vmem:[%s1416_s1 + $0x220] sm:$0xff]   ;;  %v1145_v18 = vld [vmem:[%s1416_s1 + $0x210] sm:$0xff]   ;;  %v1146_v19 = vld [vmem:[%s1416_s1 + $0x208] sm:$0xff]  }
  0x1a   :  { %983 = vmatprep.subr.bf16.mxu1 %v1093_v25  ;;  %v1147_v20 = vld [vmem:[%s1416_s1 + $0x200] sm:$0xff]  }
  0x1b   :  { %v1148_v21 = vld [vmem:[%s1417_s0 + $0x20] ss:$0 sps:$4 sm:$0xff]  }
  0x1c   :  { %962 = vmatpush3.bf16.msra.mxu0 %v1094_v26 }
  0x1d   :  { %984 = vmatpush3.bf16.msra.mxu1 %v1095_v27  ;;  %963 = vmatprep.subr.bf16.mxu0 %v1096_v28 }
  0x1e   :  { %985 = vmatprep.subr.bf16.mxu1 %v1097_v29 }
  0x20   :  { %964 = vmatpush3.bf16.msra.mxu0 %v1098_v30 }
  0x21   :  { %986 = vmatpush3.bf16.msra.mxu1 %v1099_v31  ;;  %993 = vmatprep.subr.bf16.mxu0 %v1104_v38 }
  0x22   :  { %1015 = vmatprep.subr.bf16.mxu1 %v1106_v40 }
  0x23   :  { %670 = vmatmul.mubr.bf16.vlgmr.msra.gmra.mxu0 %v866_v34 }
  0x24   :  { %710 = vmatmul.mubr.bf16.vlgmr.msra.gmra.mxu1 %v868_v36  ;;  %994 = vmatpush3.bf16.msra.mxu0 %v1105_v39 }
  0x25   :  { %1016 = vmatpush3.bf16.msra.mxu1 %v1107_v41  ;;  %995 = vmatprep.subr.bf16.mxu0 %v1108_v42 }
  0x26   :  { %1017 = vmatprep.subr.bf16.mxu1 %v1110_v44  ;;  %749 = vmatprep.mubr.bf16.mxu0 %v871_v6 }
  0x27   :  { %789 = vmatprep.mubr.bf16.mxu1 %v873_v11 }
  0x28   :  { %996 = vmatpush3.bf16.msra.mxu0 %v1109_v43 }
  0x29   :  { %1018 = vmatpush3.bf16.msra.mxu1 %v1111_v45  ;;  %997 = vmatprep.subr.bf16.mxu0 %v1112_v46  ;;  %v947_v46 = vld [vmem:[%s1418_s2] ss:$0 sm:$0xff] }
  0x2a   :  { %1019 = vmatprep.subr.bf16.mxu1 %v1114_v48  ;;  %v948_v48 = vld [vmem:[%s1419_s3] ss:$0 sm:$0xff] }
  0x2c   :  { %998 = vmatpush3.bf16.msra.mxu0 %v1113_v47 }
  0x2d   :  { %1020 = vmatpush3.bf16.msra.mxu1 %v1115_v49  ;;  %999 = vmatprep.subr.bf16.mxu0 %v1116_v50 }
  0x2e   :  { %1021 = vmatprep.subr.bf16.mxu1 %v1118_v52 }
  0x30   :  { %1000 = vmatpush3.bf16.msra.mxu0 %v1117_v51 }
  0x31   :  { %1022 = vmatpush3.bf16.msra.mxu1 %v1119_v53  ;;  %1001 = vmatprep.subr.bf16.mxu0 %v1120_v54 }
  0x32   :  { %1023 = vmatprep.subr.bf16.mxu1 %v1122_v56 }
  0x34   :  { %1002 = vmatpush3.bf16.msra.mxu0 %v1121_v55 }
  0x35   :  { %1024 = vmatpush3.bf16.msra.mxu1 %v1123_v57  ;;  %1003 = vmatprep.subr.bf16.mxu0 %v1124_v58 }
  0x36   :  { %1025 = vmatprep.subr.bf16.mxu1 %v1126_v60 }
  0x38   :  { %1004 = vmatpush3.bf16.msra.mxu0 %v1125_v59 }
  0x39   :  { %1026 = vmatpush3.bf16.msra.mxu1 %v1127_v61  ;;  %1005 = vmatprep.subr.bf16.mxu0 %v1128_v62 }
  0x3a   :  { %1027 = vmatprep.subr.bf16.mxu1 %v1130_v0 }
  0x3c   :  { %1006 = vmatpush3.bf16.msra.mxu0 %v1129_v63 }
  0x3d   :  { %1028 = vmatpush3.bf16.msra.mxu1 %v1131_v1  ;;  %1007 = vmatprep.subr.bf16.mxu0 %v1132_v2 }
  0x3e   :  { %1029 = vmatprep.subr.bf16.mxu1 %v1134_v4 }
  0x40   :  { %1008 = vmatpush3.bf16.msra.mxu0 %v1133_v3 }
  0x41   :  { %1030 = vmatpush3.bf16.msra.mxu1 %v1137_v7  ;;  %1046 = vmatprep.subr.bf16.mxu0 %v1149_v13 }
  0x43   :  { %750 = vmatmul.mubr.bf16.vlgmr.msra.gmra.mxu0 %v870_v8 }
  0x44   :  { %1047 = vmatpush3.bf16.msra.mxu0 %v1140_v12  ;;  %790 = vmatmul.mubr.bf16.vlgmr.msra.gmra.mxu1 %v872_v10 }
  0x45   :  { %1048 = vmatprep.subr.bf16.mxu0 %v1149_v13  ;;  %1062 = vmatprep.mubr.msk.bf16.mxu0 %vm1150_vm0, %v1149_v13 }
  0x48   :  { %1049 = vmatpush3.bf16.msra.mxu0 %v1141_v14 }
  0x49   :  { %1050 = vmatprep.subr.bf16.mxu0 %v1149_v13 }
  0x4c   :  { %1051 = vmatpush3.bf16.msra.mxu0 %v1142_v15 }
  0x4d   :  { %1052 = vmatprep.subr.bf16.mxu0 %v1149_v13 }
  0x50   :  { %1053 = vmatpush3.bf16.msra.mxu0 %v1143_v16 }
  0x51   :  { %1054 = vmatprep.subr.bf16.mxu0 %v1149_v13 }
  0x54   :  { %1055 = vmatpush3.bf16.msra.mxu0 %v1144_v17 }
  0x55   :  { %1056 = vmatprep.subr.bf16.mxu0 %v1149_v13 }
  0x58   :  { %1057 = vmatpush3.bf16.msra.mxu0 %v1145_v18 }
  0x59   :  { %1058 = vmatprep.subr.bf16.mxu0 %v1149_v13 }
  0x5c   :  { %1059 = vmatpush3.bf16.msra.mxu0 %v1146_v19 }
  0x5d   :  { %1060 = vmatprep.subr.bf16.mxu0 %v1149_v13 }
  0x60   :  { %1061 = vmatpush3.bf16.msra.mxu0 %v1147_v20 }
  0x63   :  { %1063 = vmatmul.mubr.bf16.vlgmr.msra.gmra.mxu0 %v1148_v21 }
  0xe3   :  { %v965_v22 = vpop.f32.mrf.mxu0 }
  0xe4   :  { %v987_v23 = vpop.f32.mrf.mxu1 }
  0xe5   :  { %v966_v24 = vpop.f32.mrf.mxu0 }
  0xe6   :  { %v988_v25 = vpop.f32.mrf.mxu1  ;;  %v967_v38 = vadd.f32 %v966_v24, %v965_v22 }
  0xe7   :  { %v968_v26 = vpop.f32.mrf.mxu0  ;;  %v989_v39 = vadd.f32 %v988_v25, %v987_v23 }
  0xe8   :  { %v990_v27 = vpop.f32.mrf.mxu1 }
  0xe9   :  { %v969_v28 = vpop.f32.mrf.mxu0  ;;  %v712_v41 = vadd.f32 %v989_v39, %v967_v38 }
  0xea   :  { %v991_v29 = vpop.f32.mrf.mxu1 }
 0x103   :  { %v1009_v30 = vpop.f32.mrf.mxu0 }
 0x104   :  { %v1031_v31 = vpop.f32.mrf.mxu1 }
 0x105   :  { %v1010_v32 = vpop.f32.mrf.mxu0 }
 0x106   :  { %v1032_v33 = vpop.f32.mrf.mxu1  ;;  %v1011_v40 = vadd.f32 %v1010_v32, %v1009_v30 }
 0x107   :  { %v1012_v34 = vpop.f32.mrf.mxu0  ;;  %v1033_v43 = vadd.f32 %v1032_v33, %v1031_v31 }
 0x108   :  { %v1034_v35 = vpop.f32.mrf.mxu1  ;;  %v752_v42 = vadd.f32 %v1011_v40, %v712_v41 }
 0x109   :  { %v1013_v36 = vpop.f32.mrf.mxu0 }
 0x10a   :  { %v1035_v37 = vpop.f32.mrf.mxu1  ;;  %v792_v44 = vadd.f32 %v1033_v43, %v752_v42 }
 0x123   :  { %v831_v45 = vpop.f32.mrf.mxu0 }
 0x124   :  { %v832_v47 = vadd.f32 %v831_v45, %v792_v44 }
 0x125   :  { %v1064_v49 = vpop.f32.mrf.mxu0 }
 0x126   :  { %v850_v50 = vmul.f32 %v947_v46, %v832_v47 }
 0x127   :  { %v834_v51 = vpop.f32.mrf.mxu0 }
 0x128   :  { %v858_v52 = vadd.f32 %v948_v48, %v850_v50 }
 0x129   :  { %v1065_v53 = vpop.f32.mrf.mxu0 }
 0x12a   :  { %v859_v54 = vmax.f32 %v858_v52, 0.0 }
 0x12c   :  { %v860_v55 = vpack.c.bf16 %v859_v54, %v859_v54 }
 0x12e   :  { %861 = vst [vmem:[%s1420_s4] sm:$0xf] %v860_v55 }

// kernel: patch2d_forward.23
= control target key start
LH: loop header
LB: loop body
LE: loop exit
PB: predicated region body
PF: predicated region fallthrough
CT: control target
= control target key end

     0   :  { %v856_v1 = vmov 0   ;;  %vm37_vm0 = vcmask 1043456   ;;  %vm77_vm1 = vcmask 1041409   ;;  %vm674_vm2 = vcmask 254976   ;;  %s1125_s1 = inlined_call_operand.vmem [shape: bf16[128,256], index: 1, kind: input, shape index: {}]   ;;  %s1126_s0 = inlined_call_operand.vmem [shape: bf16[2,4,128], index: 0, kind: input, shape index: {}]   ;;  %s1127_s4 = inlined_call_operand.vmem [shape: bf16[256,256], index: 4, kind: input, shape index: {}]   ;;  %s1128_s7 = inlined_call_operand.vmem [shape: bf16[256,32], index: 7, kind: input, shape index: {}]   ;;  %s1129_s2 = inlined_call_operand.vmem [shape: f32[1,256], index: 2, kind: input, shape index: {}]   ;;  %s1130_s3 = inlined_call_operand.vmem [shape: f32[1,256], index: 3, kind: input, shape index: {}]   ;;  %s1131_s5 = inlined_call_operand.vmem [shape: f32[1,256], index: 5, kind: input, shape index: {}]   ;;  %s1132_s6 = inlined_call_operand.vmem [shape: f32[1,256], index: 6, kind: input, shape index: {}]   ;;  %s1133_s8 = inlined_call_operand.vmem [shape: f32[1,32], index: 8, kind: input, shape index: {}]   ;;  %s1134_s9 = inlined_call_operand.vmem [shape: f32[2,32], index: 9, kind: output, shape index: {}]  }
   0x1   :  { %v768_v0 = vld [vmem:[%s1125_s1 + $0x74] ss:$8 sps:$4 sm:$0xff]   ;;  %193 = vmatprep.mubr.bf16.mxu0 %v856_v1  ;;  %v770_v2 = vld [vmem:[%s1125_s1 + $0x70] ss:$8 sps:$4 sm:$0xff]   ;;  %v771_v3 = vld [vmem:[%s1125_s1 + $0x64] ss:$8 sps:$4 sm:$0xff]  }
   0x2   :  { %161 = vmatprep.subr.bf16.mxu0 %v768_v0  ;;  %v773_v4 = vld [vmem:[%s1125_s1 + $0x60] ss:$8 sps:$4 sm:$0xff]   ;;  %v774_v5 = vld [vmem:[%s1125_s1 + $0x54] ss:$8 sps:$4 sm:$0xff]   ;;  %v776_v6 = vld [vmem:[%s1125_s1 + $0x50] ss:$8 sps:$4 sm:$0xff]  }
   0x3   :  { %162 = vmatpush1.bf16.msra.mxu0 %v770_v2  ;;  %v777_v7 = vld [vmem:[%s1125_s1 + $0x44] ss:$8 sps:$4 sm:$0xff]   ;;  %v779_v8 = vld [vmem:[%s1125_s1 + $0x40] ss:$8 sps:$4 sm:$0xff]   ;;  %v780_v9 = vld [vmem:[%s1125_s1 + $0x34] ss:$8 sps:$4 sm:$0xff]  }
   0x4   :  { %163 = vmatprep.subr.bf16.mxu0 %v771_v3  ;;  %v33_v10 = vld [vmem:[%s1126_s0] sm:$0x3]  ;;  %v34_v11 = vld [vmem:[%s1126_s0 + $0x2] sm:$0x3]  ;;  %v792_v14 = vld [vmem:[%s1127_s4 + $0x74] ss:$8 sps:$4 sm:$0xff]  }
   0x5   :  { %v35_v12 = vunpack.c.l.bf16 %v33_v10  ;;  %v36_v13 = vunpack.c.l.bf16 %v34_v11  ;;  %v794_v15 = vld [vmem:[%s1127_s4 + $0x70] ss:$8 sps:$4 sm:$0xff]   ;;  %v795_v17 = vld [vmem:[%s1127_s4 + $0x64] ss:$8 sps:$4 sm:$0xff]   ;;  %426 = vmatprep.subr.bf16.mxu1 %v792_v14  ;;  %v797_v22 = vld [vmem:[%s1127_s4 + $0x60] ss:$8 sps:$4 sm:$0xff]  }
   0x6   :  { %v782_v18 = vld [vmem:[%s1125_s1 + $0x30] ss:$8 sps:$4 sm:$0xff]   ;;  %427 = vmatpush1.bf16.msra.mxu1 %v794_v15  ;;  %v783_v23 = vld [vmem:[%s1125_s1 + $0x24] ss:$8 sps:$4 sm:$0xff]   ;;  %v798_v25 = vld [vmem:[%s1127_s4 + $0x54] ss:$8 sps:$4 sm:$0xff]  }
   0x7   :  { %164 = vmatpush1.bf16.msra.mxu0 %v773_v4  ;;  %v38_v16 = vsel %vm37_vm0, %v35_v12, 0.0  ;;  %v45_v20 = vsel %vm37_vm0, %v36_v13, 0.0  ;;  %428 = vmatprep.subr.bf16.mxu1 %v795_v17  ;;  %v785_v27 = vld [vmem:[%s1125_s1 + $0x20] ss:$8 sps:$4 sm:$0xff]   ;;  %v800_v30 = vld [vmem:[%s1127_s4 + $0x50] ss:$8 sps:$4 sm:$0xff]  }
   0x8   :  { %165 = vmatprep.subr.bf16.mxu0 %v774_v5  ;;  %v39_v19 = vrot.slane %v38_v16, 4  ;;  %v46_v21 = vrot.slane %v45_v20, 4  ;;  %v786_v31 = vld [vmem:[%s1125_s1 + $0x14] ss:$8 sps:$4 sm:$0xff]   ;;  %v801_v33 = vld [vmem:[%s1127_s4 + $0x44] ss:$8 sps:$4 sm:$0xff]  }
   0x9   :  { %v788_v35 = vld [vmem:[%s1125_s1 + $0x10] ss:$8 sps:$4 sm:$0xff]   ;;  %v803_v38 = vld [vmem:[%s1127_s4 + $0x40] ss:$8 sps:$4 sm:$0xff]   ;;  %v789_v39 = vld [vmem:[%s1125_s1 + $0x4] ss:$8 sps:$4 sm:$0xff]  }
   0xa   :  { %v40_v24 = vadd.f32 %v39_v19, %v38_v16  ;;  %v47_v26 = vadd.f32 %v46_v21, %v45_v20  ;;  %429 = vmatpush1.bf16.msra.mxu1 %v797_v22  ;;  %v804_v41 = vld [vmem:[%s1127_s4 + $0x34] ss:$8 sps:$4 sm:$0xff]   ;;  %v791_v43 = vld [vmem:[%s1125_s1] ss:$8 sps:$4 sm:$0xff]   ;;  %v806_v46 = vld [vmem:[%s1127_s4 + $0x30] ss:$8 sps:$4 sm:$0xff]   ;;  %v204_v21 = vlaneseq }
   0xb   :  { %166 = vmatpush1.bf16.msra.mxu0 %v776_v6  ;;  %430 = vmatprep.subr.bf16.mxu1 %v798_v25  ;;  %v807_v48 = vld [vmem:[%s1127_s4 + $0x24] ss:$8 sps:$4 sm:$0xff]   ;;  %v809_v52 = vld [vmem:[%s1127_s4 + $0x20] ss:$8 sps:$4 sm:$0xff]   ;;  %v810_v53 = vld [vmem:[%s1127_s4 + $0x14] ss:$8 sps:$4 sm:$0xff]  }
   0xc   :  { %167 = vmatprep.subr.bf16.mxu0 %v777_v7  ;;  %v41_v28 = vrot.slane %v40_v24, 2  ;;  %v48_v29 = vrot.slane %v47_v26, 2  ;;  %v812_v56 = vld [vmem:[%s1127_s4 + $0x10] ss:$8 sps:$4 sm:$0xff]   ;;  %v813_v57 = vld [vmem:[%s1127_s4 + $0x4] ss:$8 sps:$4 sm:$0xff]  }
   0xd   :  { %v815_v58 = vld [vmem:[%s1127_s4] ss:$8 sps:$4 sm:$0xff]   ;;  %v816_v59 = vld [vmem:[%s1127_s4 + $0xf4] ss:$8 sps:$4 sm:$0xff]   ;;  %v818_v60 = vld [vmem:[%s1127_s4 + $0xf0] ss:$8 sps:$4 sm:$0xff]  }
   0xe   :  { %v42_v32 = vadd.f32 %v41_v28, %v40_v24  ;;  %v49_v34 = vadd.f32 %v48_v29, %v47_v26  ;;  %431 = vmatpush1.bf16.msra.mxu1 %v800_v30  ;;  %v819_v61 = vld [vmem:[%s1127_s4 + $0xe4] ss:$8 sps:$4 sm:$0xff]   ;;  %v821_v62 = vld [vmem:[%s1127_s4 + $0xe0] ss:$8 sps:$4 sm:$0xff]   ;;  %v822_v63 = vld [vmem:[%s1127_s4 + $0xd4] ss:$8 sps:$4 sm:$0xff]  }
   0xf   :  { %168 = vmatpush1.bf16.msra.mxu0 %v779_v8  ;;  %432 = vmatprep.subr.bf16.mxu1 %v801_v33  ;;  %v824_v0 = vld [vmem:[%s1127_s4 + $0xd0] ss:$8 sps:$4 sm:$0xff]   ;;  %v825_v1 = vld [vmem:[%s1127_s4 + $0xc4] ss:$8 sps:$4 sm:$0xff]   ;;  %v827_v2 = vld [vmem:[%s1127_s4 + $0xc0] ss:$8 sps:$4 sm:$0xff]  }
  0x10   :  { %169 = vmatprep.subr.bf16.mxu0 %v780_v9  ;;  %v43_v36 = vrot.slane %v42_v32, 1  ;;  %v50_v37 = vrot.slane %v49_v34, 1  ;;  %v828_v3 = vld [vmem:[%s1127_s4 + $0xb4] ss:$8 sps:$4 sm:$0xff]   ;;  %v830_v4 = vld [vmem:[%s1127_s4 + $0xb0] ss:$8 sps:$4 sm:$0xff]  }
  0x11   :  { %v831_v5 = vld [vmem:[%s1127_s4 + $0xa4] ss:$8 sps:$4 sm:$0xff]   ;;  %v833_v6 = vld [vmem:[%s1127_s4 + $0xa0] ss:$8 sps:$4 sm:$0xff]   ;;  %v834_v7 = vld [vmem:[%s1127_s4 + $0x94] ss:$8 sps:$4 sm:$0xff]  }
  0x12   :  { %v44_v40 = vadd.f32 %v43_v36, %v42_v32  ;;  %v51_v42 = vadd.f32 %v50_v37, %v49_v34  ;;  %433 = vmatpush1.bf16.msra.mxu1 %v803_v38  ;;  %v836_v8 = vld [vmem:[%s1127_s4 + $0x90] ss:$8 sps:$4 sm:$0xff]   ;;  %v837_v9 = vld [vmem:[%s1127_s4 + $0x84] ss:$8 sps:$4 sm:$0xff]   ;;  %v839_v10 = vld [vmem:[%s1127_s4 + $0x80] ss:$8 sps:$4 sm:$0xff]  }
  0x13   :  { %170 = vmatpush1.bf16.msra.mxu0 %v782_v18  ;;  %434 = vmatprep.subr.bf16.mxu1 %v804_v41  ;;  %v840_v11 = vld [vmem:[%s1128_s7 + $0x78] sm:$0xff]   ;;  %v842_v13 = vld [vmem:[%s1128_s7 + $0x70] sm:$0xff]   ;;  %v844_v15 = vld [vmem:[%s1128_s7 + $0x68] sm:$0xff]   ;;  %v205_v22 = vshrl.u32 %v204_v21, 7 }
  0x14   :  { %171 = vmatprep.subr.bf16.mxu0 %v783_v23  ;;  %v53_v44 = vmul.f32 0.25, %v44_v40  ;;  %v54_v45 = vmul.f32 0.25, %v51_v42  ;;  %v841_v12 = vld [vmem:[%s1128_s7 + $0x38] sm:$0xff]   ;;  %v843_v14 = vld [vmem:[%s1128_s7 + $0x30] sm:$0xff]   ;;  %v845_v16 = vld [vmem:[%s1128_s7 + $0x28] sm:$0xff]  }
  0x15   :  { %v846_v17 = vld [vmem:[%s1128_s7 + $0x60] sm:$0xff]   ;;  %v848_v19 = vld [vmem:[%s1128_s7 + $0x58] sm:$0xff]   ;;  %v206_v23 = vsub.s32 0, %v205_v22  ;;  %v210_v25 = vsub.s32 1, %v205_v22 }
  0x16   :  { %v55_v47 = vpack.c.bf16 %v53_v44, %v53_v44  ;;  %v56_v49 = vpack.c.bf16 %v54_v45, %v54_v45  ;;  %435 = vmatpush1.bf16.msra.mxu1 %v806_v46  ;;  %v847_v18 = vld [vmem:[%s1128_s7 + $0x20] sm:$0xff]   ;;  %v849_v20 = vld [vmem:[%s1128_s7 + $0x18] sm:$0xff]   ;;  %v851_v44 = vld [vmem:[%s1128_s7 + $0x10] sm:$0xff]  }
  0x17   :  { %172 = vmatpush1.bf16.msra.mxu0 %v785_v27  ;;  %436 = vmatprep.subr.bf16.mxu1 %v807_v48  ;;  %v202_v24 = vld [vmem:[%s1129_s2] sm:$0x3]  ;;  %v852_v45 = vld [vmem:[%s1128_s7 + $0x48] sm:$0xff]  }
  0x18   :  { %173 = vmatprep.subr.bf16.mxu0 %v786_v31  ;;  %v75_v50 = vunpack.c.l.b16 %v55_v47  ;;  %v76_v51 = vunpack.c.l.b16 %v56_v49  ;;  %v216_v26 = vld [vmem:[%s1130_s3] sm:$0x3]  ;;  %v207_v27 = vrot.slane %v202_v24, %v206_v23  ;;  %v211_v29 = vrot.slane %v202_v24, %v210_v25  ;;  %v853_v46 = vld [vmem:[%s1128_s7 + $0x8] sm:$0xff]  }
  0x19   :  { %v221_v28 = vrot.slane %v216_v26, %v206_v23  ;;  %v225_v32 = vrot.slane %v216_v26, %v210_v25  ;;  %v854_v47 = vld [vmem:[%s1128_s7 + $0x40] sm:$0xff]  }
  0x1a   :  { %v78_v54 = vsel %vm77_vm1, %v76_v51, %v75_v50  ;;  %437 = vmatpush1.bf16.msra.mxu1 %v809_v52  ;;  %v855_v48 = vld [vmem:[%s1128_s7] sm:$0xff]  }
  0x1b   :  { %174 = vmatpush1.bf16.msra.mxu0 %v788_v35  ;;  %v79_v55 = vpack.c.b16 %v78_v54, %v78_v54  ;;  %438 = vmatprep.subr.bf16.mxu1 %v810_v53  ;;  %v467_v49 = vld [vmem:[%s1131_s5] sm:$0x3] }
  0x1c   :  { %175 = vmatprep.subr.bf16.mxu0 %v789_v39  ;;  %v481_v50 = vld [vmem:[%s1132_s6] sm:$0x3]  ;;  %v472_v51 = vrot.slane %v467_v49, %v206_v23  ;;  %v476_v53 = vrot.slane %v467_v49, %v210_v25 }
  0x1d   :  { %v486_v52 = vrot.slane %v481_v50, %v206_v23 }
  0x1e   :  { %439 = vmatpush1.bf16.msra.mxu1 %v812_v56  ;;  %v490_v56 = vrot.slane %v481_v50, %v210_v25 }
  0x1f   :  { %176 = vmatpush1.bf16.msra.mxu0 %v791_v43  ;;  %440 = vmatprep.subr.bf16.mxu1 %v813_v57  ;;  %v850_v43 = vld [vmem:[%s1128_s7 + $0x50] sm:$0xff]  }
  0x20   :  { %745 = vmatprep.subr.bf16.mxu0 %v840_v11 }
  0x22   :  { %194 = vmatmul.mubr.bf16.vlgmr.msra.gmra.mxu0 %v79_v55  ;;  %441 = vmatpush1.bf16.msra.mxu1 %v815_v58 }
  0x23   :  { %442 = vmatprep.subr.bf16.mxu1 %v816_v59  ;;  %746 = vmatpush3.bf16.msra.mxu0 %v841_v12 }
  0x24   :  { %747 = vmatprep.subr.bf16.mxu0 %v842_v13 }
  0x26   :  { %443 = vmatpush2.bf16.msra.mxu1 %v818_v60 }
  0x27   :  { %444 = vmatprep.subr.bf16.mxu1 %v819_v61  ;;  %748 = vmatpush3.bf16.msra.mxu0 %v843_v14 }
  0x28   :  { %749 = vmatprep.subr.bf16.mxu0 %v844_v15 }
  0x2a   :  { %445 = vmatpush2.bf16.msra.mxu1 %v821_v62 }
  0x2b   :  { %446 = vmatprep.subr.bf16.mxu1 %v822_v63  ;;  %750 = vmatpush3.bf16.msra.mxu0 %v845_v16 }
  0x2c   :  { %751 = vmatprep.subr.bf16.mxu0 %v846_v17 }
  0x2e   :  { %447 = vmatpush2.bf16.msra.mxu1 %v824_v0 }
  0x2f   :  { %448 = vmatprep.subr.bf16.mxu1 %v825_v1  ;;  %752 = vmatpush3.bf16.msra.mxu0 %v847_v18 }
  0x30   :  { %753 = vmatprep.subr.bf16.mxu0 %v848_v19 }
  0x32   :  { %449 = vmatpush2.bf16.msra.mxu1 %v827_v2 }
  0x33   :  { %450 = vmatprep.subr.bf16.mxu1 %v828_v3  ;;  %754 = vmatpush3.bf16.msra.mxu0 %v849_v20 }
  0x34   :  { %755 = vmatprep.subr.bf16.mxu0 %v850_v43 }
  0x36   :  { %451 = vmatpush2.bf16.msra.mxu1 %v830_v4  ;;  %v728_v4 = vld [vmem:[%s1133_s8] ss:$0 sm:$0xff] }
  0x37   :  { %452 = vmatprep.subr.bf16.mxu1 %v831_v5  ;;  %756 = vmatpush3.bf16.msra.mxu0 %v851_v44 }
  0x38   :  { %757 = vmatprep.subr.bf16.mxu0 %v852_v45 }
  0x3a   :  { %453 = vmatpush2.bf16.msra.mxu1 %v833_v6 }
  0x3b   :  { %454 = vmatprep.subr.bf16.mxu1 %v834_v7  ;;  %758 = vmatpush3.bf16.msra.mxu0 %v853_v46 }
  0x3c   :  { %759 = vmatprep.subr.bf16.mxu0 %v854_v47 }
  0x3e   :  { %455 = vmatpush2.bf16.msra.mxu1 %v836_v8 }
  0x3f   :  { %456 = vmatprep.subr.bf16.mxu1 %v837_v9  ;;  %760 = vmatpush3.bf16.msra.mxu0 %v855_v48 }
  0x42   :  { %457 = vmatpush2.bf16.msra.mxu1 %v839_v10 }
  0xe2   :  { %v195_v30 = vpop.f32.mrf.mxu0 }
  0xe3   :  { %v214_v31 = vmul.f32 %v207_v27, %v195_v30 }
  0xe4   :  { %v197_v33 = vpop.f32.mrf.mxu0 }
  0xe5   :  { %v228_v34 = vadd.f32 %v221_v28, %v214_v31  ;;  %v215_v35 = vmul.f32 %v211_v29, %v197_v33 }
  0xe6   :  { %v199_v36 = vpop.f32.mrf.mxu0 }
  0xe7   :  { %v229_v37 = vadd.f32 %v225_v32, %v215_v35  ;;  %v230_v38 = vmax.f32 %v228_v34, 0.0 }
  0xe8   :  { %v200_v39 = vpop.f32.mrf.mxu0 }
  0xe9   :  { %v231_v40 = vmax.f32 %v229_v37, 0.0  ;;  %v232_v42 = vpack.c.bf16 %v230_v38, %v230_v38 }
  0xeb   :  { %v233_v41 = vpack.c.bf16 %v231_v40, %v231_v40 }
  0xed   :  { %458 = vmatprep.mubr.bf16.mxu1 %v233_v41 }
  0xee   :  { %459 = vmatmul.mubr.bf16.vlgmr.msra.gmra.mxu1 %v232_v42 }
 0x1ae   :  { %v460_v54 = vpop.f32.mrf.mxu1 }
 0x1af   :  { %v479_v55 = vmul.f32 %v472_v51, %v460_v54 }
 0x1b0   :  { %v462_v57 = vpop.f32.mrf.mxu1 }
 0x1b1   :  { %v493_v58 = vadd.f32 %v486_v52, %v479_v55  ;;  %v480_v59 = vmul.f32 %v476_v53, %v462_v57 }
 0x1b2   :  { %v464_v60 = vpop.f32.mrf.mxu1 }
 0x1b3   :  { %v494_v61 = vadd.f32 %v490_v56, %v480_v59  ;;  %v495_v62 = vmax.f32 %v493_v58, 0.0 }
 0x1b4   :  { %v465_v63 = vpop.f32.mrf.mxu1 }
 0x1b5   :  { %v496_v0 = vmax.f32 %v494_v61, 0.0  ;;  %v497_v2 = vpack.c.bf16 %v495_v62, %v495_v62 }
 0x1b7   :  { %v498_v1 = vpack.c.bf16 %v496_v0, %v496_v0 }
 0x1b9   :  { %666 = vmatprep.mubr.bf16.mxu0 %v498_v1 }
 0x1ba   :  { %667 = vmatmul.mubr.bf16.vlgmr.msra.gmra.mxu0 %v497_v2 }
 0x27a   :  { %v761_v3 = vpop.f32.mrf.mxu0 }
 0x27c   :  { %v762_v5 = vpop.f32.mrf.mxu0 }
 0x27d   :  { %v763_v6 = vadd.f32 %v762_v5, %v761_v3 }
 0x27e   :  { %v764_v7 = vpop.f32.mrf.mxu0 }
 0x27f   :  { %v669_v8 = vadd.f32 %v763_v6, %v728_v4 }
 0x280   :  { %v765_v9 = vpop.f32.mrf.mxu0 }
 0x281   :  { %675 = vst.msk [vmem:[%s1134_s9] sm:$0x3] %vm674_vm2, %v669_v8 }

</bundles_post_ra>
